<compile_context>
chip_gen: v6e
topology: v6e:2x2x1
jax: 0.10.0
libtpu: 0.0.40
codegen_flags: <defaults>
</compile_context>

<pallas_src>
import functools

import jax
import jax.numpy as jnp
from jax.experimental import pallas as pl
from jax.experimental.pallas import tpu as pltpu

BN_EPS = 1e-5
NEG_SLOPE = 0.2
VMEM_LIMIT = 32 * 1024 * 1024   # explicit scoped-VMEM budget (v5e default: 16 MiB)


def _fit_tile(n, max_tile):
    """Largest power-of-two tile (<= max_tile, >= 8) dividing n, else n."""
    if n <= max_tile:
        return n
    t = max_tile
    while t >= 8:
        if n % t == 0:
            return t
        t //= 2
    return n


# --------------------------------------------------------------------------
# Kernel 1: fused kNN.  score[i, j] = <x_i, x_j> - 0.5*||x_j||^2  (monotone-
# equivalent to the negative squared distance per row), followed by an
# in-kernel iterative top-k (argmax + mask, k passes) that emits int32
# neighbour indices.  The (TN, N) score block never leaves VMEM.
# --------------------------------------------------------------------------
def _make_knn_kernel(k):
    def kernel(xr_ref, xa_ref, hsq_ref, idx_ref):
        scores = jax.lax.dot_general(
            xr_ref[0], xa_ref[0],                       # (TN, C) x (N, C), bf16
            dimension_numbers=(((1,), (1,)), ((), ())),
            preferred_element_type=jnp.float32)         # (TN, N) f32
        d = scores - hsq_ref[0]                         # (1, N) broadcasts over rows
        tn, n = d.shape
        col = jax.lax.broadcasted_iota(jnp.int32, (tn, n), 1)
        colk = jax.lax.broadcasted_iota(jnp.int32, (tn, k), 1)
        out = jnp.zeros((tn, k), jnp.int32)
        for j in range(k):                              # static unroll, k small
            m = jnp.max(d, axis=1, keepdims=True)                        # (TN, 1)
            amax = jnp.min(jnp.where(d == m, col, n), axis=1, keepdims=True)
            out = jnp.where(colk == j, amax, out)
            d = jnp.where(col == amax, -jnp.inf, d)
        idx_ref[0] = out
    return kernel


def knn_indices(feat_bnc, k):
    B, N, C = feat_bnc.shape
    xf = feat_bnc.astype(jnp.float32)
    hsq = 0.5 * jnp.sum(xf * xf, axis=-1).reshape(B, 1, N)
    # keep the in-VMEM (TN, N) score + iota blocks (~2*TN*N*4 B) under ~8 MiB
    tn = _fit_tile(N, min(256, max(8, (1 << 20) // max(N, 1))))
    return pl.pallas_call(
        _make_knn_kernel(k),
        out_shape=jax.ShapeDtypeStruct((B, N, k), jnp.int32),
        grid=(B, N // tn),
        in_specs=[
            pl.BlockSpec((1, tn, C), lambda b, i: (b, i, 0)),   # row tile
            pl.BlockSpec((1, N, C), lambda b, i: (b, 0, 0)),    # all points
            pl.BlockSpec((1, 1, N), lambda b, i: (b, 0, 0)),    # 0.5*||x_j||^2
        ],
        out_specs=pl.BlockSpec((1, tn, k), lambda b, i: (b, i, 0)),
        compiler_params=pltpu.CompilerParams(
            dimension_semantics=("parallel", "parallel"),
            vmem_limit_bytes=VMEM_LIMIT),
    )(feat_bnc, feat_bnc, hsq)


# --------------------------------------------------------------------------
# Kernel 2a (preferred): fused EdgeConv with in-kernel neighbour gather.
#   Z = feat @ W1s                (one matmul per batch, not per neighbour)
#   out[n] = LeakyReLU( max_j Z[idx[n, j]] + feat[n] @ W2s' + b )
# Equivalent to Conv2d(2C -> Cout, 1x1) over cat(f - x, x) + BN + LeakyReLU +
# max over k neighbours (BN scale folded into the weights, LeakyReLU and the
# folded bias hoisted past the max, W2' = W2 - W1 precomputed).
# --------------------------------------------------------------------------
def _make_edge_fused_kernel(k):
    def kernel(feat_ref, idx_ref, w1_ref, w2_ref, b_ref, o_ref):
        feat = feat_ref[0]                                                 # (N, C) bf16
        z = jnp.dot(feat, w1_ref[...], preferred_element_type=jnp.float32)  # (N, Cout)
        idx = idx_ref[0]                                                   # (N, k) i32
        n, cout = z.shape

        def gather(j):
            ind = jnp.broadcast_to(idx[:, j:j + 1], (n, cout))
            return jnp.take_along_axis(z, ind, axis=0, mode="promise_in_bounds")

        acc = gather(0)
        for j in range(1, k):                                              # pure gather+max
            acc = jnp.maximum(acc, gather(j))
        y = acc + jnp.dot(feat, w2_ref[...], preferred_element_type=jnp.float32)
        y = y + b_ref[...]
        o_ref[0] = jnp.maximum(y, NEG_SLOPE * y).astype(o_ref.dtype)
    return kernel


def edge_conv_fused(feat_bnc, idx_bnk, w1s, w2ps, bias):
    B, N, C = feat_bnc.shape
    k = idx_bnk.shape[2]
    Cout = w1s.shape[1]
    return pl.pallas_call(
        _make_edge_fused_kernel(k),
        out_shape=jax.ShapeDtypeStruct((B, N, Cout), jnp.bfloat16),
        grid=(B,),
        in_specs=[
            pl.BlockSpec((1, N, C), lambda b: (b, 0, 0)),
            pl.BlockSpec((1, N, k), lambda b: (b, 0, 0)),
            pl.BlockSpec((C, Cout), lambda b: (0, 0)),
            pl.BlockSpec((C, Cout), lambda b: (0, 0)),
            pl.BlockSpec((1, Cout), lambda b: (0, 0)),
        ],
        out_specs=pl.BlockSpec((1, N, Cout), lambda b: (b, 0, 0)),
        compiler_params=pltpu.CompilerParams(
            dimension_semantics=("parallel",),
            vmem_limit_bytes=VMEM_LIMIT),
    )(feat_bnc, idx_bnk, w1s, w2ps, bias)


# --------------------------------------------------------------------------
# Kernel 2b (fallback, used only if the in-kernel gather does not lower):
# neighbours are gathered by XLA into (B, k, N, C) bf16 and reduced here with
# per-neighbour matmuls; row tiles sized so the f32 running max fits in vregs.
# --------------------------------------------------------------------------
def _edge_gathered_kernel(center_ref, neigh_ref, w1_ref, w2_ref, b_ref, o_ref):
    k = neigh_ref.shape[1]
    w1 = w1_ref[...]
    acc = jnp.dot(neigh_ref[0, 0], w1, preferred_element_type=jnp.float32)
    for j in range(1, k):
        acc = jnp.maximum(
            acc, jnp.dot(neigh_ref[0, j], w1, preferred_element_type=jnp.float32))
    y = acc + jnp.dot(center_ref[0], w2_ref[...], preferred_element_type=jnp.float32)
    y = y + b_ref[...]
    o_ref[0] = jnp.maximum(y, NEG_SLOPE * y).astype(o_ref.dtype)


def edge_conv_gathered(center_bnc, neigh_bknc, w1s, w2ps, bias):
    B, N, C = center_bnc.shape
    k = neigh_bknc.shape[1]
    Cout = w1s.shape[1]
    # keep the running-max accumulator (TN, Cout) f32 within ~128 KiB
    tn = _fit_tile(N, max(8, min(256, (128 * 1024) // (Cout * 4))))
    return pl.pallas_call(
        _edge_gathered_kernel,
        out_shape=jax.ShapeDtypeStruct((B, N, Cout), jnp.bfloat16),
        grid=(B, N // tn),
        in_specs=[
            pl.BlockSpec((1, tn, C), lambda b, i: (b, i, 0)),
            pl.BlockSpec((1, k, tn, C), lambda b, i: (b, 0, i, 0)),
            pl.BlockSpec((C, Cout), lambda b, i: (0, 0)),
            pl.BlockSpec((C, Cout), lambda b, i: (0, 0)),
            pl.BlockSpec((1, Cout), lambda b, i: (0, 0)),
        ],
        out_specs=pl.BlockSpec((1, tn, Cout), lambda b, i: (b, i, 0)),
        compiler_params=pltpu.CompilerParams(
            dimension_semantics=("parallel", "parallel"),
            vmem_limit_bytes=VMEM_LIMIT),
    )(center_bnc, neigh_bknc, w1s, w2ps, bias)


# --------------------------------------------------------------------------
# Probe (runs once, OUTSIDE jit): does Mosaic lower the in-kernel gather?
# --------------------------------------------------------------------------
_FUSED_GATHER_OK = None


def fused_gather_supported(n, k, layer_dims):
    global _FUSED_GATHER_OK
    if _FUSED_GATHER_OK is None:
        try:
            for c, cout in layer_dims:
                feat = jnp.zeros((1, n, c), jnp.bfloat16)
                idx = jnp.zeros((1, n, k), jnp.int32)
                w = jnp.zeros((c, cout), jnp.bfloat16)
                b = jnp.zeros((1, cout), jnp.float32)
                jax.block_until_ready(edge_conv_fused(feat, idx, w, w, b))
            _FUSED_GATHER_OK = True
        except Exception:            # gather lowering unavailable -> fallback path
            _FUSED_GATHER_OK = False
    return _FUSED_GATHER_OK


# --------------------------------------------------------------------------
# Kernel 3: pointwise Conv1d (512 -> EMB) + folded BN + LeakyReLU, tiled over
# rows and the embedding dim.  The 512-channel concat is never materialized.
# --------------------------------------------------------------------------
def _conv5_kernel(x1_ref, x2_ref, x3_ref, x4_ref,
                  wa_ref, wb_ref, wc_ref, wd_ref, b_ref, o_ref):
    y = jnp.dot(x1_ref[0], wa_ref[...], preferred_element_type=jnp.float32)
    y = y + jnp.dot(x2_ref[0], wb_ref[...], preferred_element_type=jnp.float32)
    y = y + jnp.dot(x3_ref[0], wc_ref[...], preferred_element_type=jnp.float32)
    y = y + jnp.dot(x4_ref[0], wd_ref[...], preferred_element_type=jnp.float32)
    y = y + b_ref[...]
    o_ref[0] = jnp.maximum(y, NEG_SLOPE * y).astype(o_ref.dtype)


def pointwise_conv5(x1, x2, x3, x4, wa, wb, wc, wd, bias):
    B, N, _ = x1.shape
    E = wa.shape[1]
    tn = _fit_tile(N, 128)
    te = _fit_tile(E, 256)

    def act_spec(c):
        return pl.BlockSpec((1, tn, c), lambda b, i, e: (b, i, 0))

    def w_spec(c):
        return pl.BlockSpec((c, te), lambda b, i, e: (0, e))

    return pl.pallas_call(
        _conv5_kernel,
        out_shape=jax.ShapeDtypeStruct((B, N, E), jnp.float32),
        grid=(B, N // tn, E // te),
        in_specs=[
            act_spec(x1.shape[2]), act_spec(x2.shape[2]),
            act_spec(x3.shape[2]), act_spec(x4.shape[2]),
            w_spec(x1.shape[2]), w_spec(x2.shape[2]),
            w_spec(x3.shape[2]), w_spec(x4.shape[2]),
            pl.BlockSpec((1, te), lambda b, i, e: (0, e)),
        ],
        out_specs=pl.BlockSpec((1, tn, te), lambda b, i, e: (b, i, e)),
        compiler_params=pltpu.CompilerParams(
            dimension_semantics=("parallel", "parallel", "arbitrary"),
            vmem_limit_bytes=VMEM_LIMIT),
    )(x1, x2, x3, x4, wa, wb, wc, wd, bias)


# --------------------------------------------------------------------------
# Full DGCNN forward
# --------------------------------------------------------------------------
def dgcnn_forward(x_bcn, params, *, k, use_fused_gather=False):
    # x_bcn: (B, 3, N)  (PyTorch NCW).  `use_fused_gather` must be resolved
    # OUTSIDE jit (see fused_gather_supported); it is a static Python bool.
    x_bnc = jnp.transpose(x_bcn, (0, 2, 1)).astype(jnp.bfloat16)   # (B, N, 3)

    def edge_block(feat, layer):
        w1s, w2ps, bias = params[layer]
        idx = knn_indices(feat, k)                                 # (B, N, k) int32
        if use_fused_gather:
            return edge_conv_fused(feat, idx, w1s, w2ps, bias)     # (B, N, Cout) bf16
        # Fallback: gather neighbour rows with XLA, reduce in-kernel.
        neigh = jax.vmap(lambda fb, ib: fb[ib])(
            feat, jnp.transpose(idx, (0, 2, 1)))                   # (B, k, N, C) bf16
        return edge_conv_gathered(feat, neigh, w1s, w2ps, bias)

    x1 = edge_block(x_bnc, "conv1")                                # (B, N, 64)
    x2 = edge_block(x1, "conv2")                                   # (B, N, 64)
    x3 = edge_block(x2, "conv3")                                   # (B, N, 128)
    x4 = edge_block(x3, "conv4")                                   # (B, N, 256)

    feat = pointwise_conv5(x1, x2, x3, x4, *params["conv5"])       # (B, N, EMB) f32
    # TODO(synk): fuse this transpose into conv5 via (1, E_tile, TN) out blocks.
    return jnp.transpose(feat, (0, 2, 1))                          # (B, EMB, N)


# --------------------------------------------------------------------------
# Deterministic parameter init (shapes follow the PyTorch module __init__);
# BN running stats are folded into a per-channel scale/bias, the scale is
# folded into the conv weights, and W2' = W2 - W1 is precomputed.
# --------------------------------------------------------------------------
def _bn_fold(key, c):
    k1, k2, k3, k4 = jax.random.split(key, 4)
    gamma = 1.0 + 0.1 * jax.random.normal(k1, (c,), jnp.float32)
    beta = 0.1 * jax.random.normal(k2, (c,), jnp.float32)
    mean = 0.1 * jax.random.normal(k3, (c,), jnp.float32)
    var = 1.0 + 0.1 * jax.random.uniform(k4, (c,), jnp.float32)
    scale = gamma * jax.lax.rsqrt(var + BN_EPS)
    bias = beta - mean * scale
    return scale.reshape(1, c), bias.reshape(1, c)


EDGE_DIMS = {"conv1": (3, 64),      # Conv2d(6, 64, 1)
             "conv2": (64, 64),     # Conv2d(128, 64, 1)
             "conv3": (64, 128),    # Conv2d(128, 128, 1)
             "conv4": (128, 256)}   # Conv2d(256, 256, 1)


def init_params(key, emb_dim):
    keys = jax.random.split(key, 5)
    params = {}
    for sub, (name, (c, cout)) in zip(keys[:4], EDGE_DIMS.items()):
        kw, kb = jax.random.split(sub)
        w = 0.1 * jax.random.normal(kw, (2 * c, cout), jnp.float32)
        scale, bias = _bn_fold(kb, cout)
        w1 = w[:c]          # acts on (feature - x)
        w2 = w[c:]          # acts on x
        params[name] = ((w1 * scale).astype(jnp.bfloat16),
                        ((w2 - w1) * scale).astype(jnp.bfloat16),
                        bias)
    kw, kb = jax.random.split(keys[4])
    w5 = 0.1 * jax.random.normal(kw, (512, emb_dim), jnp.float32)  # Conv1d(512, E, 1)
    s5, b5 = _bn_fold(kb, emb_dim)
    w5s = w5 * s5
    params["conv5"] = (w5s[0:64].astype(jnp.bfloat16),
                       w5s[64:128].astype(jnp.bfloat16),
                       w5s[128:256].astype(jnp.bfloat16),
                       w5s[256:512].astype(jnp.bfloat16),
                       b5)
    return params


if __name__ == "__main__":
    B, N, K, EMB_DIM = 2, 16, 4, 32
    key = jax.random.PRNGKey(0)
    kx, kp = jax.random.split(key)
    x = jax.random.normal(kx, (B, 3, N), jnp.float32)              # (B, 3, N)
    params = init_params(kp, EMB_DIM)

    # Resolve the gather-lowering capability once, outside jit.
    use_fused = fused_gather_supported(N, K, list(EDGE_DIMS.values()))

    fwd = jax.jit(functools.partial(dgcnn_forward, k=K, use_fused_gather=use_fused))
    out = jax.block_until_ready(fwd(x, params))

    assert out.shape == (B, EMB_DIM, N), out.shape
    assert bool(jnp.all(jnp.isfinite(out)))
    print("KERNEL_OK")
</pallas_src>

<mosaic_0001>
module attributes {stable_mosaic.version = 11 : i64} {
  func.func @kernel(%arg0: i32, %arg1: memref<1x16x3xbf16, #tpu.memory_space<vmem>>, %arg2: memref<1x16x4xi32, #tpu.memory_space<vmem>>, %arg3: memref<3x64xbf16, #tpu.memory_space<vmem>>, %arg4: memref<3x64xbf16, #tpu.memory_space<vmem>>, %arg5: memref<1x64xf32, #tpu.memory_space<vmem>>, %arg6: memref<1x16x64xbf16, #tpu.memory_space<vmem>>) attributes {dimension_semantics = [#tpu.dimension_semantics<parallel>], iteration_bounds = array<i64: 1>, scalar_prefetch = 0 : i64, scratch_operands = 0 : i64, tpu.core_type = #tpu.core_type<tc>, window_params = [{transform_indices = @transform_0, window_bounds = array<i64: 1, 16, 3>}, {transform_indices = @transform_1, window_bounds = array<i64: 1, 16, 4>}, {pipeline_mode = #tpu.pipeline_mode<synchronous>, transform_indices = @transform_2, window_bounds = array<i64: 3, 64>}, {pipeline_mode = #tpu.pipeline_mode<synchronous>, transform_indices = @transform_3, window_bounds = array<i64: 3, 64>}, {pipeline_mode = #tpu.pipeline_mode<synchronous>, transform_indices = @transform_4, window_bounds = array<i64: 1, 64>}, {transform_indices = @transform_5, window_bounds = array<i64: 1, 16, 64>}]} {
    %c0 = arith.constant 0 : index
    %c0_0 = arith.constant 0 : index
    %c0_1 = arith.constant 0 : index
    %0 = vector.load %arg1[%c0, %c0_0, %c0_1] : memref<1x16x3xbf16, #tpu.memory_space<vmem>>, vector<1x16x3xbf16>
    %1 = vector.shape_cast %0 : vector<1x16x3xbf16> to vector<16x3xbf16>
    %c0_2 = arith.constant 0 : index
    %c0_3 = arith.constant 0 : index
    %2 = vector.load %arg3[%c0_2, %c0_3] : memref<3x64xbf16, #tpu.memory_space<vmem>>, vector<3x64xbf16>
    %cst = arith.constant dense<0.000000e+00> : vector<16x64xf32>
    %3 = tpu.matmul %1, %2, %cst {dimension_numbers = #tpu.dot_dimension_numbers<[1], [0], [0], [1], [0, 0, 1, 1], [], []>} : vector<16x3xbf16>, vector<3x64xbf16>, vector<16x64xf32> -> vector<16x64xf32>
    %c0_4 = arith.constant 0 : index
    %c0_5 = arith.constant 0 : index
    %c0_6 = arith.constant 0 : index
    %4 = vector.load %arg2[%c0_4, %c0_5, %c0_6] : memref<1x16x4xi32, #tpu.memory_space<vmem>>, vector<1x16x4xi32>
    %5 = vector.shape_cast %4 : vector<1x16x4xi32> to vector<16x4xi32>
    %6 = vector.extract_strided_slice %5 {offsets = [0, 0], sizes = [16, 1], strides = [1, 1]} : vector<16x4xi32> to vector<16x1xi32>
    %7 = vector.shape_cast %6 : vector<16x1xi32> to vector<16x1xi32>
    %8 = vector.broadcast %7 : vector<16x1xi32> to vector<16x64xi32>
    %9 = vector.shape_cast %8 : vector<16x64xi32> to vector<16x64x1xi32>
    %10 = vector.shape_cast %9 : vector<16x64x1xi32> to vector<16x64xi32>
    %11 = tpu.dynamic_gather %3[%10] in [0] : vector<16x64xf32>, vector<16x64xi32> -> vector<16x64xf32>
    %12 = vector.extract_strided_slice %5 {offsets = [0, 1], sizes = [16, 1], strides = [1, 1]} : vector<16x4xi32> to vector<16x1xi32>
    %13 = vector.shape_cast %12 : vector<16x1xi32> to vector<16x1xi32>
    %14 = vector.broadcast %13 : vector<16x1xi32> to vector<16x64xi32>
    %15 = vector.shape_cast %14 : vector<16x64xi32> to vector<16x64x1xi32>
    %16 = vector.shape_cast %15 : vector<16x64x1xi32> to vector<16x64xi32>
    %17 = tpu.dynamic_gather %3[%16] in [0] : vector<16x64xf32>, vector<16x64xi32> -> vector<16x64xf32>
    %18 = arith.maximumf %11, %17 : vector<16x64xf32>
    %19 = vector.extract_strided_slice %5 {offsets = [0, 2], sizes = [16, 1], strides = [1, 1]} : vector<16x4xi32> to vector<16x1xi32>
    %20 = vector.shape_cast %19 : vector<16x1xi32> to vector<16x1xi32>
    %21 = vector.broadcast %20 : vector<16x1xi32> to vector<16x64xi32>
    %22 = vector.shape_cast %21 : vector<16x64xi32> to vector<16x64x1xi32>
    %23 = vector.shape_cast %22 : vector<16x64x1xi32> to vector<16x64xi32>
    %24 = tpu.dynamic_gather %3[%23] in [0] : vector<16x64xf32>, vector<16x64xi32> -> vector<16x64xf32>
    %25 = arith.maximumf %18, %24 : vector<16x64xf32>
    %26 = vector.extract_strided_slice %5 {offsets = [0, 3], sizes = [16, 1], strides = [1, 1]} : vector<16x4xi32> to vector<16x1xi32>
    %27 = vector.shape_cast %26 : vector<16x1xi32> to vector<16x1xi32>
    %28 = vector.broadcast %27 : vector<16x1xi32> to vector<16x64xi32>
    %29 = vector.shape_cast %28 : vector<16x64xi32> to vector<16x64x1xi32>
    %30 = vector.shape_cast %29 : vector<16x64x1xi32> to vector<16x64xi32>
    %31 = tpu.dynamic_gather %3[%30] in [0] : vector<16x64xf32>, vector<16x64xi32> -> vector<16x64xf32>
    %32 = arith.maximumf %25, %31 : vector<16x64xf32>
    %c0_7 = arith.constant 0 : index
    %c0_8 = arith.constant 0 : index
    %33 = vector.load %arg4[%c0_7, %c0_8] : memref<3x64xbf16, #tpu.memory_space<vmem>>, vector<3x64xbf16>
    %cst_9 = arith.constant dense<0.000000e+00> : vector<16x64xf32>
    %34 = tpu.matmul %1, %33, %cst_9 {dimension_numbers = #tpu.dot_dimension_numbers<[1], [0], [0], [1], [0, 0, 1, 1], [], []>} : vector<16x3xbf16>, vector<3x64xbf16>, vector<16x64xf32> -> vector<16x64xf32>
    %35 = arith.addf %32, %34 : vector<16x64xf32>
    %c0_10 = arith.constant 0 : index
    %c0_11 = arith.constant 0 : index
    %36 = vector.load %arg5[%c0_10, %c0_11] : memref<1x64xf32, #tpu.memory_space<vmem>>, vector<1x64xf32>
    %37 = vector.broadcast %36 : vector<1x64xf32> to vector<16x64xf32>
    %38 = arith.addf %35, %37 : vector<16x64xf32>
    %cst_12 = arith.constant 2.000000e-01 : f32
    %39 = vector.broadcast %cst_12 : f32 to vector<16x64xf32>
    %40 = arith.mulf %39, %38 : vector<16x64xf32>
    %41 = arith.maximumf %38, %40 : vector<16x64xf32>
    %42 = arith.truncf %41 : vector<16x64xf32> to vector<16x64xbf16>
    %c0_13 = arith.constant 0 : index
    %c0_14 = arith.constant 0 : index
    %c0_15 = arith.constant 0 : index
    %43 = vector.load %arg6[%c0_13, %c0_14, %c0_15] : memref<1x16x64xbf16, #tpu.memory_space<vmem>>, vector<1x16x64xbf16>
    %44 = vector.shape_cast %43 : vector<1x16x64xbf16> to vector<16x64xbf16>
    %45 = vector.shape_cast %42 : vector<16x64xbf16> to vector<1x16x64xbf16>
    tpu.vector_store %arg6[%c0_13, %c0_14, %c0_15], %45 {strides = array<i32>} : memref<1x16x64xbf16, #tpu.memory_space<vmem>>, vector<1x16x64xbf16>,
    return
  }
  func.func @transform_0(%arg0: i32) -> (i32, i32, i32) {
    %c0_i32 = arith.constant 0 : i32
    %c0_i32_0 = arith.constant 0 : i32
    %c0_i32_1 = arith.constant 0 : i32
    return %arg0, %c0_i32, %c0_i32_0 : i32, i32, i32
  }
  func.func @transform_1(%arg0: i32) -> (i32, i32, i32) {
    %c0_i32 = arith.constant 0 : i32
    %c0_i32_0 = arith.constant 0 : i32
    %c0_i32_1 = arith.constant 0 : i32
    return %arg0, %c0_i32, %c0_i32_0 : i32, i32, i32
  }
  func.func @transform_2(%arg0: i32) -> (i32, i32) {
    %c0_i32 = arith.constant 0 : i32
    %c0_i32_0 = arith.constant 0 : i32
    %c0_i32_1 = arith.constant 0 : i32
    return %c0_i32, %c0_i32_0 : i32, i32
  }
  func.func @transform_3(%arg0: i32) -> (i32, i32) {
    %c0_i32 = arith.constant 0 : i32
    %c0_i32_0 = arith.constant 0 : i32
    %c0_i32_1 = arith.constant 0 : i32
    return %c0_i32, %c0_i32_0 : i32, i32
  }
  func.func @transform_4(%arg0: i32) -> (i32, i32) {
    %c0_i32 = arith.constant 0 : i32
    %c0_i32_0 = arith.constant 0 : i32
    %c0_i32_1 = arith.constant 0 : i32
    return %c0_i32, %c0_i32_0 : i32, i32
  }
  func.func @transform_5(%arg0: i32) -> (i32, i32, i32) {
    %c0_i32 = arith.constant 0 : i32
    %c0_i32_0 = arith.constant 0 : i32
    %c0_i32_1 = arith.constant 0 : i32
    return %arg0, %c0_i32, %c0_i32_0 : i32, i32, i32
  }
}

module attributes {stable_mosaic.version = 11 : i64} {
  func.func @kernel(%arg0: i32, %arg1: i32, %arg2: memref<1x16x3xbf16, #tpu.memory_space<vmem>>, %arg3: memref<1x16x3xbf16, #tpu.memory_space<vmem>>, %arg4: memref<1x1x16xf32, #tpu.memory_space<vmem>>, %arg5: memref<1x16x4xi32, #tpu.memory_space<vmem>>) attributes {dimension_semantics = [#tpu.dimension_semantics<parallel>, #tpu.dimension_semantics<parallel>], iteration_bounds = array<i64: 2, 1>, scalar_prefetch = 0 : i64, scratch_operands = 0 : i64, tpu.core_type = #tpu.core_type<tc>, window_params = [{transform_indices = @transform_0, window_bounds = array<i64: 1, 16, 3>}, {transform_indices = @transform_1, window_bounds = array<i64: 1, 16, 3>}, {transform_indices = @transform_2, window_bounds = array<i64: 1, 1, 16>}, {transform_indices = @transform_3, window_bounds = array<i64: 1, 16, 4>}]} {
    %c0 = arith.constant 0 : index
    %c0_0 = arith.constant 0 : index
    %c0_1 = arith.constant 0 : index
    %0 = vector.load %arg2[%c0, %c0_0, %c0_1] : memref<1x16x3xbf16, #tpu.memory_space<vmem>>, vector<1x16x3xbf16>
    %1 = vector.shape_cast %0 : vector<1x16x3xbf16> to vector<16x3xbf16>
    %c0_2 = arith.constant 0 : index
    %c0_3 = arith.constant 0 : index
    %c0_4 = arith.constant 0 : index
    %2 = vector.load %arg3[%c0_2, %c0_3, %c0_4] : memref<1x16x3xbf16, #tpu.memory_space<vmem>>, vector<1x16x3xbf16>
    %3 = vector.shape_cast %2 : vector<1x16x3xbf16> to vector<16x3xbf16>
    %cst = arith.constant dense<0.000000e+00> : vector<16x16xf32>
    %4 = tpu.matmul %1, %3, %cst {dimension_numbers = #tpu.dot_dimension_numbers<[1], [1], [0], [0], [0, 0, 1, 0], [], []>} : vector<16x3xbf16>, vector<16x3xbf16>, vector<16x16xf32> -> vector<16x16xf32>
    %c0_5 = arith.constant 0 : index
    %c0_6 = arith.constant 0 : index
    %c0_7 = arith.constant 0 : index
    %5 = vector.load %arg4[%c0_5, %c0_6, %c0_7] : memref<1x1x16xf32, #tpu.memory_space<vmem>>, vector<1x1x16xf32>
    %6 = vector.shape_cast %5 : vector<1x1x16xf32> to vector<1x16xf32>
    %7 = vector.broadcast %6 : vector<1x16xf32> to vector<16x16xf32>
    %8 = arith.subf %4, %7 : vector<16x16xf32>
    %9 = tpu.iota {dimensions = array<i32: 1>} : vector<16x16xi32>
    %10 = tpu.iota {dimensions = array<i32: 1>} : vector<16x4xi32>
    %c0_i32 = arith.constant 0 : i32
    %11 = vector.broadcast %c0_i32 : i32 to vector<16x4xi32>
    %cst_8 = arith.constant dense<0xFF800000> : vector<16xf32>
    %12 = vector.multi_reduction <maximumf>, %8, %cst_8 [1] : vector<16x16xf32> to vector<16xf32>
    %13 = vector.shape_cast %12 : vector<16xf32> to vector<16x1xf32>
    %14 = vector.broadcast %13 : vector<16x1xf32> to vector<16x16xf32>
    %15 = arith.cmpf oeq, %8, %14 : vector<16x16xf32>
    %c16_i32 = arith.constant 16 : i32
    %16 = vector.broadcast %c16_i32 : i32 to vector<16x16xi32>
    %17 = arith.select %15, %9, %16 : vector<16x16xi1>, vector<16x16xi32>
    %cst_9 = arith.constant dense<2147483647> : vector<16xi32>
    %18 = vector.multi_reduction <minsi>, %17, %cst_9 [1] : vector<16x16xi32> to vector<16xi32>
    %19 = vector.shape_cast %18 : vector<16xi32> to vector<16x1xi32>
    %c0_i32_10 = arith.constant 0 : i32
    %20 = vector.broadcast %c0_i32_10 : i32 to vector<16x4xi32>
    %21 = arith.cmpi eq, %10, %20 : vector<16x4xi32>
    %22 = vector.shape_cast %19 : vector<16x1xi32> to vector<16x1xi32>
    %23 = vector.broadcast %22 : vector<16x1xi32> to vector<16x4xi32>
    %24 = arith.select %21, %23, %11 : vector<16x4xi1>, vector<16x4xi32>
    %25 = vector.broadcast %19 : vector<16x1xi32> to vector<16x16xi32>
    %26 = arith.cmpi eq, %9, %25 : vector<16x16xi32>
    %cst_11 = arith.constant 0xFF800000 : f32
    %27 = vector.broadcast %cst_11 : f32 to vector<16x16xf32>
    %28 = arith.select %26, %27, %8 : vector<16x16xi1>, vector<16x16xf32>
    %cst_12 = arith.constant dense<0xFF800000> : vector<16xf32>
    %29 = vector.multi_reduction <maximumf>, %28, %cst_12 [1] : vector<16x16xf32> to vector<16xf32>
    %30 = vector.shape_cast %29 : vector<16xf32> to vector<16x1xf32>
    %31 = vector.broadcast %30 : vector<16x1xf32> to vector<16x16xf32>
    %32 = arith.cmpf oeq, %28, %31 : vector<16x16xf32>
    %c16_i32_13 = arith.constant 16 : i32
    %33 = vector.broadcast %c16_i32_13 : i32 to vector<16x16xi32>
    %34 = arith.select %32, %9, %33 : vector<16x16xi1>, vector<16x16xi32>
    %cst_14 = arith.constant dense<2147483647> : vector<16xi32>
    %35 = vector.multi_reduction <minsi>, %34, %cst_14 [1] : vector<16x16xi32> to vector<16xi32>
    %36 = vector.shape_cast %35 : vector<16xi32> to vector<16x1xi32>
    %c1_i32 = arith.constant 1 : i32
    %37 = vector.broadcast %c1_i32 : i32 to vector<16x4xi32>
    %38 = arith.cmpi eq, %10, %37 : vector<16x4xi32>
    %39 = vector.shape_cast %36 : vector<16x1xi32> to vector<16x1xi32>
    %40 = vector.broadcast %39 : vector<16x1xi32> to vector<16x4xi32>
    %41 = arith.select %38, %40, %24 : vector<16x4xi1>, vector<16x4xi32>
    %42 = vector.broadcast %36 : vector<16x1xi32> to vector<16x16xi32>
    %43 = arith.cmpi eq, %9, %42 : vector<16x16xi32>
    %cst_15 = arith.constant 0xFF800000 : f32
    %44 = vector.broadcast %cst_15 : f32 to vector<16x16xf32>
    %45 = arith.select %43, %44, %28 : vector<16x16xi1>, vector<16x16xf32>
    %cst_16 = arith.constant dense<0xFF800000> : vector<16xf32>
    %46 = vector.multi_reduction <maximumf>, %45, %cst_16 [1] : vector<16x16xf32> to vector<16xf32>
    %47 = vector.shape_cast %46 : vector<16xf32> to vector<16x1xf32>
    %48 = vector.broadcast %47 : vector<16x1xf32> to vector<16x16xf32>
    %49 = arith.cmpf oeq, %45, %48 : vector<16x16xf32>
    %c16_i32_17 = arith.constant 16 : i32
    %50 = vector.broadcast %c16_i32_17 : i32 to vector<16x16xi32>
    %51 = arith.select %49, %9, %50 : vector<16x16xi1>, vector<16x16xi32>
    %cst_18 = arith.constant dense<2147483647> : vector<16xi32>
    %52 = vector.multi_reduction <minsi>, %51, %cst_18 [1] : vector<16x16xi32> to vector<16xi32>
    %53 = vector.shape_cast %52 : vector<16xi32> to vector<16x1xi32>
    %c2_i32 = arith.constant 2 : i32
    %54 = vector.broadcast %c2_i32 : i32 to vector<16x4xi32>
    %55 = arith.cmpi eq, %10, %54 : vector<16x4xi32>
    %56 = vector.shape_cast %53 : vector<16x1xi32> to vector<16x1xi32>
    %57 = vector.broadcast %56 : vector<16x1xi32> to vector<16x4xi32>
    %58 = arith.select %55, %57, %41 : vector<16x4xi1>, vector<16x4xi32>
    %59 = vector.broadcast %53 : vector<16x1xi32> to vector<16x16xi32>
    %60 = arith.cmpi eq, %9, %59 : vector<16x16xi32>
    %cst_19 = arith.constant 0xFF800000 : f32
    %61 = vector.broadcast %cst_19 : f32 to vector<16x16xf32>
    %62 = arith.select %60, %61, %45 : vector<16x16xi1>, vector<16x16xf32>
    %cst_20 = arith.constant dense<0xFF800000> : vector<16xf32>
    %63 = vector.multi_reduction <maximumf>, %62, %cst_20 [1] : vector<16x16xf32> to vector<16xf32>
    %64 = vector.shape_cast %63 : vector<16xf32> to vector<16x1xf32>
    %65 = vector.broadcast %64 : vector<16x1xf32> to vector<16x16xf32>
    %66 = arith.cmpf oeq, %62, %65 : vector<16x16xf32>
    %c16_i32_21 = arith.constant 16 : i32
    %67 = vector.broadcast %c16_i32_21 : i32 to vector<16x16xi32>
    %68 = arith.select %66, %9, %67 : vector<16x16xi1>, vector<16x16xi32>
    %cst_22 = arith.constant dense<2147483647> : vector<16xi32>
    %69 = vector.multi_reduction <minsi>, %68, %cst_22 [1] : vector<16x16xi32> to vector<16xi32>
    %70 = vector.shape_cast %69 : vector<16xi32> to vector<16x1xi32>
    %c3_i32 = arith.constant 3 : i32
    %71 = vector.broadcast %c3_i32 : i32 to vector<16x4xi32>
    %72 = arith.cmpi eq, %10, %71 : vector<16x4xi32>
    %73 = vector.shape_cast %70 : vector<16x1xi32> to vector<16x1xi32>
    %74 = vector.broadcast %73 : vector<16x1xi32> to vector<16x4xi32>
    %75 = arith.select %72, %74, %58 : vector<16x4xi1>, vector<16x4xi32>
    %c0_23 = arith.constant 0 : index
    %c0_24 = arith.constant 0 : index
    %c0_25 = arith.constant 0 : index
    %76 = vector.load %arg5[%c0_23, %c0_24, %c0_25] : memref<1x16x4xi32, #tpu.memory_space<vmem>>, vector<1x16x4xi32>
    %77 = vector.shape_cast %76 : vector<1x16x4xi32> to vector<16x4xi32>
    %78 = vector.shape_cast %75 : vector<16x4xi32> to vector<1x16x4xi32>
    tpu.vector_store %arg5[%c0_23, %c0_24, %c0_25], %78 {strides = array<i32>} : memref<1x16x4xi32, #tpu.memory_space<vmem>>, vector<1x16x4xi32>,
    return
  }
  func.func @transform_0(%arg0: i32, %arg1: i32) -> (i32, i32, i32) {
    %c0_i32 = arith.constant 0 : i32
    %c0_i32_0 = arith.constant 0 : i32
    return %arg0, %arg1, %c0_i32 : i32, i32, i32
  }
  func.func @transform_1(%arg0: i32, %arg1: i32) -> (i32, i32, i32) {
    %c0_i32 = arith.constant 0 : i32
    %c0_i32_0 = arith.constant 0 : i32
    %c0_i32_1 = arith.constant 0 : i32
    return %arg0, %c0_i32, %c0_i32_0 : i32, i32, i32
  }
  func.func @transform_2(%arg0: i32, %arg1: i32) -> (i32, i32, i32) {
    %c0_i32 = arith.constant 0 : i32
    %c0_i32_0 = arith.constant 0 : i32
    %c0_i32_1 = arith.constant 0 : i32
    return %arg0, %c0_i32, %c0_i32_0 : i32, i32, i32
  }
  func.func @transform_3(%arg0: i32, %arg1: i32) -> (i32, i32, i32) {
    %c0_i32 = arith.constant 0 : i32
    %c0_i32_0 = arith.constant 0 : i32
    return %arg0, %arg1, %c0_i32 : i32, i32, i32
  }
}

module attributes {stable_mosaic.version = 11 : i64} {
  func.func @kernel(%arg0: i32, %arg1: i32, %arg2: memref<1x16x64xbf16, #tpu.memory_space<vmem>>, %arg3: memref<1x16x64xbf16, #tpu.memory_space<vmem>>, %arg4: memref<1x1x16xf32, #tpu.memory_space<vmem>>, %arg5: memref<1x16x4xi32, #tpu.memory_space<vmem>>) attributes {dimension_semantics = [#tpu.dimension_semantics<parallel>, #tpu.dimension_semantics<parallel>], iteration_bounds = array<i64: 2, 1>, scalar_prefetch = 0 : i64, scratch_operands = 0 : i64, tpu.core_type = #tpu.core_type<tc>, window_params = [{transform_indices = @transform_0, window_bounds = array<i64: 1, 16, 64>}, {transform_indices = @transform_1, window_bounds = array<i64: 1, 16, 64>}, {transform_indices = @transform_2, window_bounds = array<i64: 1, 1, 16>}, {transform_indices = @transform_3, window_bounds = array<i64: 1, 16, 4>}]} {
    %c0 = arith.constant 0 : index
    %c0_0 = arith.constant 0 : index
    %c0_1 = arith.constant 0 : index
    %0 = vector.load %arg2[%c0, %c0_0, %c0_1] : memref<1x16x64xbf16, #tpu.memory_space<vmem>>, vector<1x16x64xbf16>
    %1 = vector.shape_cast %0 : vector<1x16x64xbf16> to vector<16x64xbf16>
    %c0_2 = arith.constant 0 : index
    %c0_3 = arith.constant 0 : index
    %c0_4 = arith.constant 0 : index
    %2 = vector.load %arg3[%c0_2, %c0_3, %c0_4] : memref<1x16x64xbf16, #tpu.memory_space<vmem>>, vector<1x16x64xbf16>
    %3 = vector.shape_cast %2 : vector<1x16x64xbf16> to vector<16x64xbf16>
    %cst = arith.constant dense<0.000000e+00> : vector<16x16xf32>
    %4 = tpu.matmul %1, %3, %cst {dimension_numbers = #tpu.dot_dimension_numbers<[1], [1], [0], [0], [0, 0, 1, 0], [], []>} : vector<16x64xbf16>, vector<16x64xbf16>, vector<16x16xf32> -> vector<16x16xf32>
    %c0_5 = arith.constant 0 : index
    %c0_6 = arith.constant 0 : index
    %c0_7 = arith.constant 0 : index
    %5 = vector.load %arg4[%c0_5, %c0_6, %c0_7] : memref<1x1x16xf32, #tpu.memory_space<vmem>>, vector<1x1x16xf32>
    %6 = vector.shape_cast %5 : vector<1x1x16xf32> to vector<1x16xf32>
    %7 = vector.broadcast %6 : vector<1x16xf32> to vector<16x16xf32>
    %8 = arith.subf %4, %7 : vector<16x16xf32>
    %9 = tpu.iota {dimensions = array<i32: 1>} : vector<16x16xi32>
    %10 = tpu.iota {dimensions = array<i32: 1>} : vector<16x4xi32>
    %c0_i32 = arith.constant 0 : i32
    %11 = vector.broadcast %c0_i32 : i32 to vector<16x4xi32>
    %cst_8 = arith.constant dense<0xFF800000> : vector<16xf32>
    %12 = vector.multi_reduction <maximumf>, %8, %cst_8 [1] : vector<16x16xf32> to vector<16xf32>
    %13 = vector.shape_cast %12 : vector<16xf32> to vector<16x1xf32>
    %14 = vector.broadcast %13 : vector<16x1xf32> to vector<16x16xf32>
    %15 = arith.cmpf oeq, %8, %14 : vector<16x16xf32>
    %c16_i32 = arith.constant 16 : i32
    %16 = vector.broadcast %c16_i32 : i32 to vector<16x16xi32>
    %17 = arith.select %15, %9, %16 : vector<16x16xi1>, vector<16x16xi32>
    %cst_9 = arith.constant dense<2147483647> : vector<16xi32>
    %18 = vector.multi_reduction <minsi>, %17, %cst_9 [1] : vector<16x16xi32> to vector<16xi32>
    %19 = vector.shape_cast %18 : vector<16xi32> to vector<16x1xi32>
    %c0_i32_10 = arith.constant 0 : i32
    %20 = vector.broadcast %c0_i32_10 : i32 to vector<16x4xi32>
    %21 = arith.cmpi eq, %10, %20 : vector<16x4xi32>
    %22 = vector.shape_cast %19 : vector<16x1xi32> to vector<16x1xi32>
    %23 = vector.broadcast %22 : vector<16x1xi32> to vector<16x4xi32>
    %24 = arith.select %21, %23, %11 : vector<16x4xi1>, vector<16x4xi32>
    %25 = vector.broadcast %19 : vector<16x1xi32> to vector<16x16xi32>
    %26 = arith.cmpi eq, %9, %25 : vector<16x16xi32>
    %cst_11 = arith.constant 0xFF800000 : f32
    %27 = vector.broadcast %cst_11 : f32 to vector<16x16xf32>
    %28 = arith.select %26, %27, %8 : vector<16x16xi1>, vector<16x16xf32>
    %cst_12 = arith.constant dense<0xFF800000> : vector<16xf32>
    %29 = vector.multi_reduction <maximumf>, %28, %cst_12 [1] : vector<16x16xf32> to vector<16xf32>
    %30 = vector.shape_cast %29 : vector<16xf32> to vector<16x1xf32>
    %31 = vector.broadcast %30 : vector<16x1xf32> to vector<16x16xf32>
    %32 = arith.cmpf oeq, %28, %31 : vector<16x16xf32>
    %c16_i32_13 = arith.constant 16 : i32
    %33 = vector.broadcast %c16_i32_13 : i32 to vector<16x16xi32>
    %34 = arith.select %32, %9, %33 : vector<16x16xi1>, vector<16x16xi32>
    %cst_14 = arith.constant dense<2147483647> : vector<16xi32>
    %35 = vector.multi_reduction <minsi>, %34, %cst_14 [1] : vector<16x16xi32> to vector<16xi32>
    %36 = vector.shape_cast %35 : vector<16xi32> to vector<16x1xi32>
    %c1_i32 = arith.constant 1 : i32
    %37 = vector.broadcast %c1_i32 : i32 to vector<16x4xi32>
    %38 = arith.cmpi eq, %10, %37 : vector<16x4xi32>
    %39 = vector.shape_cast %36 : vector<16x1xi32> to vector<16x1xi32>
    %40 = vector.broadcast %39 : vector<16x1xi32> to vector<16x4xi32>
    %41 = arith.select %38, %40, %24 : vector<16x4xi1>, vector<16x4xi32>
    %42 = vector.broadcast %36 : vector<16x1xi32> to vector<16x16xi32>
    %43 = arith.cmpi eq, %9, %42 : vector<16x16xi32>
    %cst_15 = arith.constant 0xFF800000 : f32
    %44 = vector.broadcast %cst_15 : f32 to vector<16x16xf32>
    %45 = arith.select %43, %44, %28 : vector<16x16xi1>, vector<16x16xf32>
    %cst_16 = arith.constant dense<0xFF800000> : vector<16xf32>
    %46 = vector.multi_reduction <maximumf>, %45, %cst_16 [1] : vector<16x16xf32> to vector<16xf32>
    %47 = vector.shape_cast %46 : vector<16xf32> to vector<16x1xf32>
    %48 = vector.broadcast %47 : vector<16x1xf32> to vector<16x16xf32>
    %49 = arith.cmpf oeq, %45, %48 : vector<16x16xf32>
    %c16_i32_17 = arith.constant 16 : i32
    %50 = vector.broadcast %c16_i32_17 : i32 to vector<16x16xi32>
    %51 = arith.select %49, %9, %50 : vector<16x16xi1>, vector<16x16xi32>
    %cst_18 = arith.constant dense<2147483647> : vector<16xi32>
    %52 = vector.multi_reduction <minsi>, %51, %cst_18 [1] : vector<16x16xi32> to vector<16xi32>
    %53 = vector.shape_cast %52 : vector<16xi32> to vector<16x1xi32>
    %c2_i32 = arith.constant 2 : i32
    %54 = vector.broadcast %c2_i32 : i32 to vector<16x4xi32>
    %55 = arith.cmpi eq, %10, %54 : vector<16x4xi32>
    %56 = vector.shape_cast %53 : vector<16x1xi32> to vector<16x1xi32>
    %57 = vector.broadcast %56 : vector<16x1xi32> to vector<16x4xi32>
    %58 = arith.select %55, %57, %41 : vector<16x4xi1>, vector<16x4xi32>
    %59 = vector.broadcast %53 : vector<16x1xi32> to vector<16x16xi32>
    %60 = arith.cmpi eq, %9, %59 : vector<16x16xi32>
    %cst_19 = arith.constant 0xFF800000 : f32
    %61 = vector.broadcast %cst_19 : f32 to vector<16x16xf32>
    %62 = arith.select %60, %61, %45 : vector<16x16xi1>, vector<16x16xf32>
    %cst_20 = arith.constant dense<0xFF800000> : vector<16xf32>
    %63 = vector.multi_reduction <maximumf>, %62, %cst_20 [1] : vector<16x16xf32> to vector<16xf32>
    %64 = vector.shape_cast %63 : vector<16xf32> to vector<16x1xf32>
    %65 = vector.broadcast %64 : vector<16x1xf32> to vector<16x16xf32>
    %66 = arith.cmpf oeq, %62, %65 : vector<16x16xf32>
    %c16_i32_21 = arith.constant 16 : i32
    %67 = vector.broadcast %c16_i32_21 : i32 to vector<16x16xi32>
    %68 = arith.select %66, %9, %67 : vector<16x16xi1>, vector<16x16xi32>
    %cst_22 = arith.constant dense<2147483647> : vector<16xi32>
    %69 = vector.multi_reduction <minsi>, %68, %cst_22 [1] : vector<16x16xi32> to vector<16xi32>
    %70 = vector.shape_cast %69 : vector<16xi32> to vector<16x1xi32>
    %c3_i32 = arith.constant 3 : i32
    %71 = vector.broadcast %c3_i32 : i32 to vector<16x4xi32>
    %72 = arith.cmpi eq, %10, %71 : vector<16x4xi32>
    %73 = vector.shape_cast %70 : vector<16x1xi32> to vector<16x1xi32>
    %74 = vector.broadcast %73 : vector<16x1xi32> to vector<16x4xi32>
    %75 = arith.select %72, %74, %58 : vector<16x4xi1>, vector<16x4xi32>
    %c0_23 = arith.constant 0 : index
    %c0_24 = arith.constant 0 : index
    %c0_25 = arith.constant 0 : index
    %76 = vector.load %arg5[%c0_23, %c0_24, %c0_25] : memref<1x16x4xi32, #tpu.memory_space<vmem>>, vector<1x16x4xi32>
    %77 = vector.shape_cast %76 : vector<1x16x4xi32> to vector<16x4xi32>
    %78 = vector.shape_cast %75 : vector<16x4xi32> to vector<1x16x4xi32>
    tpu.vector_store %arg5[%c0_23, %c0_24, %c0_25], %78 {strides = array<i32>} : memref<1x16x4xi32, #tpu.memory_space<vmem>>, vector<1x16x4xi32>,
    return
  }
  func.func @transform_0(%arg0: i32, %arg1: i32) -> (i32, i32, i32) {
    %c0_i32 = arith.constant 0 : i32
    %c0_i32_0 = arith.constant 0 : i32
    return %arg0, %arg1, %c0_i32 : i32, i32, i32
  }
  func.func @transform_1(%arg0: i32, %arg1: i32) -> (i32, i32, i32) {
    %c0_i32 = arith.constant 0 : i32
    %c0_i32_0 = arith.constant 0 : i32
    %c0_i32_1 = arith.constant 0 : i32
    return %arg0, %c0_i32, %c0_i32_0 : i32, i32, i32
  }
  func.func @transform_2(%arg0: i32, %arg1: i32) -> (i32, i32, i32) {
    %c0_i32 = arith.constant 0 : i32
    %c0_i32_0 = arith.constant 0 : i32
    %c0_i32_1 = arith.constant 0 : i32
    return %arg0, %c0_i32, %c0_i32_0 : i32, i32, i32
  }
  func.func @transform_3(%arg0: i32, %arg1: i32) -> (i32, i32, i32) {
    %c0_i32 = arith.constant 0 : i32
    %c0_i32_0 = arith.constant 0 : i32
    return %arg0, %arg1, %c0_i32 : i32, i32, i32
  }
}

module attributes {stable_mosaic.version = 11 : i64} {
  func.func @_edge_gathered_kernel(%arg0: i32, %arg1: i32, %arg2: memref<1x16x3xbf16, #tpu.memory_space<vmem>>, %arg3: memref<1x4x16x3xbf16, #tpu.memory_space<vmem>>, %arg4: memref<3x64xbf16, #tpu.memory_space<vmem>>, %arg5: memref<3x64xbf16, #tpu.memory_space<vmem>>, %arg6: memref<1x64xf32, #tpu.memory_space<vmem>>, %arg7: memref<1x16x64xbf16, #tpu.memory_space<vmem>>) attributes {dimension_semantics = [#tpu.dimension_semantics<parallel>, #tpu.dimension_semantics<parallel>], iteration_bounds = array<i64: 2, 1>, scalar_prefetch = 0 : i64, scratch_operands = 0 : i64, tpu.core_type = #tpu.core_type<tc>, window_params = [{transform_indices = @transform_0, window_bounds = array<i64: 1, 16, 3>}, {transform_indices = @transform_1, window_bounds = array<i64: 1, 4, 16, 3>}, {pipeline_mode = #tpu.pipeline_mode<synchronous>, transform_indices = @transform_2, window_bounds = array<i64: 3, 64>}, {pipeline_mode = #tpu.pipeline_mode<synchronous>, transform_indices = @transform_3, window_bounds = array<i64: 3, 64>}, {pipeline_mode = #tpu.pipeline_mode<synchronous>, transform_indices = @transform_4, window_bounds = array<i64: 1, 64>}, {transform_indices = @transform_5, window_bounds = array<i64: 1, 16, 64>}]} {
    %c0 = arith.constant 0 : index
    %c0_0 = arith.constant 0 : index
    %0 = vector.load %arg4[%c0, %c0_0] : memref<3x64xbf16, #tpu.memory_space<vmem>>, vector<3x64xbf16>
    %c0_1 = arith.constant 0 : index
    %c0_2 = arith.constant 0 : index
    %c0_3 = arith.constant 0 : index
    %c0_4 = arith.constant 0 : index
    %1 = vector.load %arg3[%c0_1, %c0_2, %c0_3, %c0_4] : memref<1x4x16x3xbf16, #tpu.memory_space<vmem>>, vector<1x1x16x3xbf16>
    %2 = vector.shape_cast %1 : vector<1x1x16x3xbf16> to vector<16x3xbf16>
    %cst = arith.constant dense<0.000000e+00> : vector<16x64xf32>
    %3 = tpu.matmul %2, %0, %cst {dimension_numbers = #tpu.dot_dimension_numbers<[1], [0], [0], [1], [0, 0, 1, 1], [], []>} : vector<16x3xbf16>, vector<3x64xbf16>, vector<16x64xf32> -> vector<16x64xf32>
    %c0_5 = arith.constant 0 : index
    %c1 = arith.constant 1 : index
    %c0_6 = arith.constant 0 : index
    %c0_7 = arith.constant 0 : index
    %4 = vector.load %arg3[%c0_5, %c1, %c0_6, %c0_7] : memref<1x4x16x3xbf16, #tpu.memory_space<vmem>>, vector<1x1x16x3xbf16>
    %5 = vector.shape_cast %4 : vector<1x1x16x3xbf16> to vector<16x3xbf16>
    %cst_8 = arith.constant dense<0.000000e+00> : vector<16x64xf32>
    %6 = tpu.matmul %5, %0, %cst_8 {dimension_numbers = #tpu.dot_dimension_numbers<[1], [0], [0], [1], [0, 0, 1, 1], [], []>} : vector<16x3xbf16>, vector<3x64xbf16>, vector<16x64xf32> -> vector<16x64xf32>
    %7 = arith.maximumf %3, %6 : vector<16x64xf32>
    %c0_9 = arith.constant 0 : index
    %c2 = arith.constant 2 : index
    %c0_10 = arith.constant 0 : index
    %c0_11 = arith.constant 0 : index
    %8 = vector.load %arg3[%c0_9, %c2, %c0_10, %c0_11] : memref<1x4x16x3xbf16, #tpu.memory_space<vmem>>, vector<1x1x16x3xbf16>
    %9 = vector.shape_cast %8 : vector<1x1x16x3xbf16> to vector<16x3xbf16>
    %cst_12 = arith.constant dense<0.000000e+00> : vector<16x64xf32>
    %10 = tpu.matmul %9, %0, %cst_12 {dimension_numbers = #tpu.dot_dimension_numbers<[1], [0], [0], [1], [0, 0, 1, 1], [], []>} : vector<16x3xbf16>, vector<3x64xbf16>, vector<16x64xf32> -> vector<16x64xf32>
    %11 = arith.maximumf %7, %10 : vector<16x64xf32>
    %c0_13 = arith.constant 0 : index
    %c3 = arith.constant 3 : index
    %c0_14 = arith.constant 0 : index
    %c0_15 = arith.constant 0 : index
    %12 = vector.load %arg3[%c0_13, %c3, %c0_14, %c0_15] : memref<1x4x16x3xbf16, #tpu.memory_space<vmem>>, vector<1x1x16x3xbf16>
    %13 = vector.shape_cast %12 : vector<1x1x16x3xbf16> to vector<16x3xbf16>
    %cst_16 = arith.constant dense<0.000000e+00> : vector<16x64xf32>
    %14 = tpu.matmul %13, %0, %cst_16 {dimension_numbers = #tpu.dot_dimension_numbers<[1], [0], [0], [1], [0, 0, 1, 1], [], []>} : vector<16x3xbf16>, vector<3x64xbf16>, vector<16x64xf32> -> vector<16x64xf32>
    %15 = arith.maximumf %11, %14 : vector<16x64xf32>
    %c0_17 = arith.constant 0 : index
    %c0_18 = arith.constant 0 : index
    %c0_19 = arith.constant 0 : index
    %16 = vector.load %arg2[%c0_17, %c0_18, %c0_19] : memref<1x16x3xbf16, #tpu.memory_space<vmem>>, vector<1x16x3xbf16>
    %17 = vector.shape_cast %16 : vector<1x16x3xbf16> to vector<16x3xbf16>
    %c0_20 = arith.constant 0 : index
    %c0_21 = arith.constant 0 : index
    %18 = vector.load %arg5[%c0_20, %c0_21] : memref<3x64xbf16, #tpu.memory_space<vmem>>, vector<3x64xbf16>
    %cst_22 = arith.constant dense<0.000000e+00> : vector<16x64xf32>
    %19 = tpu.matmul %17, %18, %cst_22 {dimension_numbers = #tpu.dot_dimension_numbers<[1], [0], [0], [1], [0, 0, 1, 1], [], []>} : vector<16x3xbf16>, vector<3x64xbf16>, vector<16x64xf32> -> vector<16x64xf32>
    %20 = arith.addf %15, %19 : vector<16x64xf32>
    %c0_23 = arith.constant 0 : index
    %c0_24 = arith.constant 0 : index
    %21 = vector.load %arg6[%c0_23, %c0_24] : memref<1x64xf32, #tpu.memory_space<vmem>>, vector<1x64xf32>
    %22 = vector.broadcast %21 : vector<1x64xf32> to vector<16x64xf32>
    %23 = arith.addf %20, %22 : vector<16x64xf32>
    %cst_25 = arith.constant 2.000000e-01 : f32
    %24 = vector.broadcast %cst_25 : f32 to vector<16x64xf32>
    %25 = arith.mulf %24, %23 : vector<16x64xf32>
    %26 = arith.maximumf %23, %25 : vector<16x64xf32>
    %27 = arith.truncf %26 : vector<16x64xf32> to vector<16x64xbf16>
    %c0_26 = arith.constant 0 : index
    %c0_27 = arith.constant 0 : index
    %c0_28 = arith.constant 0 : index
    %28 = vector.load %arg7[%c0_26, %c0_27, %c0_28] : memref<1x16x64xbf16, #tpu.memory_space<vmem>>, vector<1x16x64xbf16>
    %29 = vector.shape_cast %28 : vector<1x16x64xbf16> to vector<16x64xbf16>
    %30 = vector.shape_cast %27 : vector<16x64xbf16> to vector<1x16x64xbf16>
    tpu.vector_store %arg7[%c0_26, %c0_27, %c0_28], %30 {strides = array<i32>} : memref<1x16x64xbf16, #tpu.memory_space<vmem>>, vector<1x16x64xbf16>,
    return
  }
  func.func @transform_0(%arg0: i32, %arg1: i32) -> (i32, i32, i32) {
    %c0_i32 = arith.constant 0 : i32
    %c0_i32_0 = arith.constant 0 : i32
    return %arg0, %arg1, %c0_i32 : i32, i32, i32
  }
  func.func @transform_1(%arg0: i32, %arg1: i32) -> (i32, i32, i32, i32) {
    %c0_i32 = arith.constant 0 : i32
    %c0_i32_0 = arith.constant 0 : i32
    %c0_i32_1 = arith.constant 0 : i32
    return %arg0, %c0_i32, %arg1, %c0_i32_0 : i32, i32, i32, i32
  }
  func.func @transform_2(%arg0: i32, %arg1: i32) -> (i32, i32) {
    %c0_i32 = arith.constant 0 : i32
    %c0_i32_0 = arith.constant 0 : i32
    %c0_i32_1 = arith.constant 0 : i32
    return %c0_i32, %c0_i32_0 : i32, i32
  }
  func.func @transform_3(%arg0: i32, %arg1: i32) -> (i32, i32) {
    %c0_i32 = arith.constant 0 : i32
    %c0_i32_0 = arith.constant 0 : i32
    %c0_i32_1 = arith.constant 0 : i32
    return %c0_i32, %c0_i32_0 : i32, i32
  }
  func.func @transform_4(%arg0: i32, %arg1: i32) -> (i32, i32) {
    %c0_i32 = arith.constant 0 : i32
    %c0_i32_0 = arith.constant 0 : i32
    %c0_i32_1 = arith.constant 0 : i32
    return %c0_i32, %c0_i32_0 : i32, i32
  }
  func.func @transform_5(%arg0: i32, %arg1: i32) -> (i32, i32, i32) {
    %c0_i32 = arith.constant 0 : i32
    %c0_i32_0 = arith.constant 0 : i32
    return %arg0, %arg1, %c0_i32 : i32, i32, i32
  }
}

module attributes {stable_mosaic.version = 11 : i64} {
  func.func @_edge_gathered_kernel(%arg0: i32, %arg1: i32, %arg2: memref<1x16x64xbf16, #tpu.memory_space<vmem>>, %arg3: memref<1x4x16x64xbf16, #tpu.memory_space<vmem>>, %arg4: memref<64x64xbf16, #tpu.memory_space<vmem>>, %arg5: memref<64x64xbf16, #tpu.memory_space<vmem>>, %arg6: memref<1x64xf32, #tpu.memory_space<vmem>>, %arg7: memref<1x16x64xbf16, #tpu.memory_space<vmem>>) attributes {dimension_semantics = [#tpu.dimension_semantics<parallel>, #tpu.dimension_semantics<parallel>], iteration_bounds = array<i64: 2, 1>, scalar_prefetch = 0 : i64, scratch_operands = 0 : i64, tpu.core_type = #tpu.core_type<tc>, window_params = [{transform_indices = @transform_0, window_bounds = array<i64: 1, 16, 64>}, {transform_indices = @transform_1, window_bounds = array<i64: 1, 4, 16, 64>}, {pipeline_mode = #tpu.pipeline_mode<synchronous>, transform_indices = @transform_2, window_bounds = array<i64: 64, 64>}, {pipeline_mode = #tpu.pipeline_mode<synchronous>, transform_indices = @transform_3, window_bounds = array<i64: 64, 64>}, {pipeline_mode = #tpu.pipeline_mode<synchronous>, transform_indices = @transform_4, window_bounds = array<i64: 1, 64>}, {transform_indices = @transform_5, window_bounds = array<i64: 1, 16, 64>}]} {
    %c0 = arith.constant 0 : index
    %c0_0 = arith.constant 0 : index
    %0 = vector.load %arg4[%c0, %c0_0] : memref<64x64xbf16, #tpu.memory_space<vmem>>, vector<64x64xbf16>
    %c0_1 = arith.constant 0 : index
    %c0_2 = arith.constant 0 : index
    %c0_3 = arith.constant 0 : index
    %c0_4 = arith.constant 0 : index
    %1 = vector.load %arg3[%c0_1, %c0_2, %c0_3, %c0_4] : memref<1x4x16x64xbf16, #tpu.memory_space<vmem>>, vector<1x1x16x64xbf16>
    %2 = vector.shape_cast %1 : vector<1x1x16x64xbf16> to vector<16x64xbf16>
    %cst = arith.constant dense<0.000000e+00> : vector<16x64xf32>
    %3 = tpu.matmul %2, %0, %cst {dimension_numbers = #tpu.dot_dimension_numbers<[1], [0], [0], [1], [0, 0, 1, 1], [], []>} : vector<16x64xbf16>, vector<64x64xbf16>, vector<16x64xf32> -> vector<16x64xf32>
    %c0_5 = arith.constant 0 : index
    %c1 = arith.constant 1 : index
    %c0_6 = arith.constant 0 : index
    %c0_7 = arith.constant 0 : index
    %4 = vector.load %arg3[%c0_5, %c1, %c0_6, %c0_7] : memref<1x4x16x64xbf16, #tpu.memory_space<vmem>>, vector<1x1x16x64xbf16>
    %5 = vector.shape_cast %4 : vector<1x1x16x64xbf16> to vector<16x64xbf16>
    %cst_8 = arith.constant dense<0.000000e+00> : vector<16x64xf32>
    %6 = tpu.matmul %5, %0, %cst_8 {dimension_numbers = #tpu.dot_dimension_numbers<[1], [0], [0], [1], [0, 0, 1, 1], [], []>} : vector<16x64xbf16>, vector<64x64xbf16>, vector<16x64xf32> -> vector<16x64xf32>
    %7 = arith.maximumf %3, %6 : vector<16x64xf32>
    %c0_9 = arith.constant 0 : index
    %c2 = arith.constant 2 : index
    %c0_10 = arith.constant 0 : index
    %c0_11 = arith.constant 0 : index
    %8 = vector.load %arg3[%c0_9, %c2, %c0_10, %c0_11] : memref<1x4x16x64xbf16, #tpu.memory_space<vmem>>, vector<1x1x16x64xbf16>
    %9 = vector.shape_cast %8 : vector<1x1x16x64xbf16> to vector<16x64xbf16>
    %cst_12 = arith.constant dense<0.000000e+00> : vector<16x64xf32>
    %10 = tpu.matmul %9, %0, %cst_12 {dimension_numbers = #tpu.dot_dimension_numbers<[1], [0], [0], [1], [0, 0, 1, 1], [], []>} : vector<16x64xbf16>, vector<64x64xbf16>, vector<16x64xf32> -> vector<16x64xf32>
    %11 = arith.maximumf %7, %10 : vector<16x64xf32>
    %c0_13 = arith.constant 0 : index
    %c3 = arith.constant 3 : index
    %c0_14 = arith.constant 0 : index
    %c0_15 = arith.constant 0 : index
    %12 = vector.load %arg3[%c0_13, %c3, %c0_14, %c0_15] : memref<1x4x16x64xbf16, #tpu.memory_space<vmem>>, vector<1x1x16x64xbf16>
    %13 = vector.shape_cast %12 : vector<1x1x16x64xbf16> to vector<16x64xbf16>
    %cst_16 = arith.constant dense<0.000000e+00> : vector<16x64xf32>
    %14 = tpu.matmul %13, %0, %cst_16 {dimension_numbers = #tpu.dot_dimension_numbers<[1], [0], [0], [1], [0, 0, 1, 1], [], []>} : vector<16x64xbf16>, vector<64x64xbf16>, vector<16x64xf32> -> vector<16x64xf32>
    %15 = arith.maximumf %11, %14 : vector<16x64xf32>
    %c0_17 = arith.constant 0 : index
    %c0_18 = arith.constant 0 : index
    %c0_19 = arith.constant 0 : index
    %16 = vector.load %arg2[%c0_17, %c0_18, %c0_19] : memref<1x16x64xbf16, #tpu.memory_space<vmem>>, vector<1x16x64xbf16>
    %17 = vector.shape_cast %16 : vector<1x16x64xbf16> to vector<16x64xbf16>
    %c0_20 = arith.constant 0 : index
    %c0_21 = arith.constant 0 : index
    %18 = vector.load %arg5[%c0_20, %c0_21] : memref<64x64xbf16, #tpu.memory_space<vmem>>, vector<64x64xbf16>
    %cst_22 = arith.constant dense<0.000000e+00> : vector<16x64xf32>
    %19 = tpu.matmul %17, %18, %cst_22 {dimension_numbers = #tpu.dot_dimension_numbers<[1], [0], [0], [1], [0, 0, 1, 1], [], []>} : vector<16x64xbf16>, vector<64x64xbf16>, vector<16x64xf32> -> vector<16x64xf32>
    %20 = arith.addf %15, %19 : vector<16x64xf32>
    %c0_23 = arith.constant 0 : index
    %c0_24 = arith.constant 0 : index
    %21 = vector.load %arg6[%c0_23, %c0_24] : memref<1x64xf32, #tpu.memory_space<vmem>>, vector<1x64xf32>
    %22 = vector.broadcast %21 : vector<1x64xf32> to vector<16x64xf32>
    %23 = arith.addf %20, %22 : vector<16x64xf32>
    %cst_25 = arith.constant 2.000000e-01 : f32
    %24 = vector.broadcast %cst_25 : f32 to vector<16x64xf32>
    %25 = arith.mulf %24, %23 : vector<16x64xf32>
    %26 = arith.maximumf %23, %25 : vector<16x64xf32>
    %27 = arith.truncf %26 : vector<16x64xf32> to vector<16x64xbf16>
    %c0_26 = arith.constant 0 : index
    %c0_27 = arith.constant 0 : index
    %c0_28 = arith.constant 0 : index
    %28 = vector.load %arg7[%c0_26, %c0_27, %c0_28] : memref<1x16x64xbf16, #tpu.memory_space<vmem>>, vector<1x16x64xbf16>
    %29 = vector.shape_cast %28 : vector<1x16x64xbf16> to vector<16x64xbf16>
    %30 = vector.shape_cast %27 : vector<16x64xbf16> to vector<1x16x64xbf16>
    tpu.vector_store %arg7[%c0_26, %c0_27, %c0_28], %30 {strides = array<i32>} : memref<1x16x64xbf16, #tpu.memory_space<vmem>>, vector<1x16x64xbf16>,
    return
  }
  func.func @transform_0(%arg0: i32, %arg1: i32) -> (i32, i32, i32) {
    %c0_i32 = arith.constant 0 : i32
    %c0_i32_0 = arith.constant 0 : i32
    return %arg0, %arg1, %c0_i32 : i32, i32, i32
  }
  func.func @transform_1(%arg0: i32, %arg1: i32) -> (i32, i32, i32, i32) {
    %c0_i32 = arith.constant 0 : i32
    %c0_i32_0 = arith.constant 0 : i32
    %c0_i32_1 = arith.constant 0 : i32
    return %arg0, %c0_i32, %arg1, %c0_i32_0 : i32, i32, i32, i32
  }
  func.func @transform_2(%arg0: i32, %arg1: i32) -> (i32, i32) {
    %c0_i32 = arith.constant 0 : i32
    %c0_i32_0 = arith.constant 0 : i32
    %c0_i32_1 = arith.constant 0 : i32
    return %c0_i32, %c0_i32_0 : i32, i32
  }
  func.func @transform_3(%arg0: i32, %arg1: i32) -> (i32, i32) {
    %c0_i32 = arith.constant 0 : i32
    %c0_i32_0 = arith.constant 0 : i32
    %c0_i32_1 = arith.constant 0 : i32
    return %c0_i32, %c0_i32_0 : i32, i32
  }
  func.func @transform_4(%arg0: i32, %arg1: i32) -> (i32, i32) {
    %c0_i32 = arith.constant 0 : i32
    %c0_i32_0 = arith.constant 0 : i32
    %c0_i32_1 = arith.constant 0 : i32
    return %c0_i32, %c0_i32_0 : i32, i32
  }
  func.func @transform_5(%arg0: i32, %arg1: i32) -> (i32, i32, i32) {
    %c0_i32 = arith.constant 0 : i32
    %c0_i32_0 = arith.constant 0 : i32
    return %arg0, %arg1, %c0_i32 : i32, i32, i32
  }
}

module attributes {stable_mosaic.version = 11 : i64} {
  func.func @_edge_gathered_kernel(%arg0: i32, %arg1: i32, %arg2: memref<1x16x64xbf16, #tpu.memory_space<vmem>>, %arg3: memref<1x4x16x64xbf16, #tpu.memory_space<vmem>>, %arg4: memref<64x128xbf16, #tpu.memory_space<vmem>>, %arg5: memref<64x128xbf16, #tpu.memory_space<vmem>>, %arg6: memref<1x128xf32, #tpu.memory_space<vmem>>, %arg7: memref<1x16x128xbf16, #tpu.memory_space<vmem>>) attributes {dimension_semantics = [#tpu.dimension_semantics<parallel>, #tpu.dimension_semantics<parallel>], iteration_bounds = array<i64: 2, 1>, scalar_prefetch = 0 : i64, scratch_operands = 0 : i64, tpu.core_type = #tpu.core_type<tc>, window_params = [{transform_indices = @transform_0, window_bounds = array<i64: 1, 16, 64>}, {transform_indices = @transform_1, window_bounds = array<i64: 1, 4, 16, 64>}, {pipeline_mode = #tpu.pipeline_mode<synchronous>, transform_indices = @transform_2, window_bounds = array<i64: 64, 128>}, {pipeline_mode = #tpu.pipeline_mode<synchronous>, transform_indices = @transform_3, window_bounds = array<i64: 64, 128>}, {pipeline_mode = #tpu.pipeline_mode<synchronous>, transform_indices = @transform_4, window_bounds = array<i64: 1, 128>}, {transform_indices = @transform_5, window_bounds = array<i64: 1, 16, 128>}]} {
    %c0 = arith.constant 0 : index
    %c0_0 = arith.constant 0 : index
    %0 = vector.load %arg4[%c0, %c0_0] : memref<64x128xbf16, #tpu.memory_space<vmem>>, vector<64x128xbf16>
    %c0_1 = arith.constant 0 : index
    %c0_2 = arith.constant 0 : index
    %c0_3 = arith.constant 0 : index
    %c0_4 = arith.constant 0 : index
    %1 = vector.load %arg3[%c0_1, %c0_2, %c0_3, %c0_4] : memref<1x4x16x64xbf16, #tpu.memory_space<vmem>>, vector<1x1x16x64xbf16>
    %2 = vector.shape_cast %1 : vector<1x1x16x64xbf16> to vector<16x64xbf16>
    %cst = arith.constant dense<0.000000e+00> : vector<16x128xf32>
    %3 = tpu.matmul %2, %0, %cst {dimension_numbers = #tpu.dot_dimension_numbers<[1], [0], [0], [1], [0, 0, 1, 1], [], []>} : vector<16x64xbf16>, vector<64x128xbf16>, vector<16x128xf32> -> vector<16x128xf32>
    %c0_5 = arith.constant 0 : index
    %c1 = arith.constant 1 : index
    %c0_6 = arith.constant 0 : index
    %c0_7 = arith.constant 0 : index
    %4 = vector.load %arg3[%c0_5, %c1, %c0_6, %c0_7] : memref<1x4x16x64xbf16, #tpu.memory_space<vmem>>, vector<1x1x16x64xbf16>
    %5 = vector.shape_cast %4 : vector<1x1x16x64xbf16> to vector<16x64xbf16>
    %cst_8 = arith.constant dense<0.000000e+00> : vector<16x128xf32>
    %6 = tpu.matmul %5, %0, %cst_8 {dimension_numbers = #tpu.dot_dimension_numbers<[1], [0], [0], [1], [0, 0, 1, 1], [], []>} : vector<16x64xbf16>, vector<64x128xbf16>, vector<16x128xf32> -> vector<16x128xf32>
    %7 = arith.maximumf %3, %6 : vector<16x128xf32>
    %c0_9 = arith.constant 0 : index
    %c2 = arith.constant 2 : index
    %c0_10 = arith.constant 0 : index
    %c0_11 = arith.constant 0 : index
    %8 = vector.load %arg3[%c0_9, %c2, %c0_10, %c0_11] : memref<1x4x16x64xbf16, #tpu.memory_space<vmem>>, vector<1x1x16x64xbf16>
    %9 = vector.shape_cast %8 : vector<1x1x16x64xbf16> to vector<16x64xbf16>
    %cst_12 = arith.constant dense<0.000000e+00> : vector<16x128xf32>
    %10 = tpu.matmul %9, %0, %cst_12 {dimension_numbers = #tpu.dot_dimension_numbers<[1], [0], [0], [1], [0, 0, 1, 1], [], []>} : vector<16x64xbf16>, vector<64x128xbf16>, vector<16x128xf32> -> vector<16x128xf32>
    %11 = arith.maximumf %7, %10 : vector<16x128xf32>
    %c0_13 = arith.constant 0 : index
    %c3 = arith.constant 3 : index
    %c0_14 = arith.constant 0 : index
    %c0_15 = arith.constant 0 : index
    %12 = vector.load %arg3[%c0_13, %c3, %c0_14, %c0_15] : memref<1x4x16x64xbf16, #tpu.memory_space<vmem>>, vector<1x1x16x64xbf16>
    %13 = vector.shape_cast %12 : vector<1x1x16x64xbf16> to vector<16x64xbf16>
    %cst_16 = arith.constant dense<0.000000e+00> : vector<16x128xf32>
    %14 = tpu.matmul %13, %0, %cst_16 {dimension_numbers = #tpu.dot_dimension_numbers<[1], [0], [0], [1], [0, 0, 1, 1], [], []>} : vector<16x64xbf16>, vector<64x128xbf16>, vector<16x128xf32> -> vector<16x128xf32>
    %15 = arith.maximumf %11, %14 : vector<16x128xf32>
    %c0_17 = arith.constant 0 : index
    %c0_18 = arith.constant 0 : index
    %c0_19 = arith.constant 0 : index
    %16 = vector.load %arg2[%c0_17, %c0_18, %c0_19] : memref<1x16x64xbf16, #tpu.memory_space<vmem>>, vector<1x16x64xbf16>
    %17 = vector.shape_cast %16 : vector<1x16x64xbf16> to vector<16x64xbf16>
    %c0_20 = arith.constant 0 : index
    %c0_21 = arith.constant 0 : index
    %18 = vector.load %arg5[%c0_20, %c0_21] : memref<64x128xbf16, #tpu.memory_space<vmem>>, vector<64x128xbf16>
    %cst_22 = arith.constant dense<0.000000e+00> : vector<16x128xf32>
    %19 = tpu.matmul %17, %18, %cst_22 {dimension_numbers = #tpu.dot_dimension_numbers<[1], [0], [0], [1], [0, 0, 1, 1], [], []>} : vector<16x64xbf16>, vector<64x128xbf16>, vector<16x128xf32> -> vector<16x128xf32>
    %20 = arith.addf %15, %19 : vector<16x128xf32>
    %c0_23 = arith.constant 0 : index
    %c0_24 = arith.constant 0 : index
    %21 = vector.load %arg6[%c0_23, %c0_24] : memref<1x128xf32, #tpu.memory_space<vmem>>, vector<1x128xf32>
    %22 = vector.broadcast %21 : vector<1x128xf32> to vector<16x128xf32>
    %23 = arith.addf %20, %22 : vector<16x128xf32>
    %cst_25 = arith.constant 2.000000e-01 : f32
    %24 = vector.broadcast %cst_25 : f32 to vector<16x128xf32>
    %25 = arith.mulf %24, %23 : vector<16x128xf32>
    %26 = arith.maximumf %23, %25 : vector<16x128xf32>
    %27 = arith.truncf %26 : vector<16x128xf32> to vector<16x128xbf16>
    %c0_26 = arith.constant 0 : index
    %c0_27 = arith.constant 0 : index
    %c0_28 = arith.constant 0 : index
    %28 = vector.load %arg7[%c0_26, %c0_27, %c0_28] : memref<1x16x128xbf16, #tpu.memory_space<vmem>>, vector<1x16x128xbf16>
    %29 = vector.shape_cast %28 : vector<1x16x128xbf16> to vector<16x128xbf16>
    %30 = vector.shape_cast %27 : vector<16x128xbf16> to vector<1x16x128xbf16>
    tpu.vector_store %arg7[%c0_26, %c0_27, %c0_28], %30 {strides = array<i32>} : memref<1x16x128xbf16, #tpu.memory_space<vmem>>, vector<1x16x128xbf16>,
    return
  }
  func.func @transform_0(%arg0: i32, %arg1: i32) -> (i32, i32, i32) {
    %c0_i32 = arith.constant 0 : i32
    %c0_i32_0 = arith.constant 0 : i32
    return %arg0, %arg1, %c0_i32 : i32, i32, i32
  }
  func.func @transform_1(%arg0: i32, %arg1: i32) -> (i32, i32, i32, i32) {
    %c0_i32 = arith.constant 0 : i32
    %c0_i32_0 = arith.constant 0 : i32
    %c0_i32_1 = arith.constant 0 : i32
    return %arg0, %c0_i32, %arg1, %c0_i32_0 : i32, i32, i32, i32
  }
  func.func @transform_2(%arg0: i32, %arg1: i32) -> (i32, i32) {
    %c0_i32 = arith.constant 0 : i32
    %c0_i32_0 = arith.constant 0 : i32
    %c0_i32_1 = arith.constant 0 : i32
    return %c0_i32, %c0_i32_0 : i32, i32
  }
  func.func @transform_3(%arg0: i32, %arg1: i32) -> (i32, i32) {
    %c0_i32 = arith.constant 0 : i32
    %c0_i32_0 = arith.constant 0 : i32
    %c0_i32_1 = arith.constant 0 : i32
    return %c0_i32, %c0_i32_0 : i32, i32
  }
  func.func @transform_4(%arg0: i32, %arg1: i32) -> (i32, i32) {
    %c0_i32 = arith.constant 0 : i32
    %c0_i32_0 = arith.constant 0 : i32
    %c0_i32_1 = arith.constant 0 : i32
    return %c0_i32, %c0_i32_0 : i32, i32
  }
  func.func @transform_5(%arg0: i32, %arg1: i32) -> (i32, i32, i32) {
    %c0_i32 = arith.constant 0 : i32
    %c0_i32_0 = arith.constant 0 : i32
    return %arg0, %arg1, %c0_i32 : i32, i32, i32
  }
}

module attributes {stable_mosaic.version = 11 : i64} {
  func.func @kernel(%arg0: i32, %arg1: i32, %arg2: memref<1x16x128xbf16, #tpu.memory_space<vmem>>, %arg3: memref<1x16x128xbf16, #tpu.memory_space<vmem>>, %arg4: memref<1x1x16xf32, #tpu.memory_space<vmem>>, %arg5: memref<1x16x4xi32, #tpu.memory_space<vmem>>) attributes {dimension_semantics = [#tpu.dimension_semantics<parallel>, #tpu.dimension_semantics<parallel>], iteration_bounds = array<i64: 2, 1>, scalar_prefetch = 0 : i64, scratch_operands = 0 : i64, tpu.core_type = #tpu.core_type<tc>, window_params = [{transform_indices = @transform_0, window_bounds = array<i64: 1, 16, 128>}, {transform_indices = @transform_1, window_bounds = array<i64: 1, 16, 128>}, {transform_indices = @transform_2, window_bounds = array<i64: 1, 1, 16>}, {transform_indices = @transform_3, window_bounds = array<i64: 1, 16, 4>}]} {
    %c0 = arith.constant 0 : index
    %c0_0 = arith.constant 0 : index
    %c0_1 = arith.constant 0 : index
    %0 = vector.load %arg2[%c0, %c0_0, %c0_1] : memref<1x16x128xbf16, #tpu.memory_space<vmem>>, vector<1x16x128xbf16>
    %1 = vector.shape_cast %0 : vector<1x16x128xbf16> to vector<16x128xbf16>
    %c0_2 = arith.constant 0 : index
    %c0_3 = arith.constant 0 : index
    %c0_4 = arith.constant 0 : index
    %2 = vector.load %arg3[%c0_2, %c0_3, %c0_4] : memref<1x16x128xbf16, #tpu.memory_space<vmem>>, vector<1x16x128xbf16>
    %3 = vector.shape_cast %2 : vector<1x16x128xbf16> to vector<16x128xbf16>
    %cst = arith.constant dense<0.000000e+00> : vector<16x16xf32>
    %4 = tpu.matmul %1, %3, %cst {dimension_numbers = #tpu.dot_dimension_numbers<[1], [1], [0], [0], [0, 0, 1, 0], [], []>} : vector<16x128xbf16>, vector<16x128xbf16>, vector<16x16xf32> -> vector<16x16xf32>
    %c0_5 = arith.constant 0 : index
    %c0_6 = arith.constant 0 : index
    %c0_7 = arith.constant 0 : index
    %5 = vector.load %arg4[%c0_5, %c0_6, %c0_7] : memref<1x1x16xf32, #tpu.memory_space<vmem>>, vector<1x1x16xf32>
    %6 = vector.shape_cast %5 : vector<1x1x16xf32> to vector<1x16xf32>
    %7 = vector.broadcast %6 : vector<1x16xf32> to vector<16x16xf32>
    %8 = arith.subf %4, %7 : vector<16x16xf32>
    %9 = tpu.iota {dimensions = array<i32: 1>} : vector<16x16xi32>
    %10 = tpu.iota {dimensions = array<i32: 1>} : vector<16x4xi32>
    %c0_i32 = arith.constant 0 : i32
    %11 = vector.broadcast %c0_i32 : i32 to vector<16x4xi32>
    %cst_8 = arith.constant dense<0xFF800000> : vector<16xf32>
    %12 = vector.multi_reduction <maximumf>, %8, %cst_8 [1] : vector<16x16xf32> to vector<16xf32>
    %13 = vector.shape_cast %12 : vector<16xf32> to vector<16x1xf32>
    %14 = vector.broadcast %13 : vector<16x1xf32> to vector<16x16xf32>
    %15 = arith.cmpf oeq, %8, %14 : vector<16x16xf32>
    %c16_i32 = arith.constant 16 : i32
    %16 = vector.broadcast %c16_i32 : i32 to vector<16x16xi32>
    %17 = arith.select %15, %9, %16 : vector<16x16xi1>, vector<16x16xi32>
    %cst_9 = arith.constant dense<2147483647> : vector<16xi32>
    %18 = vector.multi_reduction <minsi>, %17, %cst_9 [1] : vector<16x16xi32> to vector<16xi32>
    %19 = vector.shape_cast %18 : vector<16xi32> to vector<16x1xi32>
    %c0_i32_10 = arith.constant 0 : i32
    %20 = vector.broadcast %c0_i32_10 : i32 to vector<16x4xi32>
    %21 = arith.cmpi eq, %10, %20 : vector<16x4xi32>
    %22 = vector.shape_cast %19 : vector<16x1xi32> to vector<16x1xi32>
    %23 = vector.broadcast %22 : vector<16x1xi32> to vector<16x4xi32>
    %24 = arith.select %21, %23, %11 : vector<16x4xi1>, vector<16x4xi32>
    %25 = vector.broadcast %19 : vector<16x1xi32> to vector<16x16xi32>
    %26 = arith.cmpi eq, %9, %25 : vector<16x16xi32>
    %cst_11 = arith.constant 0xFF800000 : f32
    %27 = vector.broadcast %cst_11 : f32 to vector<16x16xf32>
    %28 = arith.select %26, %27, %8 : vector<16x16xi1>, vector<16x16xf32>
    %cst_12 = arith.constant dense<0xFF800000> : vector<16xf32>
    %29 = vector.multi_reduction <maximumf>, %28, %cst_12 [1] : vector<16x16xf32> to vector<16xf32>
    %30 = vector.shape_cast %29 : vector<16xf32> to vector<16x1xf32>
    %31 = vector.broadcast %30 : vector<16x1xf32> to vector<16x16xf32>
    %32 = arith.cmpf oeq, %28, %31 : vector<16x16xf32>
    %c16_i32_13 = arith.constant 16 : i32
    %33 = vector.broadcast %c16_i32_13 : i32 to vector<16x16xi32>
    %34 = arith.select %32, %9, %33 : vector<16x16xi1>, vector<16x16xi32>
    %cst_14 = arith.constant dense<2147483647> : vector<16xi32>
    %35 = vector.multi_reduction <minsi>, %34, %cst_14 [1] : vector<16x16xi32> to vector<16xi32>
    %36 = vector.shape_cast %35 : vector<16xi32> to vector<16x1xi32>
    %c1_i32 = arith.constant 1 : i32
    %37 = vector.broadcast %c1_i32 : i32 to vector<16x4xi32>
    %38 = arith.cmpi eq, %10, %37 : vector<16x4xi32>
    %39 = vector.shape_cast %36 : vector<16x1xi32> to vector<16x1xi32>
    %40 = vector.broadcast %39 : vector<16x1xi32> to vector<16x4xi32>
    %41 = arith.select %38, %40, %24 : vector<16x4xi1>, vector<16x4xi32>
    %42 = vector.broadcast %36 : vector<16x1xi32> to vector<16x16xi32>
    %43 = arith.cmpi eq, %9, %42 : vector<16x16xi32>
    %cst_15 = arith.constant 0xFF800000 : f32
    %44 = vector.broadcast %cst_15 : f32 to vector<16x16xf32>
    %45 = arith.select %43, %44, %28 : vector<16x16xi1>, vector<16x16xf32>
    %cst_16 = arith.constant dense<0xFF800000> : vector<16xf32>
    %46 = vector.multi_reduction <maximumf>, %45, %cst_16 [1] : vector<16x16xf32> to vector<16xf32>
    %47 = vector.shape_cast %46 : vector<16xf32> to vector<16x1xf32>
    %48 = vector.broadcast %47 : vector<16x1xf32> to vector<16x16xf32>
    %49 = arith.cmpf oeq, %45, %48 : vector<16x16xf32>
    %c16_i32_17 = arith.constant 16 : i32
    %50 = vector.broadcast %c16_i32_17 : i32 to vector<16x16xi32>
    %51 = arith.select %49, %9, %50 : vector<16x16xi1>, vector<16x16xi32>
    %cst_18 = arith.constant dense<2147483647> : vector<16xi32>
    %52 = vector.multi_reduction <minsi>, %51, %cst_18 [1] : vector<16x16xi32> to vector<16xi32>
    %53 = vector.shape_cast %52 : vector<16xi32> to vector<16x1xi32>
    %c2_i32 = arith.constant 2 : i32
    %54 = vector.broadcast %c2_i32 : i32 to vector<16x4xi32>
    %55 = arith.cmpi eq, %10, %54 : vector<16x4xi32>
    %56 = vector.shape_cast %53 : vector<16x1xi32> to vector<16x1xi32>
    %57 = vector.broadcast %56 : vector<16x1xi32> to vector<16x4xi32>
    %58 = arith.select %55, %57, %41 : vector<16x4xi1>, vector<16x4xi32>
    %59 = vector.broadcast %53 : vector<16x1xi32> to vector<16x16xi32>
    %60 = arith.cmpi eq, %9, %59 : vector<16x16xi32>
    %cst_19 = arith.constant 0xFF800000 : f32
    %61 = vector.broadcast %cst_19 : f32 to vector<16x16xf32>
    %62 = arith.select %60, %61, %45 : vector<16x16xi1>, vector<16x16xf32>
    %cst_20 = arith.constant dense<0xFF800000> : vector<16xf32>
    %63 = vector.multi_reduction <maximumf>, %62, %cst_20 [1] : vector<16x16xf32> to vector<16xf32>
    %64 = vector.shape_cast %63 : vector<16xf32> to vector<16x1xf32>
    %65 = vector.broadcast %64 : vector<16x1xf32> to vector<16x16xf32>
    %66 = arith.cmpf oeq, %62, %65 : vector<16x16xf32>
    %c16_i32_21 = arith.constant 16 : i32
    %67 = vector.broadcast %c16_i32_21 : i32 to vector<16x16xi32>
    %68 = arith.select %66, %9, %67 : vector<16x16xi1>, vector<16x16xi32>
    %cst_22 = arith.constant dense<2147483647> : vector<16xi32>
    %69 = vector.multi_reduction <minsi>, %68, %cst_22 [1] : vector<16x16xi32> to vector<16xi32>
    %70 = vector.shape_cast %69 : vector<16xi32> to vector<16x1xi32>
    %c3_i32 = arith.constant 3 : i32
    %71 = vector.broadcast %c3_i32 : i32 to vector<16x4xi32>
    %72 = arith.cmpi eq, %10, %71 : vector<16x4xi32>
    %73 = vector.shape_cast %70 : vector<16x1xi32> to vector<16x1xi32>
    %74 = vector.broadcast %73 : vector<16x1xi32> to vector<16x4xi32>
    %75 = arith.select %72, %74, %58 : vector<16x4xi1>, vector<16x4xi32>
    %c0_23 = arith.constant 0 : index
    %c0_24 = arith.constant 0 : index
    %c0_25 = arith.constant 0 : index
    %76 = vector.load %arg5[%c0_23, %c0_24, %c0_25] : memref<1x16x4xi32, #tpu.memory_space<vmem>>, vector<1x16x4xi32>
    %77 = vector.shape_cast %76 : vector<1x16x4xi32> to vector<16x4xi32>
    %78 = vector.shape_cast %75 : vector<16x4xi32> to vector<1x16x4xi32>
    tpu.vector_store %arg5[%c0_23, %c0_24, %c0_25], %78 {strides = array<i32>} : memref<1x16x4xi32, #tpu.memory_space<vmem>>, vector<1x16x4xi32>,
    return
  }
  func.func @transform_0(%arg0: i32, %arg1: i32) -> (i32, i32, i32) {
    %c0_i32 = arith.constant 0 : i32
    %c0_i32_0 = arith.constant 0 : i32
    return %arg0, %arg1, %c0_i32 : i32, i32, i32
  }
  func.func @transform_1(%arg0: i32, %arg1: i32) -> (i32, i32, i32) {
    %c0_i32 = arith.constant 0 : i32
    %c0_i32_0 = arith.constant 0 : i32
    %c0_i32_1 = arith.constant 0 : i32
    return %arg0, %c0_i32, %c0_i32_0 : i32, i32, i32
  }
  func.func @transform_2(%arg0: i32, %arg1: i32) -> (i32, i32, i32) {
    %c0_i32 = arith.constant 0 : i32
    %c0_i32_0 = arith.constant 0 : i32
    %c0_i32_1 = arith.constant 0 : i32
    return %arg0, %c0_i32, %c0_i32_0 : i32, i32, i32
  }
  func.func @transform_3(%arg0: i32, %arg1: i32) -> (i32, i32, i32) {
    %c0_i32 = arith.constant 0 : i32
    %c0_i32_0 = arith.constant 0 : i32
    return %arg0, %arg1, %c0_i32 : i32, i32, i32
  }
}

module attributes {stable_mosaic.version = 11 : i64} {
  func.func @_edge_gathered_kernel(%arg0: i32, %arg1: i32, %arg2: memref<1x16x128xbf16, #tpu.memory_space<vmem>>, %arg3: memref<1x4x16x128xbf16, #tpu.memory_space<vmem>>, %arg4: memref<128x256xbf16, #tpu.memory_space<vmem>>, %arg5: memref<128x256xbf16, #tpu.memory_space<vmem>>, %arg6: memref<1x256xf32, #tpu.memory_space<vmem>>, %arg7: memref<1x16x256xbf16, #tpu.memory_space<vmem>>) attributes {dimension_semantics = [#tpu.dimension_semantics<parallel>, #tpu.dimension_semantics<parallel>], iteration_bounds = array<i64: 2, 1>, scalar_prefetch = 0 : i64, scratch_operands = 0 : i64, tpu.core_type = #tpu.core_type<tc>, window_params = [{transform_indices = @transform_0, window_bounds = array<i64: 1, 16, 128>}, {transform_indices = @transform_1, window_bounds = array<i64: 1, 4, 16, 128>}, {pipeline_mode = #tpu.pipeline_mode<synchronous>, transform_indices = @transform_2, window_bounds = array<i64: 128, 256>}, {pipeline_mode = #tpu.pipeline_mode<synchronous>, transform_indices = @transform_3, window_bounds = array<i64: 128, 256>}, {pipeline_mode = #tpu.pipeline_mode<synchronous>, transform_indices = @transform_4, window_bounds = array<i64: 1, 256>}, {transform_indices = @transform_5, window_bounds = array<i64: 1, 16, 256>}]} {
    %c0 = arith.constant 0 : index
    %c0_0 = arith.constant 0 : index
    %0 = vector.load %arg4[%c0, %c0_0] : memref<128x256xbf16, #tpu.memory_space<vmem>>, vector<128x256xbf16>
    %c0_1 = arith.constant 0 : index
    %c0_2 = arith.constant 0 : index
    %c0_3 = arith.constant 0 : index
    %c0_4 = arith.constant 0 : index
    %1 = vector.load %arg3[%c0_1, %c0_2, %c0_3, %c0_4] : memref<1x4x16x128xbf16, #tpu.memory_space<vmem>>, vector<1x1x16x128xbf16>
    %2 = vector.shape_cast %1 : vector<1x1x16x128xbf16> to vector<16x128xbf16>
    %cst = arith.constant dense<0.000000e+00> : vector<16x256xf32>
    %3 = tpu.matmul %2, %0, %cst {dimension_numbers = #tpu.dot_dimension_numbers<[1], [0], [0], [1], [0, 0, 1, 1], [], []>} : vector<16x128xbf16>, vector<128x256xbf16>, vector<16x256xf32> -> vector<16x256xf32>
    %c0_5 = arith.constant 0 : index
    %c1 = arith.constant 1 : index
    %c0_6 = arith.constant 0 : index
    %c0_7 = arith.constant 0 : index
    %4 = vector.load %arg3[%c0_5, %c1, %c0_6, %c0_7] : memref<1x4x16x128xbf16, #tpu.memory_space<vmem>>, vector<1x1x16x128xbf16>
    %5 = vector.shape_cast %4 : vector<1x1x16x128xbf16> to vector<16x128xbf16>
    %cst_8 = arith.constant dense<0.000000e+00> : vector<16x256xf32>
    %6 = tpu.matmul %5, %0, %cst_8 {dimension_numbers = #tpu.dot_dimension_numbers<[1], [0], [0], [1], [0, 0, 1, 1], [], []>} : vector<16x128xbf16>, vector<128x256xbf16>, vector<16x256xf32> -> vector<16x256xf32>
    %7 = arith.maximumf %3, %6 : vector<16x256xf32>
    %c0_9 = arith.constant 0 : index
    %c2 = arith.constant 2 : index
    %c0_10 = arith.constant 0 : index
    %c0_11 = arith.constant 0 : index
    %8 = vector.load %arg3[%c0_9, %c2, %c0_10, %c0_11] : memref<1x4x16x128xbf16, #tpu.memory_space<vmem>>, vector<1x1x16x128xbf16>
    %9 = vector.shape_cast %8 : vector<1x1x16x128xbf16> to vector<16x128xbf16>
    %cst_12 = arith.constant dense<0.000000e+00> : vector<16x256xf32>
    %10 = tpu.matmul %9, %0, %cst_12 {dimension_numbers = #tpu.dot_dimension_numbers<[1], [0], [0], [1], [0, 0, 1, 1], [], []>} : vector<16x128xbf16>, vector<128x256xbf16>, vector<16x256xf32> -> vector<16x256xf32>
    %11 = arith.maximumf %7, %10 : vector<16x256xf32>
    %c0_13 = arith.constant 0 : index
    %c3 = arith.constant 3 : index
    %c0_14 = arith.constant 0 : index
    %c0_15 = arith.constant 0 : index
    %12 = vector.load %arg3[%c0_13, %c3, %c0_14, %c0_15] : memref<1x4x16x128xbf16, #tpu.memory_space<vmem>>, vector<1x1x16x128xbf16>
    %13 = vector.shape_cast %12 : vector<1x1x16x128xbf16> to vector<16x128xbf16>
    %cst_16 = arith.constant dense<0.000000e+00> : vector<16x256xf32>
    %14 = tpu.matmul %13, %0, %cst_16 {dimension_numbers = #tpu.dot_dimension_numbers<[1], [0], [0], [1], [0, 0, 1, 1], [], []>} : vector<16x128xbf16>, vector<128x256xbf16>, vector<16x256xf32> -> vector<16x256xf32>
    %15 = arith.maximumf %11, %14 : vector<16x256xf32>
    %c0_17 = arith.constant 0 : index
    %c0_18 = arith.constant 0 : index
    %c0_19 = arith.constant 0 : index
    %16 = vector.load %arg2[%c0_17, %c0_18, %c0_19] : memref<1x16x128xbf16, #tpu.memory_space<vmem>>, vector<1x16x128xbf16>
    %17 = vector.shape_cast %16 : vector<1x16x128xbf16> to vector<16x128xbf16>
    %c0_20 = arith.constant 0 : index
    %c0_21 = arith.constant 0 : index
    %18 = vector.load %arg5[%c0_20, %c0_21] : memref<128x256xbf16, #tpu.memory_space<vmem>>, vector<128x256xbf16>
    %cst_22 = arith.constant dense<0.000000e+00> : vector<16x256xf32>
    %19 = tpu.matmul %17, %18, %cst_22 {dimension_numbers = #tpu.dot_dimension_numbers<[1], [0], [0], [1], [0, 0, 1, 1], [], []>} : vector<16x128xbf16>, vector<128x256xbf16>, vector<16x256xf32> -> vector<16x256xf32>
    %20 = arith.addf %15, %19 : vector<16x256xf32>
    %c0_23 = arith.constant 0 : index
    %c0_24 = arith.constant 0 : index
    %21 = vector.load %arg6[%c0_23, %c0_24] : memref<1x256xf32, #tpu.memory_space<vmem>>, vector<1x256xf32>
    %22 = vector.broadcast %21 : vector<1x256xf32> to vector<16x256xf32>
    %23 = arith.addf %20, %22 : vector<16x256xf32>
    %cst_25 = arith.constant 2.000000e-01 : f32
    %24 = vector.broadcast %cst_25 : f32 to vector<16x256xf32>
    %25 = arith.mulf %24, %23 : vector<16x256xf32>
    %26 = arith.maximumf %23, %25 : vector<16x256xf32>
    %27 = arith.truncf %26 : vector<16x256xf32> to vector<16x256xbf16>
    %c0_26 = arith.constant 0 : index
    %c0_27 = arith.constant 0 : index
    %c0_28 = arith.constant 0 : index
    %28 = vector.load %arg7[%c0_26, %c0_27, %c0_28] : memref<1x16x256xbf16, #tpu.memory_space<vmem>>, vector<1x16x256xbf16>
    %29 = vector.shape_cast %28 : vector<1x16x256xbf16> to vector<16x256xbf16>
    %30 = vector.shape_cast %27 : vector<16x256xbf16> to vector<1x16x256xbf16>
    tpu.vector_store %arg7[%c0_26, %c0_27, %c0_28], %30 {strides = array<i32>} : memref<1x16x256xbf16, #tpu.memory_space<vmem>>, vector<1x16x256xbf16>,
    return
  }
  func.func @transform_0(%arg0: i32, %arg1: i32) -> (i32, i32, i32) {
    %c0_i32 = arith.constant 0 : i32
    %c0_i32_0 = arith.constant 0 : i32
    return %arg0, %arg1, %c0_i32 : i32, i32, i32
  }
  func.func @transform_1(%arg0: i32, %arg1: i32) -> (i32, i32, i32, i32) {
    %c0_i32 = arith.constant 0 : i32
    %c0_i32_0 = arith.constant 0 : i32
    %c0_i32_1 = arith.constant 0 : i32
    return %arg0, %c0_i32, %arg1, %c0_i32_0 : i32, i32, i32, i32
  }
  func.func @transform_2(%arg0: i32, %arg1: i32) -> (i32, i32) {
    %c0_i32 = arith.constant 0 : i32
    %c0_i32_0 = arith.constant 0 : i32
    %c0_i32_1 = arith.constant 0 : i32
    return %c0_i32, %c0_i32_0 : i32, i32
  }
  func.func @transform_3(%arg0: i32, %arg1: i32) -> (i32, i32) {
    %c0_i32 = arith.constant 0 : i32
    %c0_i32_0 = arith.constant 0 : i32
    %c0_i32_1 = arith.constant 0 : i32
    return %c0_i32, %c0_i32_0 : i32, i32
  }
  func.func @transform_4(%arg0: i32, %arg1: i32) -> (i32, i32) {
    %c0_i32 = arith.constant 0 : i32
    %c0_i32_0 = arith.constant 0 : i32
    %c0_i32_1 = arith.constant 0 : i32
    return %c0_i32, %c0_i32_0 : i32, i32
  }
  func.func @transform_5(%arg0: i32, %arg1: i32) -> (i32, i32, i32) {
    %c0_i32 = arith.constant 0 : i32
    %c0_i32_0 = arith.constant 0 : i32
    return %arg0, %arg1, %c0_i32 : i32, i32, i32
  }
}

module attributes {stable_mosaic.version = 11 : i64} {
  func.func @_conv5_kernel(%arg0: i32, %arg1: i32, %arg2: i32, %arg3: memref<1x16x64xbf16, #tpu.memory_space<vmem>>, %arg4: memref<1x16x64xbf16, #tpu.memory_space<vmem>>, %arg5: memref<1x16x128xbf16, #tpu.memory_space<vmem>>, %arg6: memref<1x16x256xbf16, #tpu.memory_space<vmem>>, %arg7: memref<64x32xbf16, #tpu.memory_space<vmem>>, %arg8: memref<64x32xbf16, #tpu.memory_space<vmem>>, %arg9: memref<128x32xbf16, #tpu.memory_space<vmem>>, %arg10: memref<256x32xbf16, #tpu.memory_space<vmem>>, %arg11: memref<1x32xf32, #tpu.memory_space<vmem>>, %arg12: memref<1x16x32xf32, #tpu.memory_space<vmem>>) attributes {dimension_semantics = [#tpu.dimension_semantics<parallel>, #tpu.dimension_semantics<parallel>, #tpu.dimension_semantics<arbitrary>], iteration_bounds = array<i64: 2, 1, 1>, scalar_prefetch = 0 : i64, scratch_operands = 0 : i64, tpu.core_type = #tpu.core_type<tc>, window_params = [{transform_indices = @transform_0, window_bounds = array<i64: 1, 16, 64>}, {transform_indices = @transform_1, window_bounds = array<i64: 1, 16, 64>}, {transform_indices = @transform_2, window_bounds = array<i64: 1, 16, 128>}, {transform_indices = @transform_3, window_bounds = array<i64: 1, 16, 256>}, {transform_indices = @transform_4, window_bounds = array<i64: 64, 32>}, {transform_indices = @transform_5, window_bounds = array<i64: 64, 32>}, {transform_indices = @transform_6, window_bounds = array<i64: 128, 32>}, {transform_indices = @transform_7, window_bounds = array<i64: 256, 32>}, {transform_indices = @transform_8, window_bounds = array<i64: 1, 32>}, {transform_indices = @transform_9, window_bounds = array<i64: 1, 16, 32>}]} {
    %c0 = arith.constant 0 : index
    %c0_0 = arith.constant 0 : index
    %c0_1 = arith.constant 0 : index
    %0 = vector.load %arg3[%c0, %c0_0, %c0_1] : memref<1x16x64xbf16, #tpu.memory_space<vmem>>, vector<1x16x64xbf16>
    %1 = vector.shape_cast %0 : vector<1x16x64xbf16> to vector<16x64xbf16>
    %c0_2 = arith.constant 0 : index
    %c0_3 = arith.constant 0 : index
    %2 = vector.load %arg7[%c0_2, %c0_3] : memref<64x32xbf16, #tpu.memory_space<vmem>>, vector<64x32xbf16>
    %cst = arith.constant dense<0.000000e+00> : vector<16x32xf32>
    %3 = tpu.matmul %1, %2, %cst {dimension_numbers = #tpu.dot_dimension_numbers<[1], [0], [0], [1], [0, 0, 1, 1], [], []>} : vector<16x64xbf16>, vector<64x32xbf16>, vector<16x32xf32> -> vector<16x32xf32>
    %c0_4 = arith.constant 0 : index
    %c0_5 = arith.constant 0 : index
    %c0_6 = arith.constant 0 : index
    %4 = vector.load %arg4[%c0_4, %c0_5, %c0_6] : memref<1x16x64xbf16, #tpu.memory_space<vmem>>, vector<1x16x64xbf16>
    %5 = vector.shape_cast %4 : vector<1x16x64xbf16> to vector<16x64xbf16>
    %c0_7 = arith.constant 0 : index
    %c0_8 = arith.constant 0 : index
    %6 = vector.load %arg8[%c0_7, %c0_8] : memref<64x32xbf16, #tpu.memory_space<vmem>>, vector<64x32xbf16>
    %cst_9 = arith.constant dense<0.000000e+00> : vector<16x32xf32>
    %7 = tpu.matmul %5, %6, %cst_9 {dimension_numbers = #tpu.dot_dimension_numbers<[1], [0], [0], [1], [0, 0, 1, 1], [], []>} : vector<16x64xbf16>, vector<64x32xbf16>, vector<16x32xf32> -> vector<16x32xf32>
    %8 = arith.addf %3, %7 : vector<16x32xf32>
    %c0_10 = arith.constant 0 : index
    %c0_11 = arith.constant 0 : index
    %c0_12 = arith.constant 0 : index
    %9 = vector.load %arg5[%c0_10, %c0_11, %c0_12] : memref<1x16x128xbf16, #tpu.memory_space<vmem>>, vector<1x16x128xbf16>
    %10 = vector.shape_cast %9 : vector<1x16x128xbf16> to vector<16x128xbf16>
    %c0_13 = arith.constant 0 : index
    %c0_14 = arith.constant 0 : index
    %11 = vector.load %arg9[%c0_13, %c0_14] : memref<128x32xbf16, #tpu.memory_space<vmem>>, vector<128x32xbf16>
    %cst_15 = arith.constant dense<0.000000e+00> : vector<16x32xf32>
    %12 = tpu.matmul %10, %11, %cst_15 {dimension_numbers = #tpu.dot_dimension_numbers<[1], [0], [0], [1], [0, 0, 1, 1], [], []>} : vector<16x128xbf16>, vector<128x32xbf16>, vector<16x32xf32> -> vector<16x32xf32>
    %13 = arith.addf %8, %12 : vector<16x32xf32>
    %c0_16 = arith.constant 0 : index
    %c0_17 = arith.constant 0 : index
    %c0_18 = arith.constant 0 : index
    %14 = vector.load %arg6[%c0_16, %c0_17, %c0_18] : memref<1x16x256xbf16, #tpu.memory_space<vmem>>, vector<1x16x256xbf16>
    %15 = vector.shape_cast %14 : vector<1x16x256xbf16> to vector<16x256xbf16>
    %c0_19 = arith.constant 0 : index
    %c0_20 = arith.constant 0 : index
    %16 = vector.load %arg10[%c0_19, %c0_20] : memref<256x32xbf16, #tpu.memory_space<vmem>>, vector<256x32xbf16>
    %cst_21 = arith.constant dense<0.000000e+00> : vector<16x32xf32>
    %17 = tpu.matmul %15, %16, %cst_21 {dimension_numbers = #tpu.dot_dimension_numbers<[1], [0], [0], [1], [0, 0, 1, 1], [], []>} : vector<16x256xbf16>, vector<256x32xbf16>, vector<16x32xf32> -> vector<16x32xf32>
    %18 = arith.addf %13, %17 : vector<16x32xf32>
    %c0_22 = arith.constant 0 : index
    %c0_23 = arith.constant 0 : index
    %19 = vector.load %arg11[%c0_22, %c0_23] : memref<1x32xf32, #tpu.memory_space<vmem>>, vector<1x32xf32>
    %20 = vector.broadcast %19 : vector<1x32xf32> to vector<16x32xf32>
    %21 = arith.addf %18, %20 : vector<16x32xf32>
    %cst_24 = arith.constant 2.000000e-01 : f32
    %22 = vector.broadcast %cst_24 : f32 to vector<16x32xf32>
    %23 = arith.mulf %22, %21 : vector<16x32xf32>
    %24 = arith.maximumf %21, %23 : vector<16x32xf32>
    %c0_25 = arith.constant 0 : index
    %c0_26 = arith.constant 0 : index
    %c0_27 = arith.constant 0 : index
    %25 = vector.load %arg12[%c0_25, %c0_26, %c0_27] : memref<1x16x32xf32, #tpu.memory_space<vmem>>, vector<1x16x32xf32>
    %26 = vector.shape_cast %25 : vector<1x16x32xf32> to vector<16x32xf32>
    %27 = vector.shape_cast %24 : vector<16x32xf32> to vector<1x16x32xf32>
    tpu.vector_store %arg12[%c0_25, %c0_26, %c0_27], %27 {strides = array<i32>} : memref<1x16x32xf32, #tpu.memory_space<vmem>>, vector<1x16x32xf32>,
    return
  }
  func.func @transform_0(%arg0: i32, %arg1: i32, %arg2: i32) -> (i32, i32, i32) {
    %c0_i32 = arith.constant 0 : i32
    %c0_i32_0 = arith.constant 0 : i32
    return %arg0, %arg1, %c0_i32 : i32, i32, i32
  }
  func.func @transform_1(%arg0: i32, %arg1: i32, %arg2: i32) -> (i32, i32, i32) {
    %c0_i32 = arith.constant 0 : i32
    %c0_i32_0 = arith.constant 0 : i32
    return %arg0, %arg1, %c0_i32 : i32, i32, i32
  }
  func.func @transform_2(%arg0: i32, %arg1: i32, %arg2: i32) -> (i32, i32, i32) {
    %c0_i32 = arith.constant 0 : i32
    %c0_i32_0 = arith.constant 0 : i32
    return %arg0, %arg1, %c0_i32 : i32, i32, i32
  }
  func.func @transform_3(%arg0: i32, %arg1: i32, %arg2: i32) -> (i32, i32, i32) {
    %c0_i32 = arith.constant 0 : i32
    %c0_i32_0 = arith.constant 0 : i32
    return %arg0, %arg1, %c0_i32 : i32, i32, i32
  }
  func.func @transform_4(%arg0: i32, %arg1: i32, %arg2: i32) -> (i32, i32) {
    %c0_i32 = arith.constant 0 : i32
    %c0_i32_0 = arith.constant 0 : i32
    return %c0_i32, %arg2 : i32, i32
  }
  func.func @transform_5(%arg0: i32, %arg1: i32, %arg2: i32) -> (i32, i32) {
    %c0_i32 = arith.constant 0 : i32
    %c0_i32_0 = arith.constant 0 : i32
    return %c0_i32, %arg2 : i32, i32
  }
  func.func @transform_6(%arg0: i32, %arg1: i32, %arg2: i32) -> (i32, i32) {
    %c0_i32 = arith.constant 0 : i32
    %c0_i32_0 = arith.constant 0 : i32
    return %c0_i32, %arg2 : i32, i32
  }
  func.func @transform_7(%arg0: i32, %arg1: i32, %arg2: i32) -> (i32, i32) {
    %c0_i32 = arith.constant 0 : i32
    %c0_i32_0 = arith.constant 0 : i32
    return %c0_i32, %arg2 : i32, i32
  }
  func.func @transform_8(%arg0: i32, %arg1: i32, %arg2: i32) -> (i32, i32) {
    %c0_i32 = arith.constant 0 : i32
    %c0_i32_0 = arith.constant 0 : i32
    return %c0_i32, %arg2 : i32, i32
  }
  func.func @transform_9(%arg0: i32, %arg1: i32, %arg2: i32) -> (i32, i32, i32) {
    %c0_i32 = arith.constant 0 : i32
    return %arg0, %arg1, %arg2 : i32, i32, i32
  }
}

</mosaic_0001>

<bundles_post_ra>
// kernel: dgcnn_forward.11
= control target key start
LH: loop header
LB: loop body
LE: loop exit
PB: predicated region body
PF: predicated region fallthrough
CT: control target
= control target key end

     0   :  { %s716_s12 = smov 0   ;;  %s718_s13 = smov 0   ;;  %s796_s0 = inlined_call_operand.vmem [shape: bf16[2,16,64], index: 0, kind: input, shape index: {}, may-alias: {0,1}]   ;;  %s797_s1 = inlined_call_operand.vmem [shape: bf16[2,16,64], index: 1, kind: input, shape index: {}, may-alias: {0,1}]   ;;  %s798_s2 = inlined_call_operand.vmem [shape: f32[2,1,16], index: 2, kind: input, shape index: {}]   ;;  %s799_s3 = inlined_call_operand.vmem [shape: s32[2,16,4], index: 3, kind: output, shape index: {}]  }
   0x1   :  { %s720_s14 = smov 0  }
   0x2 LB: > { %s25_s15 = sadd.s32 1, %s688_s13  ;;  %p618_p0 = scmp.ge.s32.totalorder %s692_s14, 1  ;;  %s692_s14 = sphi %s720_s14, %s13_s14   ;;  %s688_s13 = sphi %s718_s13, %s801_s13   ;;  %s684_s12 = sphi %s716_s12, %s800_s12  }
   0x3   : > { %p27_p1 = scmp.ge.s32.totalorder %s25_s15, 2  ;;  %p176_p2 = scmp.lt.s32.totalorder %s692_s14, 3 }
   0x5   : > { %s803_s15 = smov (%p27_p1, %s25_s15), 0  ;;  %p177_p3 = pnand %p618_p0, %p176_p2 }
   0x6   : > { %p217_p4 = scmp.lt.s32.totalorder (!%p177_p3), %s684_s12, 1 }
   0x7   : > { %180 = sbr.rel (%p177_p3) target bundleno = 1943 (0x797), region = 32 }
   0xc   : > { %v694_v0 = vmov 0.0   ;;  %vm695_vm0 = vmmov 0   ;;  %s805_s12 = smov (!%p217_p4, %s684_s12), 1  ;;  %vm259_vm1 = vcmask 523264   ;;  %vm318_vm2 = vcmask 130048  }
   0xd   : > { %636 = vmatprep.subr.bf16.mxu0 %v694_v0  ;;  %638 = vmatprep.mubr.msk.bf16.mxu0 %vm695_vm0, %v694_v0  ;;  %s631_s16 = sshll.u32 %s805_s12, 3  ;;  %s233_s25 = scalar_lea.vmem %s798_s2, %s805_s12  ;;  %v316_v13 = vlaneseq }
   0xe   : > { %s224_s19 = scalar_lea.vmem %s796_s0, %s631_s16  ;;  %s230_s22 = scalar_lea.vmem %s797_s1, %s631_s16  ;;  %v628_v4 = vld [vmem:[%s233_s25] ss:$0 sm:$0xff] }
   0xf   : > { %v668_v1 = vld [vmem:[%s230_s22] sm:$0xff]   ;;  %v749_v14 = vand.u32 127, %v316_v13  ;;  %s633_s26 = sshll.u32 %s805_s12, 4 }
  0x10   : > { %v264_v2 = vsel %vm259_vm1, %v668_v1, 0  ;;  %v669_v3 = vld [vmem:[%s224_s19] sm:$0xff]   ;;  %s242_s29 = scalar_lea.vmem %s799_s3, %s633_s26 }
  0x11   : > { %637 = vmatpush3.bf16.xpose.msra.mxu0 %v264_v2  ;;  %vm359_vm13 = vcmp.eq.s32.totalorder %v749_v14, 0  ;;  %vm406_vm14 = vcmp.eq.s32.totalorder %v749_v14, 1 }
  0x18   : > { %639 = vmatmul.mubr.msk.bf16.vlgmr.msra.gmra.mxu0 %vm259_vm1, %v669_v3 }
  0xd8   : > { %v300_v5 = vpop.f32.mrf.mxu0 }
  0xd9   : > { %v314_v6 = vsub.f32 %v300_v5, %v628_v4 }
  0xda   : > { %v640_v7 = vpop.f32.mrf.mxu0 }
  0xdb   : > { %v319_v8 = vsel %vm318_vm2, %v314_v6, -inf }
  0xdc   : > { %320 = vmax.xlane.f32.xlu0 %v319_v8  ;;  %v303_v9 = vpop.f32.mrf.mxu0 }
  0xdd   : > { %v315_v10 = vsub.f32 %v303_v9, %v628_v4 }
  0xde   : > { %v641_v11 = vpop.f32.mrf.mxu0 }
  0xdf   : > { %v322_v12 = vsel %vm318_vm2, %v315_v10, -inf }
  0xe0   : > { %323 = vmax.xlane.f32.xlu0 %v322_v12 }
 0x165   : > { %v321_v15 = vpop.xlane.xlu0 %320 }
 0x166   : > { %vm325_vm3 = vcmp.eq.f32.partialorder %v314_v6, %v321_v15 }
 0x167   : > { %v327_v16 = vsel %vm325_vm3, %v749_v14, 16 }
 0x168   : > { %v329_v17 = vsel %vm318_vm2, %v327_v16, 2147483647 }
 0x169   : > { %v324_v18 = vpop.xlane.xlu0 %323  ;;  %v331_v19 = vshra.s32 %v329_v17, 16  ;;  %v330_v25 = vand.u32 65535, %v329_v17 }
 0x16a   : > { %vm326_vm4 = vcmp.eq.f32.partialorder %v315_v10, %v324_v18 }
 0x16b   : > { %v328_v20 = vsel %vm326_vm4, %v749_v14, 16  ;;  %v333_v21 = vcvt.s32.f32 %v331_v19  ;;  %v332_v27 = vcvt.s32.f32 %v330_v25 }
 0x16c   : > { %v344_v22 = vsel %vm318_vm2, %v328_v20, 2147483647 }
 0x16d   : > { %334 = vmin.xlane.f32.xlu1 %v333_v21  ;;  %v346_v23 = vshra.s32 %v344_v22, 16  ;;  %v345_v28 = vand.u32 65535, %v344_v22 }
 0x16f   : > { %v348_v24 = vcvt.s32.f32 %v346_v23  ;;  %v347_v31 = vcvt.s32.f32 %v345_v28 }
 0x171   : > { %349 = vmin.xlane.f32.xlu1 %v348_v24 }
 0x1f6   : > { %v335_v26 = vpop.xlane.xlu1 %334 }
 0x1f7   : > { %vm336_vm5 = vcmp.eq.f32.partialorder %v333_v21, %v335_v26  ;;  %v341_v33 = vcvt.f32.s32 %v335_v26 }
 0x1f8   : > { %v337_v29 = vsel %vm336_vm5, %v332_v27, inf }
 0x1f9   : > { %338 = vmin.xlane.f32.xlu0 %v337_v29  ;;  %v342_v35 = vshll.u32 %v341_v33, 16 }
 0x1fa   : > { %v350_v30 = vpop.xlane.xlu1 %349 }
 0x1fb   : > { %vm351_vm6 = vcmp.eq.f32.partialorder %v348_v24, %v350_v30  ;;  %v356_v36 = vcvt.f32.s32 %v350_v30 }
 0x1fc   : > { %v352_v32 = vsel %vm351_vm6, %v347_v31, inf  ;;  %vm453_vm6 = vcmp.eq.s32.totalorder %v749_v14, 2 }
 0x1fd   : > { %353 = vmin.xlane.f32.xlu1 %v352_v32  ;;  %v357_v40 = vshll.u32 %v356_v36, 16 }
 0x282   : > { %v339_v34 = vpop.xlane.xlu0 %338 }
 0x283   : > { %v340_v37 = vcvt.f32.s32 %v339_v34 }
 0x285   : > { %v343_v38 = vadd.s32 %v342_v35, %v340_v37 }
 0x286   : > { %v354_v39 = vpop.xlane.xlu1 %353 }
 0x287   : > { %v355_v41 = vcvt.f32.s32 %v354_v39  ;;  %vm362_vm7 = vcmp.eq.s32.totalorder %v749_v14, %v343_v38  ;;  %v360_v7 = vsel %vm359_vm13, %v343_v38, 0 }
 0x288   : > { %v364_v42 = vsel %vm362_vm7, -inf, %v314_v6 }
 0x289   : > { %v358_v43 = vadd.s32 %v357_v40, %v355_v41  ;;  %v366_v44 = vsel %vm318_vm2, %v364_v42, -inf }
 0x28a   : > { %367 = vmax.xlane.f32.xlu0 %v366_v44 }
 0x28b   : > { %vm363_vm8 = vcmp.eq.s32.totalorder %v749_v14, %v358_v43  ;;  %v361_v16 = vsel %vm359_vm13, %v358_v43, 0  ;;  %vm503_vm13 = vcmask 31744  }
 0x28c   : > { %v365_v45 = vsel %vm363_vm8, -inf, %v315_v10 }
 0x28d   : > { %v369_v46 = vsel %vm318_vm2, %v365_v45, -inf }
 0x28e   : > { %370 = vmax.xlane.f32.xlu1 %v369_v46 }
 0x313   : > { %v368_v47 = vpop.xlane.xlu0 %367 }
 0x314   : > { %vm372_vm9 = vcmp.eq.f32.partialorder %v364_v42, %v368_v47 }
 0x315   : > { %v374_v48 = vsel %vm372_vm9, %v749_v14, 16 }
 0x316   : > { %v376_v49 = vsel %vm318_vm2, %v374_v48, 2147483647 }
 0x317   : > { %v371_v50 = vpop.xlane.xlu1 %370  ;;  %v378_v51 = vshra.s32 %v376_v49, 16  ;;  %v377_v57 = vand.u32 65535, %v376_v49 }
 0x318   : > { %vm373_vm10 = vcmp.eq.f32.partialorder %v365_v45, %v371_v50 }
 0x319   : > { %v375_v52 = vsel %vm373_vm10, %v749_v14, 16  ;;  %v380_v53 = vcvt.s32.f32 %v378_v51  ;;  %v379_v59 = vcvt.s32.f32 %v377_v57 }
 0x31a   : > { %v391_v54 = vsel %vm318_vm2, %v375_v52, 2147483647 }
 0x31b   : > { %381 = vmin.xlane.f32.xlu0 %v380_v53  ;;  %v393_v55 = vshra.s32 %v391_v54, 16  ;;  %v392_v60 = vand.u32 65535, %v391_v54 }
 0x31d   : > { %v395_v56 = vcvt.s32.f32 %v393_v55  ;;  %v394_v63 = vcvt.s32.f32 %v392_v60 }
 0x31f   : > { %396 = vmin.xlane.f32.xlu1 %v395_v56 }
 0x3a4   : > { %v382_v58 = vpop.xlane.xlu0 %381 }
 0x3a5   : > { %vm383_vm11 = vcmp.eq.f32.partialorder %v380_v53, %v382_v58  ;;  %v388_v1 = vcvt.f32.s32 %v382_v58 }
 0x3a6   : > { %v384_v61 = vsel %vm383_vm11, %v379_v59, inf }
 0x3a7   : > { %385 = vmin.xlane.f32.xlu0 %v384_v61  ;;  %v389_v3 = vshll.u32 %v388_v1, 16 }
 0x3a8   : > { %v397_v62 = vpop.xlane.xlu1 %396 }
 0x3a9   : > { %vm398_vm12 = vcmp.eq.f32.partialorder %v395_v56, %v397_v62  ;;  %v403_v4 = vcvt.f32.s32 %v397_v62 }
 0x3aa   : > { %v399_v0 = vsel %vm398_vm12, %v394_v63, inf }
 0x3ab   : > { %400 = vmin.xlane.f32.xlu1 %v399_v0  ;;  %v404_v9 = vshll.u32 %v403_v4, 16 }
 0x430   : > { %v386_v2 = vpop.xlane.xlu0 %385 }
 0x431   : > { %v387_v5 = vcvt.f32.s32 %v386_v2 }
 0x433   : > { %v390_v6 = vadd.s32 %v389_v3, %v387_v5 }
 0x434   : > { %v401_v8 = vpop.xlane.xlu1 %400 }
 0x435   : > { %v407_v10 = vsel %vm406_vm14, %v390_v6, %v360_v7  ;;  %v402_v11 = vcvt.f32.s32 %v401_v8  ;;  %vm409_vm15 = vcmp.eq.s32.totalorder %v749_v14, %v390_v6 }
 0x436   : > { %v411_v12 = vsel %vm409_vm15, -inf, %v364_v42 }
 0x437   : > { %v405_v13 = vadd.s32 %v404_v9, %v402_v11  ;;  %v413_v15 = vsel %vm318_vm2, %v411_v12, -inf }
 0x438   : > { %414 = vmax.xlane.f32.xlu0 %v413_v15 }
 0x439   : > { %v408_v17 = vsel %vm406_vm14, %v405_v13, %v361_v16  ;;  %vm410_vm0 = vcmp.eq.s32.totalorder %v749_v14, %v405_v13 }
 0x43a   : > { %v412_v18 = vsel %vm410_vm0, -inf, %v365_v45 }
 0x43b   : > { %v416_v19 = vsel %vm318_vm2, %v412_v18, -inf }
 0x43c   : > { %417 = vmax.xlane.f32.xlu1 %v416_v19 }
 0x4c1   : > { %v415_v20 = vpop.xlane.xlu0 %414 }
 0x4c2   : > { %vm419_vm1 = vcmp.eq.f32.partialorder %v411_v12, %v415_v20 }
 0x4c3   : > { %v421_v21 = vsel %vm419_vm1, %v749_v14, 16 }
 0x4c4   : > { %v423_v22 = vsel %vm318_vm2, %v421_v21, 2147483647 }
 0x4c5   : > { %v418_v23 = vpop.xlane.xlu1 %417  ;;  %v425_v24 = vshra.s32 %v423_v22, 16  ;;  %v424_v30 = vand.u32 65535, %v423_v22 }
 0x4c6   : > { %vm420_vm3 = vcmp.eq.f32.partialorder %v412_v18, %v418_v23 }
 0x4c7   : > { %v422_v25 = vsel %vm420_vm3, %v749_v14, 16  ;;  %v427_v26 = vcvt.s32.f32 %v425_v24  ;;  %v426_v32 = vcvt.s32.f32 %v424_v30 }
 0x4c8   : > { %v438_v27 = vsel %vm318_vm2, %v422_v25, 2147483647 }
 0x4c9   : > { %428 = vmin.xlane.f32.xlu0 %v427_v26  ;;  %v440_v28 = vshra.s32 %v438_v27, 16  ;;  %v439_v33 = vand.u32 65535, %v438_v27 }
 0x4cb   : > { %v442_v29 = vcvt.s32.f32 %v440_v28  ;;  %v441_v36 = vcvt.s32.f32 %v439_v33 }
 0x4cd   : > { %443 = vmin.xlane.f32.xlu1 %v442_v29 }
 0x552   : > { %v429_v31 = vpop.xlane.xlu0 %428 }
 0x553   : > { %vm430_vm4 = vcmp.eq.f32.partialorder %v427_v26, %v429_v31  ;;  %v435_v38 = vcvt.f32.s32 %v429_v31 }
 0x554   : > { %v431_v34 = vsel %vm430_vm4, %v426_v32, inf }
 0x555   : > { %432 = vmin.xlane.f32.xlu0 %v431_v34  ;;  %v436_v40 = vshll.u32 %v435_v38, 16 }
 0x556   : > { %v444_v35 = vpop.xlane.xlu1 %443 }
 0x557   : > { %vm445_vm5 = vcmp.eq.f32.partialorder %v442_v29, %v444_v35  ;;  %v450_v41 = vcvt.f32.s32 %v444_v35 }
 0x558   : > { %v446_v37 = vsel %vm445_vm5, %v441_v36, inf }
 0x559   : > { %447 = vmin.xlane.f32.xlu1 %v446_v37  ;;  %v451_v45 = vshll.u32 %v450_v41, 16 }
 0x5de   : > { %v433_v39 = vpop.xlane.xlu0 %432 }
 0x5df   : > { %v434_v42 = vcvt.f32.s32 %v433_v39 }
 0x5e1   : > { %v437_v43 = vadd.s32 %v436_v40, %v434_v42 }
 0x5e2   : > { %v448_v44 = vpop.xlane.xlu1 %447 }
 0x5e3   : > { %v454_v46 = vsel %vm453_vm6, %v437_v43, %v407_v10  ;;  %v449_v47 = vcvt.f32.s32 %v448_v44  ;;  %vm456_vm7 = vcmp.eq.s32.totalorder %v749_v14, %v437_v43 }
 0x5e4   : > { %v458_v48 = vsel %vm456_vm7, -inf, %v411_v12 }
 0x5e5   : > { %v452_v49 = vadd.s32 %v451_v45, %v449_v47  ;;  %v460_v50 = vsel %vm318_vm2, %v458_v48, -inf }
 0x5e6   : > { %461 = vmax.xlane.f32.xlu0 %v460_v50 }
 0x5e7   : > { %v455_v51 = vsel %vm453_vm6, %v452_v49, %v408_v17  ;;  %vm457_vm8 = vcmp.eq.s32.totalorder %v749_v14, %v452_v49 }
 0x5e8   : > { %v459_v52 = vsel %vm457_vm8, -inf, %v412_v18 }
 0x5e9   : > { %v463_v53 = vsel %vm318_vm2, %v459_v52, -inf }
 0x5ea   : > { %464 = vmax.xlane.f32.xlu1 %v463_v53 }
 0x66f   : > { %v462_v54 = vpop.xlane.xlu0 %461 }
 0x670   : > { %vm466_vm9 = vcmp.eq.f32.partialorder %v458_v48, %v462_v54 }
 0x671   : > { %v468_v55 = vsel %vm466_vm9, %v749_v14, 16 }
 0x672   : > { %v470_v56 = vsel %vm318_vm2, %v468_v55, 2147483647 }
 0x673   : > { %v465_v57 = vpop.xlane.xlu1 %464  ;;  %v472_v58 = vshra.s32 %v470_v56, 16  ;;  %v471_v0 = vand.u32 65535, %v470_v56 }
 0x674   : > { %vm467_vm10 = vcmp.eq.f32.partialorder %v459_v52, %v465_v57 }
 0x675   : > { %v469_v59 = vsel %vm467_vm10, %v749_v14, 16  ;;  %v474_v60 = vcvt.s32.f32 %v472_v58  ;;  %v473_v2 = vcvt.s32.f32 %v471_v0 }
 0x676   : > { %v485_v61 = vsel %vm318_vm2, %v469_v59, 2147483647  ;;  %vm500_vm2 = vcmp.eq.s32.totalorder %v749_v14, 3 }
 0x677   : > { %475 = vmin.xlane.f32.xlu0 %v474_v60  ;;  %v487_v62 = vshra.s32 %v485_v61, 16  ;;  %v486_v3 = vand.u32 65535, %v485_v61 }
 0x679   : > { %v489_v63 = vcvt.s32.f32 %v487_v62  ;;  %v488_v6 = vcvt.s32.f32 %v486_v3 }
 0x67b   : > { %490 = vmin.xlane.f32.xlu1 %v489_v63 }
 0x700   : > { %v476_v1 = vpop.xlane.xlu0 %475 }
 0x701   : > { %vm477_vm11 = vcmp.eq.f32.partialorder %v474_v60, %v476_v1  ;;  %v482_v8 = vcvt.f32.s32 %v476_v1 }
 0x702   : > { %v478_v4 = vsel %vm477_vm11, %v473_v2, inf }
 0x703   : > { %479 = vmin.xlane.f32.xlu0 %v478_v4  ;;  %v483_v10 = vshll.u32 %v482_v8, 16 }
 0x704   : > { %v491_v5 = vpop.xlane.xlu1 %490 }
 0x705   : > { %vm492_vm12 = vcmp.eq.f32.partialorder %v489_v63, %v491_v5  ;;  %v497_v11 = vcvt.f32.s32 %v491_v5 }
 0x706   : > { %v493_v7 = vsel %vm492_vm12, %v488_v6, inf }
 0x707   : > { %494 = vmin.xlane.f32.xlu1 %v493_v7  ;;  %v498_v16 = vshll.u32 %v497_v11, 16 }
 0x78c   : > { %v480_v9 = vpop.xlane.xlu0 %479 }
 0x78d   : > { %v481_v12 = vcvt.f32.s32 %v480_v9 }
 0x78f   : > { %v484_v13 = vadd.s32 %v483_v10, %v481_v12 }
 0x790   : > { %v495_v15 = vpop.xlane.xlu1 %494 }
 0x791   : > { %v501_v17 = vsel %vm500_vm2, %v484_v13, %v454_v46  ;;  %v496_v18 = vcvt.f32.s32 %v495_v15 }
 0x792   : > { %504 = vst.msk [vmem:[%s242_s29] sm:$0xff] %vm503_vm13, %v501_v17 }
 0x793   : > { %v499_v19 = vadd.s32 %v498_v16, %v496_v18 }
 0x795   : > { %v502_v20 = vsel %vm500_vm2, %v499_v19, %v455_v51 }
 0x796   : > { %505 = vst.msk [vmem:[%s242_s29 + $0x8] sm:$0xff] %vm503_vm13, %v502_v20 }
 0x797 PF: > { %s13_s14 = sadd.s32 1, %s692_s14   ;;  %s800_s12 = smov %s688_s13 }
 0x798   : > { %p10_p5 = scmp.ge.s32.totalorder %s13_s14, 4   ;;  %s801_s13 = smov %s803_s15 }
 0x79a   :  { %12 = sbr.rel (!%p10_p5) target bundleno = 2 (0x2), region = 68 }

// kernel: dgcnn_forward.9
= control target key start
LH: loop header
LB: loop body
LE: loop exit
PB: predicated region body
PF: predicated region fallthrough
CT: control target
= control target key end

     0   :  { %s716_s12 = smov 0   ;;  %s718_s13 = smov 0   ;;  %s796_s0 = inlined_call_operand.vmem [shape: bf16[2,16,3], index: 0, kind: input, shape index: {}, may-alias: {0,1}]   ;;  %s797_s1 = inlined_call_operand.vmem [shape: bf16[2,16,3], index: 1, kind: input, shape index: {}, may-alias: {0,1}]   ;;  %s798_s2 = inlined_call_operand.vmem [shape: f32[2,1,16], index: 2, kind: input, shape index: {}]   ;;  %s799_s3 = inlined_call_operand.vmem [shape: s32[2,16,4], index: 3, kind: output, shape index: {}]  }
   0x1   :  { %s720_s14 = smov 0  }
   0x2 LB: > { %s25_s15 = sadd.s32 1, %s688_s13  ;;  %p618_p0 = scmp.ge.s32.totalorder %s692_s14, 1  ;;  %s692_s14 = sphi %s720_s14, %s13_s14   ;;  %s688_s13 = sphi %s718_s13, %s801_s13   ;;  %s684_s12 = sphi %s716_s12, %s800_s12  }
   0x3   : > { %p27_p1 = scmp.ge.s32.totalorder %s25_s15, 2  ;;  %p176_p2 = scmp.lt.s32.totalorder %s692_s14, 3 }
   0x5   : > { %s803_s15 = smov (%p27_p1, %s25_s15), 0  ;;  %p177_p3 = pnand %p618_p0, %p176_p2 }
   0x6   : > { %p217_p4 = scmp.lt.s32.totalorder (!%p177_p3), %s684_s12, 1 }
   0x7   : > { %180 = sbr.rel (%p177_p3) target bundleno = 1943 (0x797), region = 32 }
   0xc   : > { %v694_v0 = vmov 0.0   ;;  %vm695_vm0 = vmmov 0   ;;  %s805_s12 = smov (!%p217_p4, %s684_s12), 1  ;;  %vm259_vm1 = vcmask 23552   ;;  %vm318_vm2 = vcmask 130048  }
   0xd   : > { %636 = vmatprep.subr.bf16.mxu0 %v694_v0  ;;  %638 = vmatprep.mubr.msk.bf16.mxu0 %vm695_vm0, %v694_v0  ;;  %s631_s16 = sshll.u32 %s805_s12, 3  ;;  %s233_s25 = scalar_lea.vmem %s798_s2, %s805_s12  ;;  %v316_v13 = vlaneseq }
   0xe   : > { %s224_s19 = scalar_lea.vmem %s796_s0, %s631_s16  ;;  %s230_s22 = scalar_lea.vmem %s797_s1, %s631_s16  ;;  %v628_v4 = vld [vmem:[%s233_s25] ss:$0 sm:$0xff] }
   0xf   : > { %v668_v1 = vld [vmem:[%s230_s22] sm:$0xff]   ;;  %v749_v14 = vand.u32 127, %v316_v13  ;;  %s633_s26 = sshll.u32 %s805_s12, 4 }
  0x10   : > { %v264_v2 = vsel %vm259_vm1, %v668_v1, 0  ;;  %v669_v3 = vld [vmem:[%s224_s19] sm:$0xff]   ;;  %s242_s29 = scalar_lea.vmem %s799_s3, %s633_s26 }
  0x11   : > { %637 = vmatpush3.bf16.xpose.msra.mxu0 %v264_v2  ;;  %vm359_vm13 = vcmp.eq.s32.totalorder %v749_v14, 0  ;;  %vm406_vm14 = vcmp.eq.s32.totalorder %v749_v14, 1 }
  0x18   : > { %639 = vmatmul.mubr.msk.bf16.vlgmr.msra.gmra.mxu0 %vm259_vm1, %v669_v3 }
  0xd8   : > { %v300_v5 = vpop.f32.mrf.mxu0 }
  0xd9   : > { %v314_v6 = vsub.f32 %v300_v5, %v628_v4 }
  0xda   : > { %v640_v7 = vpop.f32.mrf.mxu0 }
  0xdb   : > { %v319_v8 = vsel %vm318_vm2, %v314_v6, -inf }
  0xdc   : > { %320 = vmax.xlane.f32.xlu0 %v319_v8  ;;  %v303_v9 = vpop.f32.mrf.mxu0 }
  0xdd   : > { %v315_v10 = vsub.f32 %v303_v9, %v628_v4 }
  0xde   : > { %v641_v11 = vpop.f32.mrf.mxu0 }
  0xdf   : > { %v322_v12 = vsel %vm318_vm2, %v315_v10, -inf }
  0xe0   : > { %323 = vmax.xlane.f32.xlu0 %v322_v12 }
 0x165   : > { %v321_v15 = vpop.xlane.xlu0 %320 }
 0x166   : > { %vm325_vm3 = vcmp.eq.f32.partialorder %v314_v6, %v321_v15 }
 0x167   : > { %v327_v16 = vsel %vm325_vm3, %v749_v14, 16 }
 0x168   : > { %v329_v17 = vsel %vm318_vm2, %v327_v16, 2147483647 }
 0x169   : > { %v324_v18 = vpop.xlane.xlu0 %323  ;;  %v331_v19 = vshra.s32 %v329_v17, 16  ;;  %v330_v25 = vand.u32 65535, %v329_v17 }
 0x16a   : > { %vm326_vm4 = vcmp.eq.f32.partialorder %v315_v10, %v324_v18 }
 0x16b   : > { %v328_v20 = vsel %vm326_vm4, %v749_v14, 16  ;;  %v333_v21 = vcvt.s32.f32 %v331_v19  ;;  %v332_v27 = vcvt.s32.f32 %v330_v25 }
 0x16c   : > { %v344_v22 = vsel %vm318_vm2, %v328_v20, 2147483647 }
 0x16d   : > { %334 = vmin.xlane.f32.xlu1 %v333_v21  ;;  %v346_v23 = vshra.s32 %v344_v22, 16  ;;  %v345_v28 = vand.u32 65535, %v344_v22 }
 0x16f   : > { %v348_v24 = vcvt.s32.f32 %v346_v23  ;;  %v347_v31 = vcvt.s32.f32 %v345_v28 }
 0x171   : > { %349 = vmin.xlane.f32.xlu1 %v348_v24 }
 0x1f6   : > { %v335_v26 = vpop.xlane.xlu1 %334 }
 0x1f7   : > { %vm336_vm5 = vcmp.eq.f32.partialorder %v333_v21, %v335_v26  ;;  %v341_v33 = vcvt.f32.s32 %v335_v26 }
 0x1f8   : > { %v337_v29 = vsel %vm336_vm5, %v332_v27, inf }
 0x1f9   : > { %338 = vmin.xlane.f32.xlu0 %v337_v29  ;;  %v342_v35 = vshll.u32 %v341_v33, 16 }
 0x1fa   : > { %v350_v30 = vpop.xlane.xlu1 %349 }
 0x1fb   : > { %vm351_vm6 = vcmp.eq.f32.partialorder %v348_v24, %v350_v30  ;;  %v356_v36 = vcvt.f32.s32 %v350_v30 }
 0x1fc   : > { %v352_v32 = vsel %vm351_vm6, %v347_v31, inf  ;;  %vm453_vm6 = vcmp.eq.s32.totalorder %v749_v14, 2 }
 0x1fd   : > { %353 = vmin.xlane.f32.xlu1 %v352_v32  ;;  %v357_v40 = vshll.u32 %v356_v36, 16 }
 0x282   : > { %v339_v34 = vpop.xlane.xlu0 %338 }
 0x283   : > { %v340_v37 = vcvt.f32.s32 %v339_v34 }
 0x285   : > { %v343_v38 = vadd.s32 %v342_v35, %v340_v37 }
 0x286   : > { %v354_v39 = vpop.xlane.xlu1 %353 }
 0x287   : > { %v355_v41 = vcvt.f32.s32 %v354_v39  ;;  %vm362_vm7 = vcmp.eq.s32.totalorder %v749_v14, %v343_v38  ;;  %v360_v7 = vsel %vm359_vm13, %v343_v38, 0 }
 0x288   : > { %v364_v42 = vsel %vm362_vm7, -inf, %v314_v6 }
 0x289   : > { %v358_v43 = vadd.s32 %v357_v40, %v355_v41  ;;  %v366_v44 = vsel %vm318_vm2, %v364_v42, -inf }
 0x28a   : > { %367 = vmax.xlane.f32.xlu0 %v366_v44 }
 0x28b   : > { %vm363_vm8 = vcmp.eq.s32.totalorder %v749_v14, %v358_v43  ;;  %v361_v16 = vsel %vm359_vm13, %v358_v43, 0  ;;  %vm503_vm13 = vcmask 31744  }
 0x28c   : > { %v365_v45 = vsel %vm363_vm8, -inf, %v315_v10 }
 0x28d   : > { %v369_v46 = vsel %vm318_vm2, %v365_v45, -inf }
 0x28e   : > { %370 = vmax.xlane.f32.xlu1 %v369_v46 }
 0x313   : > { %v368_v47 = vpop.xlane.xlu0 %367 }
 0x314   : > { %vm372_vm9 = vcmp.eq.f32.partialorder %v364_v42, %v368_v47 }
 0x315   : > { %v374_v48 = vsel %vm372_vm9, %v749_v14, 16 }
 0x316   : > { %v376_v49 = vsel %vm318_vm2, %v374_v48, 2147483647 }
 0x317   : > { %v371_v50 = vpop.xlane.xlu1 %370  ;;  %v378_v51 = vshra.s32 %v376_v49, 16  ;;  %v377_v57 = vand.u32 65535, %v376_v49 }
 0x318   : > { %vm373_vm10 = vcmp.eq.f32.partialorder %v365_v45, %v371_v50 }
 0x319   : > { %v375_v52 = vsel %vm373_vm10, %v749_v14, 16  ;;  %v380_v53 = vcvt.s32.f32 %v378_v51  ;;  %v379_v59 = vcvt.s32.f32 %v377_v57 }
 0x31a   : > { %v391_v54 = vsel %vm318_vm2, %v375_v52, 2147483647 }
 0x31b   : > { %381 = vmin.xlane.f32.xlu0 %v380_v53  ;;  %v393_v55 = vshra.s32 %v391_v54, 16  ;;  %v392_v60 = vand.u32 65535, %v391_v54 }
 0x31d   : > { %v395_v56 = vcvt.s32.f32 %v393_v55  ;;  %v394_v63 = vcvt.s32.f32 %v392_v60 }
 0x31f   : > { %396 = vmin.xlane.f32.xlu1 %v395_v56 }
 0x3a4   : > { %v382_v58 = vpop.xlane.xlu0 %381 }
 0x3a5   : > { %vm383_vm11 = vcmp.eq.f32.partialorder %v380_v53, %v382_v58  ;;  %v388_v1 = vcvt.f32.s32 %v382_v58 }
 0x3a6   : > { %v384_v61 = vsel %vm383_vm11, %v379_v59, inf }
 0x3a7   : > { %385 = vmin.xlane.f32.xlu0 %v384_v61  ;;  %v389_v3 = vshll.u32 %v388_v1, 16 }
 0x3a8   : > { %v397_v62 = vpop.xlane.xlu1 %396 }
 0x3a9   : > { %vm398_vm12 = vcmp.eq.f32.partialorder %v395_v56, %v397_v62  ;;  %v403_v4 = vcvt.f32.s32 %v397_v62 }
 0x3aa   : > { %v399_v0 = vsel %vm398_vm12, %v394_v63, inf }
 0x3ab   : > { %400 = vmin.xlane.f32.xlu1 %v399_v0  ;;  %v404_v9 = vshll.u32 %v403_v4, 16 }
 0x430   : > { %v386_v2 = vpop.xlane.xlu0 %385 }
 0x431   : > { %v387_v5 = vcvt.f32.s32 %v386_v2 }
 0x433   : > { %v390_v6 = vadd.s32 %v389_v3, %v387_v5 }
 0x434   : > { %v401_v8 = vpop.xlane.xlu1 %400 }
 0x435   : > { %v407_v10 = vsel %vm406_vm14, %v390_v6, %v360_v7  ;;  %v402_v11 = vcvt.f32.s32 %v401_v8  ;;  %vm409_vm15 = vcmp.eq.s32.totalorder %v749_v14, %v390_v6 }
 0x436   : > { %v411_v12 = vsel %vm409_vm15, -inf, %v364_v42 }
 0x437   : > { %v405_v13 = vadd.s32 %v404_v9, %v402_v11  ;;  %v413_v15 = vsel %vm318_vm2, %v411_v12, -inf }
 0x438   : > { %414 = vmax.xlane.f32.xlu0 %v413_v15 }
 0x439   : > { %v408_v17 = vsel %vm406_vm14, %v405_v13, %v361_v16  ;;  %vm410_vm0 = vcmp.eq.s32.totalorder %v749_v14, %v405_v13 }
 0x43a   : > { %v412_v18 = vsel %vm410_vm0, -inf, %v365_v45 }
 0x43b   : > { %v416_v19 = vsel %vm318_vm2, %v412_v18, -inf }
 0x43c   : > { %417 = vmax.xlane.f32.xlu1 %v416_v19 }
 0x4c1   : > { %v415_v20 = vpop.xlane.xlu0 %414 }
 0x4c2   : > { %vm419_vm1 = vcmp.eq.f32.partialorder %v411_v12, %v415_v20 }
 0x4c3   : > { %v421_v21 = vsel %vm419_vm1, %v749_v14, 16 }
 0x4c4   : > { %v423_v22 = vsel %vm318_vm2, %v421_v21, 2147483647 }
 0x4c5   : > { %v418_v23 = vpop.xlane.xlu1 %417  ;;  %v425_v24 = vshra.s32 %v423_v22, 16  ;;  %v424_v30 = vand.u32 65535, %v423_v22 }
 0x4c6   : > { %vm420_vm3 = vcmp.eq.f32.partialorder %v412_v18, %v418_v23 }
 0x4c7   : > { %v422_v25 = vsel %vm420_vm3, %v749_v14, 16  ;;  %v427_v26 = vcvt.s32.f32 %v425_v24  ;;  %v426_v32 = vcvt.s32.f32 %v424_v30 }
 0x4c8   : > { %v438_v27 = vsel %vm318_vm2, %v422_v25, 2147483647 }
 0x4c9   : > { %428 = vmin.xlane.f32.xlu0 %v427_v26  ;;  %v440_v28 = vshra.s32 %v438_v27, 16  ;;  %v439_v33 = vand.u32 65535, %v438_v27 }
 0x4cb   : > { %v442_v29 = vcvt.s32.f32 %v440_v28  ;;  %v441_v36 = vcvt.s32.f32 %v439_v33 }
 0x4cd   : > { %443 = vmin.xlane.f32.xlu1 %v442_v29 }
 0x552   : > { %v429_v31 = vpop.xlane.xlu0 %428 }
 0x553   : > { %vm430_vm4 = vcmp.eq.f32.partialorder %v427_v26, %v429_v31  ;;  %v435_v38 = vcvt.f32.s32 %v429_v31 }
 0x554   : > { %v431_v34 = vsel %vm430_vm4, %v426_v32, inf }
 0x555   : > { %432 = vmin.xlane.f32.xlu0 %v431_v34  ;;  %v436_v40 = vshll.u32 %v435_v38, 16 }
 0x556   : > { %v444_v35 = vpop.xlane.xlu1 %443 }
 0x557   : > { %vm445_vm5 = vcmp.eq.f32.partialorder %v442_v29, %v444_v35  ;;  %v450_v41 = vcvt.f32.s32 %v444_v35 }
 0x558   : > { %v446_v37 = vsel %vm445_vm5, %v441_v36, inf }
 0x559   : > { %447 = vmin.xlane.f32.xlu1 %v446_v37  ;;  %v451_v45 = vshll.u32 %v450_v41, 16 }
 0x5de   : > { %v433_v39 = vpop.xlane.xlu0 %432 }
 0x5df   : > { %v434_v42 = vcvt.f32.s32 %v433_v39 }
 0x5e1   : > { %v437_v43 = vadd.s32 %v436_v40, %v434_v42 }
 0x5e2   : > { %v448_v44 = vpop.xlane.xlu1 %447 }
 0x5e3   : > { %v454_v46 = vsel %vm453_vm6, %v437_v43, %v407_v10  ;;  %v449_v47 = vcvt.f32.s32 %v448_v44  ;;  %vm456_vm7 = vcmp.eq.s32.totalorder %v749_v14, %v437_v43 }
 0x5e4   : > { %v458_v48 = vsel %vm456_vm7, -inf, %v411_v12 }
 0x5e5   : > { %v452_v49 = vadd.s32 %v451_v45, %v449_v47  ;;  %v460_v50 = vsel %vm318_vm2, %v458_v48, -inf }
 0x5e6   : > { %461 = vmax.xlane.f32.xlu0 %v460_v50 }
 0x5e7   : > { %v455_v51 = vsel %vm453_vm6, %v452_v49, %v408_v17  ;;  %vm457_vm8 = vcmp.eq.s32.totalorder %v749_v14, %v452_v49 }
 0x5e8   : > { %v459_v52 = vsel %vm457_vm8, -inf, %v412_v18 }
 0x5e9   : > { %v463_v53 = vsel %vm318_vm2, %v459_v52, -inf }
 0x5ea   : > { %464 = vmax.xlane.f32.xlu1 %v463_v53 }
 0x66f   : > { %v462_v54 = vpop.xlane.xlu0 %461 }
 0x670   : > { %vm466_vm9 = vcmp.eq.f32.partialorder %v458_v48, %v462_v54 }
 0x671   : > { %v468_v55 = vsel %vm466_vm9, %v749_v14, 16 }
 0x672   : > { %v470_v56 = vsel %vm318_vm2, %v468_v55, 2147483647 }
 0x673   : > { %v465_v57 = vpop.xlane.xlu1 %464  ;;  %v472_v58 = vshra.s32 %v470_v56, 16  ;;  %v471_v0 = vand.u32 65535, %v470_v56 }
 0x674   : > { %vm467_vm10 = vcmp.eq.f32.partialorder %v459_v52, %v465_v57 }
 0x675   : > { %v469_v59 = vsel %vm467_vm10, %v749_v14, 16  ;;  %v474_v60 = vcvt.s32.f32 %v472_v58  ;;  %v473_v2 = vcvt.s32.f32 %v471_v0 }
 0x676   : > { %v485_v61 = vsel %vm318_vm2, %v469_v59, 2147483647  ;;  %vm500_vm2 = vcmp.eq.s32.totalorder %v749_v14, 3 }
 0x677   : > { %475 = vmin.xlane.f32.xlu0 %v474_v60  ;;  %v487_v62 = vshra.s32 %v485_v61, 16  ;;  %v486_v3 = vand.u32 65535, %v485_v61 }
 0x679   : > { %v489_v63 = vcvt.s32.f32 %v487_v62  ;;  %v488_v6 = vcvt.s32.f32 %v486_v3 }
 0x67b   : > { %490 = vmin.xlane.f32.xlu1 %v489_v63 }
 0x700   : > { %v476_v1 = vpop.xlane.xlu0 %475 }
 0x701   : > { %vm477_vm11 = vcmp.eq.f32.partialorder %v474_v60, %v476_v1  ;;  %v482_v8 = vcvt.f32.s32 %v476_v1 }
 0x702   : > { %v478_v4 = vsel %vm477_vm11, %v473_v2, inf }
 0x703   : > { %479 = vmin.xlane.f32.xlu0 %v478_v4  ;;  %v483_v10 = vshll.u32 %v482_v8, 16 }
 0x704   : > { %v491_v5 = vpop.xlane.xlu1 %490 }
 0x705   : > { %vm492_vm12 = vcmp.eq.f32.partialorder %v489_v63, %v491_v5  ;;  %v497_v11 = vcvt.f32.s32 %v491_v5 }
 0x706   : > { %v493_v7 = vsel %vm492_vm12, %v488_v6, inf }
 0x707   : > { %494 = vmin.xlane.f32.xlu1 %v493_v7  ;;  %v498_v16 = vshll.u32 %v497_v11, 16 }
 0x78c   : > { %v480_v9 = vpop.xlane.xlu0 %479 }
 0x78d   : > { %v481_v12 = vcvt.f32.s32 %v480_v9 }
 0x78f   : > { %v484_v13 = vadd.s32 %v483_v10, %v481_v12 }
 0x790   : > { %v495_v15 = vpop.xlane.xlu1 %494 }
 0x791   : > { %v501_v17 = vsel %vm500_vm2, %v484_v13, %v454_v46  ;;  %v496_v18 = vcvt.f32.s32 %v495_v15 }
 0x792   : > { %504 = vst.msk [vmem:[%s242_s29] sm:$0xff] %vm503_vm13, %v501_v17 }
 0x793   : > { %v499_v19 = vadd.s32 %v498_v16, %v496_v18 }
 0x795   : > { %v502_v20 = vsel %vm500_vm2, %v499_v19, %v455_v51 }
 0x796   : > { %505 = vst.msk [vmem:[%s242_s29 + $0x8] sm:$0xff] %vm503_vm13, %v502_v20 }
 0x797 PF: > { %s13_s14 = sadd.s32 1, %s692_s14   ;;  %s800_s12 = smov %s688_s13 }
 0x798   : > { %p10_p5 = scmp.ge.s32.totalorder %s13_s14, 4   ;;  %s801_s13 = smov %s803_s15 }
 0x79a   :  { %12 = sbr.rel (!%p10_p5) target bundleno = 2 (0x2), region = 68 }

// kernel: dgcnn_forward.10
= control target key start
LH: loop header
LB: loop body
LE: loop exit
PB: predicated region body
PF: predicated region fallthrough
CT: control target
= control target key end

     0   :  { %s875_s18 = smov 0   ;;  %s877_s19 = smov 0   ;;  %s938_s0 = inlined_call_operand.vmem [shape: bf16[2,16,3], index: 0, kind: input, shape index: {}]   ;;  %s939_s1 = inlined_call_operand.vmem [shape: bf16[2,4,16,3], index: 1, kind: input, shape index: {}]   ;;  %s940_s2 = inlined_call_operand.vmem [shape: bf16[3,64], index: 2, kind: input, shape index: {}]   ;;  %s941_s3 = inlined_call_operand.vmem [shape: bf16[3,64], index: 3, kind: input, shape index: {}]   ;;  %s942_s4 = inlined_call_operand.vmem [shape: f32[1,64], index: 4, kind: input, shape index: {}]   ;;  %s943_s5 = inlined_call_operand.vmem [shape: bf16[2,16,64], index: 5, kind: output, shape index: {}]  }
   0x1   :  { %s879_s20 = smov 0  }
   0x2 LB: > { %s27_s21 = sadd.s32 1, %s836_s19  ;;  %p713_p0 = scmp.ge.s32.totalorder %s840_s20, 1  ;;  %s840_s20 = sphi %s879_s20, %s15_s20   ;;  %s836_s19 = sphi %s877_s19, %s945_s19   ;;  %s832_s18 = sphi %s875_s18, %s944_s18  }
   0x3   : > { %p29_p1 = scmp.ge.s32.totalorder %s27_s21, 2  ;;  %p225_p2 = scmp.lt.s32.totalorder %s840_s20, 3 }
   0x5   : > { %s947_s21 = smov (%p29_p1, %s27_s21), 0  ;;  %p226_p3 = pnand %p713_p0, %p225_p2 }
   0x6   : > { %p271_p4 = scmp.lt.s32.totalorder (!%p226_p3), %s832_s18, 1 }
   0x7   : > { %229 = sbr.rel (%p226_p3) target bundleno = 244 (0xf4), region = 40 }
   0xc   : > { %v301_v0 = vld [vmem:[%s940_s2] sm:$0x3]  ;;  %vm313_vm0 = vcmask 1040384   ;;  %vm314_vm1 = vcmask 1041408   ;;  %v842_v1 = vmov 0.0   ;;  %v843_v2 = vmov 65535  }
   0xd   : > { %756 = vmatprep.subr.bf16.mxu0 %v842_v1  ;;  %v315_v3 = vsel %vm313_vm0, 4294967295, %v843_v2  ;;  %762 = vmatprep.subr.bf16.mxu1 %v842_v1  ;;  %vm844_vm2 = vmmov 0   ;;  %s949_s18 = smov (!%p271_p4, %s832_s18), 1  ;;  %vm309_vm3 = vcmask 23552   ;;  %v525_v8 = vld [vmem:[%s941_s3] sm:$0x3] }
   0xe   : > { %v316_v4 = vsel %vm314_vm1, %v315_v3, 0  ;;  %758 = vmatprep.mubr.msk.bf16.mxu0 %vm844_vm2, %v842_v1  ;;  %764 = vmatprep.mubr.msk.bf16.mxu1 %vm844_vm2, %v842_v1  ;;  %s742_s24 = sshll.u32 %s949_s18, 5  ;;  %s741_s28 = sshll.u32 %s949_s18, 3  ;;  %v736_v35 = vld [vmem:[%s942_s4] ss:$0 sm:$0xff]  ;;  %vm601_vm4 = vcmask 519168  }
   0xf   : > { %v318_v5 = vand.u32 %v316_v4, %v301_v0  ;;  %s288_s27 = scalar_lea.vmem %s939_s1, %s742_s24  ;;  %s278_s6 = scalar_lea.vmem %s938_s0, %s741_s28  ;;  %v535_v11 = vand.u32 %v525_v8, %v316_v4 }
  0x10   : > { %v813_v6 = vld [vmem:[%s288_s27] sm:$0xff]   ;;  %v814_v7 = vld [vmem:[%s288_s27 + $0x8] sm:$0xff]   ;;  %v815_v9 = vld [vmem:[%s288_s27 + $0x10] sm:$0xff]   ;;  %s298_s13 = scalar_lea.vmem %s943_s5, %s741_s28 }
  0x11   : > { %757 = vmatpush3.bf16.msra.mxu0 %v318_v5  ;;  %763 = vmatpush3.bf16.msra.mxu1 %v318_v5  ;;  %v816_v10 = vld [vmem:[%s288_s27 + $0x18] sm:$0xff]   ;;  %v817_v12 = vld [vmem:[%s278_s6] sm:$0xff]  }
  0x12   : > { %768 = vmatprep.subr.bf16.mxu0 %v842_v1  ;;  %774 = vmatprep.subr.bf16.mxu1 %v842_v1 }
  0x14   : > { %759 = vmatmul.mubr.msk.bf16.vlgmr.msra.gmra.mxu0 %vm309_vm3, %v813_v6  ;;  %765 = vmatmul.mubr.msk.bf16.vlgmr.msra.gmra.mxu1 %vm309_vm3, %v814_v7 }
  0x15   : > { %769 = vmatpush3.bf16.msra.mxu0 %v318_v5  ;;  %775 = vmatpush3.bf16.msra.mxu1 %v318_v5 }
  0x16   : > { %770 = vmatprep.mubr.msk.bf16.mxu0 %vm844_vm2, %v842_v1  ;;  %776 = vmatprep.mubr.msk.bf16.mxu1 %vm844_vm2, %v842_v1 }
  0x17   : > { %780 = vmatprep.subr.bf16.mxu0 %v842_v1 }
  0x1c   : > { %771 = vmatmul.mubr.msk.bf16.vlgmr.msra.gmra.mxu0 %vm309_vm3, %v815_v9  ;;  %777 = vmatmul.mubr.msk.bf16.vlgmr.msra.gmra.mxu1 %vm309_vm3, %v816_v10 }
  0x1d   : > { %781 = vmatpush3.bf16.msra.mxu0 %v535_v11  ;;  %782 = vmatprep.mubr.msk.bf16.mxu0 %vm844_vm2, %v842_v1 }
  0x24   : > { %783 = vmatmul.mubr.msk.bf16.vlgmr.msra.gmra.mxu0 %vm309_vm3, %v817_v12 }
  0xd4   : > { %v354_v13 = vpop.f32.mrf.mxu0  ;;  %v406_v14 = vpop.f32.mrf.mxu1 }
  0xd5   : > { %v413_v22 = vmax.f32 %v354_v13, %v406_v14 }
  0xd6   : > { %v760_v15 = vpop.f32.mrf.mxu0  ;;  %v766_v16 = vpop.f32.mrf.mxu1 }
  0xd8   : > { %v357_v17 = vpop.f32.mrf.mxu0  ;;  %v409_v18 = vpop.f32.mrf.mxu1 }
  0xd9   : > { %v414_v28 = vmax.f32 %v357_v17, %v409_v18 }
  0xda   : > { %v761_v19 = vpop.f32.mrf.mxu0  ;;  %v767_v20 = vpop.f32.mrf.mxu1 }
  0xdc   : > { %v460_v21 = vpop.f32.mrf.mxu0  ;;  %v514_v23 = vpop.f32.mrf.mxu1 }
  0xdd   : > { %v467_v25 = vmax.f32 %v413_v22, %v460_v21 }
  0xde   : > { %v772_v24 = vpop.f32.mrf.mxu0  ;;  %v778_v26 = vpop.f32.mrf.mxu1 }
  0xdf   : > { %v521_v31 = vmax.f32 %v467_v25, %v514_v23 }
  0xe0   : > { %v463_v27 = vpop.f32.mrf.mxu0  ;;  %v517_v29 = vpop.f32.mrf.mxu1 }
  0xe1   : > { %v468_v32 = vmax.f32 %v414_v28, %v463_v27 }
  0xe2   : > { %v773_v30 = vpop.f32.mrf.mxu0  ;;  %v779_v33 = vpop.f32.mrf.mxu1 }
  0xe3   : > { %v522_v38 = vmax.f32 %v468_v32, %v517_v29 }
  0xe4   : > { %v571_v34 = vpop.f32.mrf.mxu0 }
  0xe5   : > { %v578_v36 = vadd.f32 %v571_v34, %v521_v31 }
  0xe6   : > { %v784_v37 = vpop.f32.mrf.mxu0 }
  0xe7   : > { %v587_v39 = vadd.f32 %v736_v35, %v578_v36 }
  0xe8   : > { %v574_v40 = vpop.f32.mrf.mxu0 }
  0xe9   : > { %v589_v41 = vmul.f32 0.2, %v587_v39  ;;  %v579_v42 = vadd.f32 %v574_v40, %v522_v38 }
  0xea   : > { %v785_v43 = vpop.f32.mrf.mxu0 }
  0xeb   : > { %v591_v44 = vmax.f32 %v587_v39, %v589_v41  ;;  %v588_v45 = vadd.f32 %v736_v35, %v579_v42 }
  0xed   : > { %v744_v46 = vpack.c.bf16 %v591_v44, %v591_v44  ;;  %v590_v47 = vmul.f32 0.2, %v588_v45 }
  0xef   : > { %602 = vst.msk [vmem:[%s298_s13] sm:$0xf] %vm601_vm4, %v744_v46  ;;  %v592_v48 = vmax.f32 %v588_v45, %v590_v47 }
  0xf1   : > { %v745_v49 = vpack.c.bf16 %v592_v48, %v592_v48 }
  0xf3   : > { %603 = vst.msk [vmem:[%s298_s13 + $0x4] sm:$0xf] %vm601_vm4, %v745_v49 }
  0xf4 PF: > { %s15_s20 = sadd.s32 1, %s840_s20   ;;  %s944_s18 = smov %s836_s19 }
  0xf5   : > { %p12_p5 = scmp.ge.s32.totalorder %s15_s20, 4   ;;  %s945_s19 = smov %s947_s21 }
  0xf7   :  { %14 = sbr.rel (!%p12_p5) target bundleno = 2 (0x2), region = 76 }

// kernel: dgcnn_forward.12
= control target key start
LH: loop header
LB: loop body
LE: loop exit
PB: predicated region body
PF: predicated region fallthrough
CT: control target
= control target key end

     0   :  { %s986_s18 = smov 0   ;;  %s988_s19 = smov 0   ;;  %s1101_s0 = inlined_call_operand.vmem [shape: bf16[2,16,64], index: 0, kind: input, shape index: {}]   ;;  %s1102_s1 = inlined_call_operand.vmem [shape: bf16[2,4,16,64], index: 1, kind: input, shape index: {}]   ;;  %s1103_s2 = inlined_call_operand.vmem [shape: bf16[64,64], index: 2, kind: input, shape index: {}]   ;;  %s1104_s3 = inlined_call_operand.vmem [shape: bf16[64,64], index: 3, kind: input, shape index: {}]   ;;  %s1105_s4 = inlined_call_operand.vmem [shape: f32[1,64], index: 4, kind: input, shape index: {}]   ;;  %s1106_s5 = inlined_call_operand.vmem [shape: bf16[2,16,64], index: 5, kind: output, shape index: {}]  }
   0x1   :  { %s990_s20 = smov 0  }
   0x2 LB: > { %s27_s21 = sadd.s32 1, %s948_s19  ;;  %p765_p0 = scmp.ge.s32.totalorder %s952_s20, 1  ;;  %s952_s20 = sphi %s990_s20, %s15_s20   ;;  %s948_s19 = sphi %s988_s19, %s1108_s19   ;;  %s944_s18 = sphi %s986_s18, %s1107_s18  }
   0x3   : > { %p29_p1 = scmp.ge.s32.totalorder %s27_s21, 2  ;;  %p225_p2 = scmp.lt.s32.totalorder %s952_s20, 3 }
   0x5   : > { %s1110_s21 = smov (%p29_p1, %s27_s21), 0  ;;  %p226_p3 = pnand %p765_p0, %p225_p2 }
   0x6   : > { %p271_p4 = scmp.lt.s32.totalorder (!%p226_p3), %s944_s18, 1 }
   0x7   : > { %229 = sbr.rel (%p226_p3) target bundleno = 269 (0x10d), region = 40 }
   0xc   : > { %v917_v0 = vld [vmem:[%s1103_s2 + $0x18] sm:$0xff]   ;;  %v954_v1 = vmov 0.0   ;;  %v918_v2 = vld [vmem:[%s1103_s2 + $0x10] sm:$0xff]   ;;  %vm955_vm0 = vmmov 0   ;;  %s1112_s18 = smov (!%p271_p4, %s944_s18), 1  ;;  %v919_v3 = vld [vmem:[%s1103_s2 + $0x8] sm:$0xff]  }
   0xd   : > { %831 = vmatprep.subr.bf16.mxu0 %v954_v1  ;;  %843 = vmatprep.subr.bf16.mxu1 %v954_v1  ;;  %s802_s28 = sshll.u32 %s1112_s18, 5  ;;  %s801_s7 = sshll.u32 %s1112_s18, 3  ;;  %v920_v4 = vld [vmem:[%s1103_s2] sm:$0xff]   ;;  %vm340_vm1 = vcmask 523264   ;;  %v924_v9 = vld [vmem:[%s1104_s3 + $0x18] sm:$0xff]   ;;  %v926_v10 = vld [vmem:[%s1104_s3 + $0x10] sm:$0xff]  }
   0xe   : > { %832 = vmatpush3.bf16.msra.mxu0 %v917_v0  ;;  %844 = vmatpush3.bf16.msra.mxu1 %v917_v0  ;;  %s1029_s6 = scalar_lea.vmem %s1102_s1, %s802_s28  ;;  %s1042_s12 = scalar_lea.vmem %s1101_s0, %s801_s7  ;;  %v927_v11 = vld [vmem:[%s1104_s3 + $0x8] sm:$0xff]   ;;  %v928_v12 = vld [vmem:[%s1104_s3] sm:$0xff]   ;;  %vm653_vm2 = vcmask 519168  }
   0xf   : > { %833 = vmatprep.subr.bf16.mxu0 %v954_v1  ;;  %845 = vmatprep.subr.bf16.mxu1 %v954_v1  ;;  %v921_v5 = vld [vmem:[%s1029_s6] sm:$0xff]   ;;  %v922_v6 = vld [vmem:[%s1029_s6 + $0x8] sm:$0xff]   ;;  %v923_v7 = vld [vmem:[%s1029_s6 + $0x10] sm:$0xff]   ;;  %s298_s29 = scalar_lea.vmem %s1106_s5, %s801_s7 }
  0x10   : > { %839 = vmatprep.mubr.msk.bf16.mxu0 %vm955_vm0, %v954_v1  ;;  %851 = vmatprep.mubr.msk.bf16.mxu1 %vm955_vm0, %v954_v1  ;;  %v925_v8 = vld [vmem:[%s1029_s6 + $0x18] sm:$0xff]   ;;  %v929_v13 = vld [vmem:[%s1042_s12] sm:$0xff]  }
  0x11   : > { %v796_v36 = vld [vmem:[%s1105_s4] ss:$0 sm:$0xff] }
  0x12   : > { %834 = vmatpush3.bf16.msra.mxu0 %v918_v2  ;;  %846 = vmatpush3.bf16.msra.mxu1 %v918_v2 }
  0x13   : > { %835 = vmatprep.subr.bf16.mxu0 %v954_v1  ;;  %847 = vmatprep.subr.bf16.mxu1 %v954_v1 }
  0x16   : > { %836 = vmatpush3.bf16.msra.mxu0 %v919_v3  ;;  %848 = vmatpush3.bf16.msra.mxu1 %v919_v3 }
  0x17   : > { %837 = vmatprep.subr.bf16.mxu0 %v954_v1  ;;  %849 = vmatprep.subr.bf16.mxu1 %v954_v1 }
  0x1a   : > { %838 = vmatpush3.bf16.msra.mxu0 %v920_v4  ;;  %850 = vmatpush3.bf16.msra.mxu1 %v920_v4 }
  0x1b   : > { %855 = vmatprep.subr.bf16.mxu0 %v954_v1  ;;  %867 = vmatprep.subr.bf16.mxu1 %v954_v1 }
  0x1d   : > { %840 = vmatmul.mubr.msk.bf16.vlgmr.msra.gmra.mxu0 %vm340_vm1, %v921_v5  ;;  %852 = vmatmul.mubr.msk.bf16.vlgmr.msra.gmra.mxu1 %vm340_vm1, %v922_v6 }
  0x1e   : > { %856 = vmatpush3.bf16.msra.mxu0 %v917_v0  ;;  %868 = vmatpush3.bf16.msra.mxu1 %v917_v0 }
  0x1f   : > { %857 = vmatprep.subr.bf16.mxu0 %v954_v1  ;;  %869 = vmatprep.subr.bf16.mxu1 %v954_v1 }
  0x20   : > { %863 = vmatprep.mubr.msk.bf16.mxu0 %vm955_vm0, %v954_v1  ;;  %875 = vmatprep.mubr.msk.bf16.mxu1 %vm955_vm0, %v954_v1 }
  0x22   : > { %858 = vmatpush3.bf16.msra.mxu0 %v918_v2  ;;  %870 = vmatpush3.bf16.msra.mxu1 %v918_v2 }
  0x23   : > { %859 = vmatprep.subr.bf16.mxu0 %v954_v1  ;;  %871 = vmatprep.subr.bf16.mxu1 %v954_v1 }
  0x26   : > { %860 = vmatpush3.bf16.msra.mxu0 %v919_v3  ;;  %872 = vmatpush3.bf16.msra.mxu1 %v919_v3 }
  0x27   : > { %861 = vmatprep.subr.bf16.mxu0 %v954_v1  ;;  %873 = vmatprep.subr.bf16.mxu1 %v954_v1 }
  0x2a   : > { %862 = vmatpush3.bf16.msra.mxu0 %v920_v4  ;;  %874 = vmatpush3.bf16.msra.mxu1 %v920_v4 }
  0x2b   : > { %879 = vmatprep.subr.bf16.mxu0 %v954_v1 }
  0x2d   : > { %864 = vmatmul.mubr.msk.bf16.vlgmr.msra.gmra.mxu0 %vm340_vm1, %v923_v7  ;;  %876 = vmatmul.mubr.msk.bf16.vlgmr.msra.gmra.mxu1 %vm340_vm1, %v925_v8 }
  0x2e   : > { %880 = vmatpush3.bf16.msra.mxu0 %v924_v9  ;;  %887 = vmatprep.mubr.msk.bf16.mxu0 %vm955_vm0, %v954_v1 }
  0x2f   : > { %881 = vmatprep.subr.bf16.mxu0 %v954_v1 }
  0x32   : > { %882 = vmatpush3.bf16.msra.mxu0 %v926_v10 }
  0x33   : > { %883 = vmatprep.subr.bf16.mxu0 %v954_v1 }
  0x36   : > { %884 = vmatpush3.bf16.msra.mxu0 %v927_v11 }
  0x37   : > { %885 = vmatprep.subr.bf16.mxu0 %v954_v1 }
  0x3a   : > { %886 = vmatpush3.bf16.msra.mxu0 %v928_v12 }
  0x3d   : > { %888 = vmatmul.mubr.msk.bf16.vlgmr.msra.gmra.mxu0 %vm340_vm1, %v929_v13 }
  0xdd   : > { %v378_v14 = vpop.f32.mrf.mxu0  ;;  %v430_v15 = vpop.f32.mrf.mxu1 }
  0xde   : > { %v437_v30 = vmax.f32 %v378_v14, %v430_v15 }
  0xdf   : > { %v841_v16 = vpop.f32.mrf.mxu0  ;;  %v853_v17 = vpop.f32.mrf.mxu1 }
  0xe1   : > { %v381_v18 = vpop.f32.mrf.mxu0  ;;  %v433_v19 = vpop.f32.mrf.mxu1 }
  0xe2   : > { %v438_v32 = vmax.f32 %v381_v18, %v433_v19 }
  0xe3   : > { %v842_v20 = vpop.f32.mrf.mxu0  ;;  %v854_v21 = vpop.f32.mrf.mxu1 }
  0xed   : > { %v484_v22 = vpop.f32.mrf.mxu0  ;;  %v538_v23 = vpop.f32.mrf.mxu1 }
  0xee   : > { %v491_v31 = vmax.f32 %v437_v30, %v484_v22 }
  0xef   : > { %v865_v24 = vpop.f32.mrf.mxu0  ;;  %v877_v25 = vpop.f32.mrf.mxu1 }
  0xf0   : > { %v545_v33 = vmax.f32 %v491_v31, %v538_v23 }
  0xf1   : > { %v487_v26 = vpop.f32.mrf.mxu0  ;;  %v541_v27 = vpop.f32.mrf.mxu1 }
  0xf2   : > { %v492_v34 = vmax.f32 %v438_v32, %v487_v26 }
  0xf3   : > { %v866_v28 = vpop.f32.mrf.mxu0  ;;  %v878_v29 = vpop.f32.mrf.mxu1 }
  0xf4   : > { %v546_v39 = vmax.f32 %v492_v34, %v541_v27 }
  0xfd   : > { %v623_v35 = vpop.f32.mrf.mxu0 }
  0xfe   : > { %v630_v37 = vadd.f32 %v623_v35, %v545_v33 }
  0xff   : > { %v889_v38 = vpop.f32.mrf.mxu0 }
 0x100   : > { %v639_v40 = vadd.f32 %v796_v36, %v630_v37 }
 0x101   : > { %v626_v41 = vpop.f32.mrf.mxu0 }
 0x102   : > { %v641_v42 = vmul.f32 0.2, %v639_v40  ;;  %v631_v43 = vadd.f32 %v626_v41, %v546_v39 }
 0x103   : > { %v890_v44 = vpop.f32.mrf.mxu0 }
 0x104   : > { %v643_v45 = vmax.f32 %v639_v40, %v641_v42  ;;  %v640_v46 = vadd.f32 %v796_v36, %v631_v43 }
 0x106   : > { %v804_v47 = vpack.c.bf16 %v643_v45, %v643_v45  ;;  %v642_v48 = vmul.f32 0.2, %v640_v46 }
 0x108   : > { %654 = vst.msk [vmem:[%s298_s29] sm:$0xf] %vm653_vm2, %v804_v47  ;;  %v644_v49 = vmax.f32 %v640_v46, %v642_v48 }
 0x10a   : > { %v805_v50 = vpack.c.bf16 %v644_v49, %v644_v49 }
 0x10c   : > { %655 = vst.msk [vmem:[%s298_s29 + $0x4] sm:$0xf] %vm653_vm2, %v805_v50 }
 0x10d PF: > { %s15_s20 = sadd.s32 1, %s952_s20   ;;  %s1107_s18 = smov %s948_s19 }
 0x10e   : > { %p12_p5 = scmp.ge.s32.totalorder %s15_s20, 4   ;;  %s1108_s19 = smov %s1110_s21 }
 0x110   :  { %14 = sbr.rel (!%p12_p5) target bundleno = 2 (0x2), region = 76 }

// kernel: dgcnn_forward.14
= control target key start
LH: loop header
LB: loop body
LE: loop exit
PB: predicated region body
PF: predicated region fallthrough
CT: control target
= control target key end

     0   :  { %s990_s18 = smov 0   ;;  %s992_s19 = smov 0   ;;  %s1105_s0 = inlined_call_operand.vmem [shape: bf16[2,16,64], index: 0, kind: input, shape index: {}]   ;;  %s1106_s1 = inlined_call_operand.vmem [shape: bf16[2,4,16,64], index: 1, kind: input, shape index: {}]   ;;  %s1107_s2 = inlined_call_operand.vmem [shape: bf16[64,128], index: 2, kind: input, shape index: {}]   ;;  %s1108_s3 = inlined_call_operand.vmem [shape: bf16[64,128], index: 3, kind: input, shape index: {}]   ;;  %s1109_s4 = inlined_call_operand.vmem [shape: f32[1,128], index: 4, kind: input, shape index: {}]   ;;  %s1110_s5 = inlined_call_operand.vmem [shape: bf16[2,16,128], index: 5, kind: output, shape index: {}]  }
   0x1   :  { %s994_s20 = smov 0  }
   0x2 LB: > { %s27_s21 = sadd.s32 1, %s952_s19  ;;  %p764_p0 = scmp.ge.s32.totalorder %s956_s20, 1  ;;  %s956_s20 = sphi %s994_s20, %s15_s20   ;;  %s952_s19 = sphi %s992_s19, %s1112_s19   ;;  %s948_s18 = sphi %s990_s18, %s1111_s18  }
   0x3   : > { %p29_p1 = scmp.ge.s32.totalorder %s27_s21, 2  ;;  %p225_p2 = scmp.lt.s32.totalorder %s956_s20, 3 }
   0x5   : > { %s1114_s21 = smov (%p29_p1, %s27_s21), 0  ;;  %p226_p3 = pnand %p764_p0, %p225_p2 }
   0x6   : > { %p271_p4 = scmp.lt.s32.totalorder (!%p226_p3), %s948_s18, 1 }
   0x7   : > { %229 = sbr.rel (%p226_p3) target bundleno = 269 (0x10d), region = 40 }
   0xc   : > { %v921_v0 = vld [vmem:[%s1107_s2 + $0x18] sm:$0xff]   ;;  %v958_v1 = vmov 0.0   ;;  %v922_v2 = vld [vmem:[%s1107_s2 + $0x10] sm:$0xff]   ;;  %vm959_vm0 = vmmov 0   ;;  %s1116_s18 = smov (!%p271_p4, %s948_s18), 1  ;;  %v923_v3 = vld [vmem:[%s1107_s2 + $0x8] sm:$0xff]  }
   0xd   : > { %835 = vmatprep.subr.bf16.mxu0 %v958_v1  ;;  %847 = vmatprep.subr.bf16.mxu1 %v958_v1  ;;  %s801_s28 = sshll.u32 %s1116_s18, 5  ;;  %s800_s7 = sshll.u32 %s1116_s18, 3  ;;  %v924_v4 = vld [vmem:[%s1107_s2] sm:$0xff]   ;;  %vm340_vm1 = vcmask 523264   ;;  %v928_v9 = vld [vmem:[%s1108_s3 + $0x18] sm:$0xff]   ;;  %v930_v10 = vld [vmem:[%s1108_s3 + $0x10] sm:$0xff]  }
   0xe   : > { %836 = vmatpush3.bf16.msra.mxu0 %v921_v0  ;;  %848 = vmatpush3.bf16.msra.mxu1 %v921_v0  ;;  %s1033_s6 = scalar_lea.vmem %s1106_s1, %s801_s28  ;;  %s1046_s12 = scalar_lea.vmem %s1105_s0, %s800_s7  ;;  %v931_v11 = vld [vmem:[%s1108_s3 + $0x8] sm:$0xff]   ;;  %v932_v12 = vld [vmem:[%s1108_s3] sm:$0xff]  }
   0xf   : > { %837 = vmatprep.subr.bf16.mxu0 %v958_v1  ;;  %849 = vmatprep.subr.bf16.mxu1 %v958_v1  ;;  %v925_v5 = vld [vmem:[%s1033_s6] sm:$0xff]   ;;  %v926_v6 = vld [vmem:[%s1033_s6 + $0x8] sm:$0xff]   ;;  %v927_v7 = vld [vmem:[%s1033_s6 + $0x10] sm:$0xff]   ;;  %s298_s29 = scalar_lea.vmem %s1110_s5, %s800_s7 }
  0x10   : > { %843 = vmatprep.mubr.msk.bf16.mxu0 %vm959_vm0, %v958_v1  ;;  %855 = vmatprep.mubr.msk.bf16.mxu1 %vm959_vm0, %v958_v1  ;;  %v929_v8 = vld [vmem:[%s1033_s6 + $0x18] sm:$0xff]   ;;  %v933_v13 = vld [vmem:[%s1046_s12] sm:$0xff]  }
  0x11   : > { %v795_v36 = vld [vmem:[%s1109_s4] ss:$0 sm:$0xff] }
  0x12   : > { %838 = vmatpush3.bf16.msra.mxu0 %v922_v2  ;;  %850 = vmatpush3.bf16.msra.mxu1 %v922_v2 }
  0x13   : > { %839 = vmatprep.subr.bf16.mxu0 %v958_v1  ;;  %851 = vmatprep.subr.bf16.mxu1 %v958_v1 }
  0x16   : > { %840 = vmatpush3.bf16.msra.mxu0 %v923_v3  ;;  %852 = vmatpush3.bf16.msra.mxu1 %v923_v3 }
  0x17   : > { %841 = vmatprep.subr.bf16.mxu0 %v958_v1  ;;  %853 = vmatprep.subr.bf16.mxu1 %v958_v1 }
  0x1a   : > { %842 = vmatpush3.bf16.msra.mxu0 %v924_v4  ;;  %854 = vmatpush3.bf16.msra.mxu1 %v924_v4 }
  0x1b   : > { %859 = vmatprep.subr.bf16.mxu0 %v958_v1  ;;  %871 = vmatprep.subr.bf16.mxu1 %v958_v1 }
  0x1d   : > { %844 = vmatmul.mubr.msk.bf16.vlgmr.msra.gmra.mxu0 %vm340_vm1, %v925_v5  ;;  %856 = vmatmul.mubr.msk.bf16.vlgmr.msra.gmra.mxu1 %vm340_vm1, %v926_v6 }
  0x1e   : > { %860 = vmatpush3.bf16.msra.mxu0 %v921_v0  ;;  %872 = vmatpush3.bf16.msra.mxu1 %v921_v0 }
  0x1f   : > { %861 = vmatprep.subr.bf16.mxu0 %v958_v1  ;;  %873 = vmatprep.subr.bf16.mxu1 %v958_v1 }
  0x20   : > { %867 = vmatprep.mubr.msk.bf16.mxu0 %vm959_vm0, %v958_v1  ;;  %879 = vmatprep.mubr.msk.bf16.mxu1 %vm959_vm0, %v958_v1 }
  0x22   : > { %862 = vmatpush3.bf16.msra.mxu0 %v922_v2  ;;  %874 = vmatpush3.bf16.msra.mxu1 %v922_v2 }
  0x23   : > { %863 = vmatprep.subr.bf16.mxu0 %v958_v1  ;;  %875 = vmatprep.subr.bf16.mxu1 %v958_v1 }
  0x26   : > { %864 = vmatpush3.bf16.msra.mxu0 %v923_v3  ;;  %876 = vmatpush3.bf16.msra.mxu1 %v923_v3 }
  0x27   : > { %865 = vmatprep.subr.bf16.mxu0 %v958_v1  ;;  %877 = vmatprep.subr.bf16.mxu1 %v958_v1 }
  0x2a   : > { %866 = vmatpush3.bf16.msra.mxu0 %v924_v4  ;;  %878 = vmatpush3.bf16.msra.mxu1 %v924_v4 }
  0x2b   : > { %883 = vmatprep.subr.bf16.mxu0 %v958_v1 }
  0x2d   : > { %868 = vmatmul.mubr.msk.bf16.vlgmr.msra.gmra.mxu0 %vm340_vm1, %v927_v7  ;;  %880 = vmatmul.mubr.msk.bf16.vlgmr.msra.gmra.mxu1 %vm340_vm1, %v929_v8 }
  0x2e   : > { %884 = vmatpush3.bf16.msra.mxu0 %v928_v9  ;;  %891 = vmatprep.mubr.msk.bf16.mxu0 %vm959_vm0, %v958_v1 }
  0x2f   : > { %885 = vmatprep.subr.bf16.mxu0 %v958_v1 }
  0x32   : > { %886 = vmatpush3.bf16.msra.mxu0 %v930_v10 }
  0x33   : > { %887 = vmatprep.subr.bf16.mxu0 %v958_v1 }
  0x36   : > { %888 = vmatpush3.bf16.msra.mxu0 %v931_v11 }
  0x37   : > { %889 = vmatprep.subr.bf16.mxu0 %v958_v1 }
  0x3a   : > { %890 = vmatpush3.bf16.msra.mxu0 %v932_v12 }
  0x3d   : > { %892 = vmatmul.mubr.msk.bf16.vlgmr.msra.gmra.mxu0 %vm340_vm1, %v933_v13 }
  0xdd   : > { %v378_v14 = vpop.f32.mrf.mxu0  ;;  %v430_v15 = vpop.f32.mrf.mxu1 }
  0xde   : > { %v437_v30 = vmax.f32 %v378_v14, %v430_v15 }
  0xdf   : > { %v845_v16 = vpop.f32.mrf.mxu0  ;;  %v857_v17 = vpop.f32.mrf.mxu1 }
  0xe1   : > { %v381_v18 = vpop.f32.mrf.mxu0  ;;  %v433_v19 = vpop.f32.mrf.mxu1 }
  0xe2   : > { %v438_v32 = vmax.f32 %v381_v18, %v433_v19 }
  0xe3   : > { %v846_v20 = vpop.f32.mrf.mxu0  ;;  %v858_v21 = vpop.f32.mrf.mxu1 }
  0xed   : > { %v484_v22 = vpop.f32.mrf.mxu0  ;;  %v538_v23 = vpop.f32.mrf.mxu1 }
  0xee   : > { %v491_v31 = vmax.f32 %v437_v30, %v484_v22 }
  0xef   : > { %v869_v24 = vpop.f32.mrf.mxu0  ;;  %v881_v25 = vpop.f32.mrf.mxu1 }
  0xf0   : > { %v545_v33 = vmax.f32 %v491_v31, %v538_v23 }
  0xf1   : > { %v487_v26 = vpop.f32.mrf.mxu0  ;;  %v541_v27 = vpop.f32.mrf.mxu1 }
  0xf2   : > { %v492_v34 = vmax.f32 %v438_v32, %v487_v26 }
  0xf3   : > { %v870_v28 = vpop.f32.mrf.mxu0  ;;  %v882_v29 = vpop.f32.mrf.mxu1 }
  0xf4   : > { %v546_v39 = vmax.f32 %v492_v34, %v541_v27 }
  0xfd   : > { %v623_v35 = vpop.f32.mrf.mxu0 }
  0xfe   : > { %v630_v37 = vadd.f32 %v623_v35, %v545_v33 }
  0xff   : > { %v893_v38 = vpop.f32.mrf.mxu0 }
 0x100   : > { %v639_v40 = vadd.f32 %v795_v36, %v630_v37 }
 0x101   : > { %v626_v41 = vpop.f32.mrf.mxu0 }
 0x102   : > { %v631_v42 = vadd.f32 %v626_v41, %v546_v39  ;;  %v641_v44 = vmul.f32 0.2, %v639_v40 }
 0x103   : > { %v894_v43 = vpop.f32.mrf.mxu0 }
 0x104   : > { %v640_v45 = vadd.f32 %v795_v36, %v631_v42  ;;  %v643_v47 = vmax.f32 %v639_v40, %v641_v44 }
 0x106   : > { %v642_v46 = vmul.f32 0.2, %v640_v45 }
 0x108   : > { %v644_v48 = vmax.f32 %v640_v45, %v642_v46 }
 0x10a   : > { %v808_v49 = vpack.c.bf16 %v644_v48, %v643_v47 }
 0x10c   : > { %809 = vst [vmem:[%s298_s29] sm:$0xff] %v808_v49  }
 0x10d PF: > { %s15_s20 = sadd.s32 1, %s956_s20   ;;  %s1111_s18 = smov %s952_s19 }
 0x10e   : > { %p12_p5 = scmp.ge.s32.totalorder %s15_s20, 4   ;;  %s1112_s19 = smov %s1114_s21 }
 0x110   :  { %14 = sbr.rel (!%p12_p5) target bundleno = 2 (0x2), region = 76 }

// kernel: dgcnn_forward.15
= control target key start
LH: loop header
LB: loop body
LE: loop exit
PB: predicated region body
PF: predicated region fallthrough
CT: control target
= control target key end

     0   :  { %s710_s12 = smov 0   ;;  %s712_s13 = smov 0   ;;  %s790_s0 = inlined_call_operand.vmem [shape: bf16[2,16,128], index: 0, kind: input, shape index: {}, may-alias: {0,1}]   ;;  %s791_s1 = inlined_call_operand.vmem [shape: bf16[2,16,128], index: 1, kind: input, shape index: {}, may-alias: {0,1}]   ;;  %s792_s2 = inlined_call_operand.vmem [shape: f32[2,1,16], index: 2, kind: input, shape index: {}]   ;;  %s793_s3 = inlined_call_operand.vmem [shape: s32[2,16,4], index: 3, kind: output, shape index: {}]  }
   0x1   :  { %s714_s14 = smov 0  }
   0x2 LB: > { %s25_s15 = sadd.s32 1, %s682_s13  ;;  %p613_p0 = scmp.ge.s32.totalorder %s686_s14, 1  ;;  %s686_s14 = sphi %s714_s14, %s13_s14   ;;  %s682_s13 = sphi %s712_s13, %s795_s13   ;;  %s678_s12 = sphi %s710_s12, %s794_s12  }
   0x3   : > { %p27_p1 = scmp.ge.s32.totalorder %s25_s15, 2  ;;  %p176_p2 = scmp.lt.s32.totalorder %s686_s14, 3 }
   0x5   : > { %s797_s15 = smov (%p27_p1, %s25_s15), 0  ;;  %p177_p3 = pnand %p613_p0, %p176_p2 }
   0x6   : > { %p217_p4 = scmp.lt.s32.totalorder (!%p177_p3), %s678_s12, 1 }
   0x7   : > { %180 = sbr.rel (%p177_p3) target bundleno = 1942 (0x796), region = 32 }
   0xc   : > { %v688_v0 = vmov 0.0   ;;  %vm689_vm0 = vmmov 0   ;;  %s799_s12 = smov (!%p217_p4, %s678_s12), 1  ;;  %vm313_vm1 = vcmask 130048   ;;  %v311_v12 = vlaneseq }
   0xd   : > { %630 = vmatprep.subr.bf16.mxu0 %v688_v0  ;;  %632 = vmatprep.mubr.msk.bf16.mxu0 %vm689_vm0, %v688_v0  ;;  %s625_s16 = sshll.u32 %s799_s12, 3  ;;  %s233_s25 = scalar_lea.vmem %s792_s2, %s799_s12 }
   0xe   : > { %s230_s19 = scalar_lea.vmem %s791_s1, %s625_s16  ;;  %s224_s22 = scalar_lea.vmem %s790_s0, %s625_s16  ;;  %v622_v3 = vld [vmem:[%s233_s25] ss:$0 sm:$0xff]  ;;  %v743_v13 = vand.u32 127, %v311_v12 }
   0xf   : > { %v662_v1 = vld [vmem:[%s230_s19] sm:$0xff]   ;;  %s627_s26 = sshll.u32 %s799_s12, 4 }
  0x10   : > { %631 = vmatpush3.bf16.xpose.msra.mxu0 %v662_v1  ;;  %v663_v2 = vld [vmem:[%s224_s22] sm:$0xff]   ;;  %vm354_vm12 = vcmp.eq.s32.totalorder %v743_v13, 0  ;;  %vm401_vm13 = vcmp.eq.s32.totalorder %v743_v13, 1  ;;  %s242_s29 = scalar_lea.vmem %s793_s3, %s627_s26 }
  0x17   : > { %633 = vmatmul.mubr.bf16.vlgmr.msra.gmra.mxu0 %v663_v2 }
  0xd7   : > { %v295_v4 = vpop.f32.mrf.mxu0 }
  0xd8   : > { %v309_v5 = vsub.f32 %v295_v4, %v622_v3 }
  0xd9   : > { %v634_v6 = vpop.f32.mrf.mxu0 }
  0xda   : > { %v314_v7 = vsel %vm313_vm1, %v309_v5, -inf }
  0xdb   : > { %315 = vmax.xlane.f32.xlu0 %v314_v7  ;;  %v298_v8 = vpop.f32.mrf.mxu0 }
  0xdc   : > { %v310_v9 = vsub.f32 %v298_v8, %v622_v3 }
  0xdd   : > { %v635_v10 = vpop.f32.mrf.mxu0 }
  0xde   : > { %v317_v11 = vsel %vm313_vm1, %v310_v9, -inf }
  0xdf   : > { %318 = vmax.xlane.f32.xlu0 %v317_v11 }
 0x164   : > { %v316_v14 = vpop.xlane.xlu0 %315 }
 0x165   : > { %vm320_vm2 = vcmp.eq.f32.partialorder %v309_v5, %v316_v14 }
 0x166   : > { %v322_v15 = vsel %vm320_vm2, %v743_v13, 16 }
 0x167   : > { %v324_v16 = vsel %vm313_vm1, %v322_v15, 2147483647 }
 0x168   : > { %v319_v17 = vpop.xlane.xlu0 %318  ;;  %v326_v18 = vshra.s32 %v324_v16, 16  ;;  %v325_v24 = vand.u32 65535, %v324_v16 }
 0x169   : > { %vm321_vm3 = vcmp.eq.f32.partialorder %v310_v9, %v319_v17 }
 0x16a   : > { %v323_v19 = vsel %vm321_vm3, %v743_v13, 16  ;;  %v328_v20 = vcvt.s32.f32 %v326_v18  ;;  %v327_v26 = vcvt.s32.f32 %v325_v24 }
 0x16b   : > { %v339_v21 = vsel %vm313_vm1, %v323_v19, 2147483647 }
 0x16c   : > { %329 = vmin.xlane.f32.xlu1 %v328_v20  ;;  %v341_v22 = vshra.s32 %v339_v21, 16  ;;  %v340_v27 = vand.u32 65535, %v339_v21 }
 0x16e   : > { %v343_v23 = vcvt.s32.f32 %v341_v22  ;;  %v342_v30 = vcvt.s32.f32 %v340_v27 }
 0x170   : > { %344 = vmin.xlane.f32.xlu1 %v343_v23 }
 0x1f5   : > { %v330_v25 = vpop.xlane.xlu1 %329 }
 0x1f6   : > { %vm331_vm4 = vcmp.eq.f32.partialorder %v328_v20, %v330_v25  ;;  %v336_v32 = vcvt.f32.s32 %v330_v25 }
 0x1f7   : > { %v332_v28 = vsel %vm331_vm4, %v327_v26, inf }
 0x1f8   : > { %333 = vmin.xlane.f32.xlu0 %v332_v28  ;;  %v337_v34 = vshll.u32 %v336_v32, 16 }
 0x1f9   : > { %v345_v29 = vpop.xlane.xlu1 %344 }
 0x1fa   : > { %vm346_vm5 = vcmp.eq.f32.partialorder %v343_v23, %v345_v29  ;;  %v351_v35 = vcvt.f32.s32 %v345_v29 }
 0x1fb   : > { %v347_v31 = vsel %vm346_vm5, %v342_v30, inf  ;;  %vm448_vm5 = vcmp.eq.s32.totalorder %v743_v13, 2 }
 0x1fc   : > { %348 = vmin.xlane.f32.xlu1 %v347_v31  ;;  %v352_v39 = vshll.u32 %v351_v35, 16 }
 0x281   : > { %v334_v33 = vpop.xlane.xlu0 %333 }
 0x282   : > { %v335_v36 = vcvt.f32.s32 %v334_v33 }
 0x284   : > { %v338_v37 = vadd.s32 %v337_v34, %v335_v36 }
 0x285   : > { %v349_v38 = vpop.xlane.xlu1 %348 }
 0x286   : > { %v350_v40 = vcvt.f32.s32 %v349_v38  ;;  %vm357_vm6 = vcmp.eq.s32.totalorder %v743_v13, %v338_v37  ;;  %v355_v6 = vsel %vm354_vm12, %v338_v37, 0 }
 0x287   : > { %v359_v41 = vsel %vm357_vm6, -inf, %v309_v5 }
 0x288   : > { %v353_v42 = vadd.s32 %v352_v39, %v350_v40  ;;  %v361_v43 = vsel %vm313_vm1, %v359_v41, -inf }
 0x289   : > { %362 = vmax.xlane.f32.xlu0 %v361_v43 }
 0x28a   : > { %vm358_vm7 = vcmp.eq.s32.totalorder %v743_v13, %v353_v42  ;;  %v356_v15 = vsel %vm354_vm12, %v353_v42, 0  ;;  %vm498_vm12 = vcmask 31744  }
 0x28b   : > { %v360_v44 = vsel %vm358_vm7, -inf, %v310_v9 }
 0x28c   : > { %v364_v45 = vsel %vm313_vm1, %v360_v44, -inf }
 0x28d   : > { %365 = vmax.xlane.f32.xlu1 %v364_v45 }
 0x312   : > { %v363_v46 = vpop.xlane.xlu0 %362 }
 0x313   : > { %vm367_vm8 = vcmp.eq.f32.partialorder %v359_v41, %v363_v46 }
 0x314   : > { %v369_v47 = vsel %vm367_vm8, %v743_v13, 16 }
 0x315   : > { %v371_v48 = vsel %vm313_vm1, %v369_v47, 2147483647 }
 0x316   : > { %v366_v49 = vpop.xlane.xlu1 %365  ;;  %v373_v50 = vshra.s32 %v371_v48, 16  ;;  %v372_v56 = vand.u32 65535, %v371_v48 }
 0x317   : > { %vm368_vm9 = vcmp.eq.f32.partialorder %v360_v44, %v366_v49 }
 0x318   : > { %v370_v51 = vsel %vm368_vm9, %v743_v13, 16  ;;  %v375_v52 = vcvt.s32.f32 %v373_v50  ;;  %v374_v58 = vcvt.s32.f32 %v372_v56 }
 0x319   : > { %v386_v53 = vsel %vm313_vm1, %v370_v51, 2147483647 }
 0x31a   : > { %376 = vmin.xlane.f32.xlu0 %v375_v52  ;;  %v388_v54 = vshra.s32 %v386_v53, 16  ;;  %v387_v59 = vand.u32 65535, %v386_v53 }
 0x31c   : > { %v390_v55 = vcvt.s32.f32 %v388_v54  ;;  %v389_v62 = vcvt.s32.f32 %v387_v59 }
 0x31e   : > { %391 = vmin.xlane.f32.xlu1 %v390_v55 }
 0x3a3   : > { %v377_v57 = vpop.xlane.xlu0 %376 }
 0x3a4   : > { %vm378_vm10 = vcmp.eq.f32.partialorder %v375_v52, %v377_v57  ;;  %v383_v0 = vcvt.f32.s32 %v377_v57 }
 0x3a5   : > { %v379_v60 = vsel %vm378_vm10, %v374_v58, inf }
 0x3a6   : > { %380 = vmin.xlane.f32.xlu0 %v379_v60  ;;  %v384_v2 = vshll.u32 %v383_v0, 16 }
 0x3a7   : > { %v392_v61 = vpop.xlane.xlu1 %391 }
 0x3a8   : > { %vm393_vm11 = vcmp.eq.f32.partialorder %v390_v55, %v392_v61  ;;  %v398_v3 = vcvt.f32.s32 %v392_v61 }
 0x3a9   : > { %v394_v63 = vsel %vm393_vm11, %v389_v62, inf }
 0x3aa   : > { %395 = vmin.xlane.f32.xlu1 %v394_v63  ;;  %v399_v8 = vshll.u32 %v398_v3, 16 }
 0x42f   : > { %v381_v1 = vpop.xlane.xlu0 %380 }
 0x430   : > { %v382_v4 = vcvt.f32.s32 %v381_v1 }
 0x432   : > { %v385_v5 = vadd.s32 %v384_v2, %v382_v4 }
 0x433   : > { %v396_v7 = vpop.xlane.xlu1 %395 }
 0x434   : > { %v402_v9 = vsel %vm401_vm13, %v385_v5, %v355_v6  ;;  %v397_v10 = vcvt.f32.s32 %v396_v7  ;;  %vm404_vm14 = vcmp.eq.s32.totalorder %v743_v13, %v385_v5 }
 0x435   : > { %v406_v11 = vsel %vm404_vm14, -inf, %v359_v41 }
 0x436   : > { %v400_v12 = vadd.s32 %v399_v8, %v397_v10  ;;  %v408_v14 = vsel %vm313_vm1, %v406_v11, -inf }
 0x437   : > { %409 = vmax.xlane.f32.xlu0 %v408_v14 }
 0x438   : > { %v403_v16 = vsel %vm401_vm13, %v400_v12, %v356_v15  ;;  %vm405_vm15 = vcmp.eq.s32.totalorder %v743_v13, %v400_v12 }
 0x439   : > { %v407_v17 = vsel %vm405_vm15, -inf, %v360_v44 }
 0x43a   : > { %v411_v18 = vsel %vm313_vm1, %v407_v17, -inf }
 0x43b   : > { %412 = vmax.xlane.f32.xlu1 %v411_v18 }
 0x4c0   : > { %v410_v19 = vpop.xlane.xlu0 %409 }
 0x4c1   : > { %vm414_vm0 = vcmp.eq.f32.partialorder %v406_v11, %v410_v19 }
 0x4c2   : > { %v416_v20 = vsel %vm414_vm0, %v743_v13, 16 }
 0x4c3   : > { %v418_v21 = vsel %vm313_vm1, %v416_v20, 2147483647 }
 0x4c4   : > { %v413_v22 = vpop.xlane.xlu1 %412  ;;  %v420_v23 = vshra.s32 %v418_v21, 16  ;;  %v419_v29 = vand.u32 65535, %v418_v21 }
 0x4c5   : > { %vm415_vm2 = vcmp.eq.f32.partialorder %v407_v17, %v413_v22 }
 0x4c6   : > { %v417_v24 = vsel %vm415_vm2, %v743_v13, 16  ;;  %v422_v25 = vcvt.s32.f32 %v420_v23  ;;  %v421_v31 = vcvt.s32.f32 %v419_v29 }
 0x4c7   : > { %v433_v26 = vsel %vm313_vm1, %v417_v24, 2147483647 }
 0x4c8   : > { %423 = vmin.xlane.f32.xlu0 %v422_v25  ;;  %v435_v27 = vshra.s32 %v433_v26, 16  ;;  %v434_v32 = vand.u32 65535, %v433_v26 }
 0x4ca   : > { %v437_v28 = vcvt.s32.f32 %v435_v27  ;;  %v436_v35 = vcvt.s32.f32 %v434_v32 }
 0x4cc   : > { %438 = vmin.xlane.f32.xlu1 %v437_v28 }
 0x551   : > { %v424_v30 = vpop.xlane.xlu0 %423 }
 0x552   : > { %vm425_vm3 = vcmp.eq.f32.partialorder %v422_v25, %v424_v30  ;;  %v430_v37 = vcvt.f32.s32 %v424_v30 }
 0x553   : > { %v426_v33 = vsel %vm425_vm3, %v421_v31, inf }
 0x554   : > { %427 = vmin.xlane.f32.xlu0 %v426_v33  ;;  %v431_v39 = vshll.u32 %v430_v37, 16 }
 0x555   : > { %v439_v34 = vpop.xlane.xlu1 %438 }
 0x556   : > { %vm440_vm4 = vcmp.eq.f32.partialorder %v437_v28, %v439_v34  ;;  %v445_v40 = vcvt.f32.s32 %v439_v34 }
 0x557   : > { %v441_v36 = vsel %vm440_vm4, %v436_v35, inf }
 0x558   : > { %442 = vmin.xlane.f32.xlu1 %v441_v36  ;;  %v446_v44 = vshll.u32 %v445_v40, 16 }
 0x5dd   : > { %v428_v38 = vpop.xlane.xlu0 %427 }
 0x5de   : > { %v429_v41 = vcvt.f32.s32 %v428_v38 }
 0x5e0   : > { %v432_v42 = vadd.s32 %v431_v39, %v429_v41 }
 0x5e1   : > { %v443_v43 = vpop.xlane.xlu1 %442 }
 0x5e2   : > { %v449_v45 = vsel %vm448_vm5, %v432_v42, %v402_v9  ;;  %v444_v46 = vcvt.f32.s32 %v443_v43  ;;  %vm451_vm6 = vcmp.eq.s32.totalorder %v743_v13, %v432_v42 }
 0x5e3   : > { %v453_v47 = vsel %vm451_vm6, -inf, %v406_v11 }
 0x5e4   : > { %v447_v48 = vadd.s32 %v446_v44, %v444_v46  ;;  %v455_v49 = vsel %vm313_vm1, %v453_v47, -inf }
 0x5e5   : > { %456 = vmax.xlane.f32.xlu0 %v455_v49 }
 0x5e6   : > { %v450_v50 = vsel %vm448_vm5, %v447_v48, %v403_v16  ;;  %vm452_vm7 = vcmp.eq.s32.totalorder %v743_v13, %v447_v48 }
 0x5e7   : > { %v454_v51 = vsel %vm452_vm7, -inf, %v407_v17 }
 0x5e8   : > { %v458_v52 = vsel %vm313_vm1, %v454_v51, -inf }
 0x5e9   : > { %459 = vmax.xlane.f32.xlu1 %v458_v52 }
 0x66e   : > { %v457_v53 = vpop.xlane.xlu0 %456 }
 0x66f   : > { %vm461_vm8 = vcmp.eq.f32.partialorder %v453_v47, %v457_v53 }
 0x670   : > { %v463_v54 = vsel %vm461_vm8, %v743_v13, 16 }
 0x671   : > { %v465_v55 = vsel %vm313_vm1, %v463_v54, 2147483647 }
 0x672   : > { %v460_v56 = vpop.xlane.xlu1 %459  ;;  %v467_v57 = vshra.s32 %v465_v55, 16  ;;  %v466_v63 = vand.u32 65535, %v465_v55 }
 0x673   : > { %vm462_vm9 = vcmp.eq.f32.partialorder %v454_v51, %v460_v56 }
 0x674   : > { %v464_v58 = vsel %vm462_vm9, %v743_v13, 16  ;;  %v469_v59 = vcvt.s32.f32 %v467_v57  ;;  %v468_v1 = vcvt.s32.f32 %v466_v63 }
 0x675   : > { %v480_v60 = vsel %vm313_vm1, %v464_v58, 2147483647  ;;  %vm495_vm1 = vcmp.eq.s32.totalorder %v743_v13, 3 }
 0x676   : > { %470 = vmin.xlane.f32.xlu0 %v469_v59  ;;  %v482_v61 = vshra.s32 %v480_v60, 16  ;;  %v481_v2 = vand.u32 65535, %v480_v60 }
 0x678   : > { %v484_v62 = vcvt.s32.f32 %v482_v61  ;;  %v483_v5 = vcvt.s32.f32 %v481_v2 }
 0x67a   : > { %485 = vmin.xlane.f32.xlu1 %v484_v62 }
 0x6ff   : > { %v471_v0 = vpop.xlane.xlu0 %470 }
 0x700   : > { %vm472_vm10 = vcmp.eq.f32.partialorder %v469_v59, %v471_v0  ;;  %v477_v7 = vcvt.f32.s32 %v471_v0 }
 0x701   : > { %v473_v3 = vsel %vm472_vm10, %v468_v1, inf }
 0x702   : > { %474 = vmin.xlane.f32.xlu0 %v473_v3  ;;  %v478_v9 = vshll.u32 %v477_v7, 16 }
 0x703   : > { %v486_v4 = vpop.xlane.xlu1 %485 }
 0x704   : > { %vm487_vm11 = vcmp.eq.f32.partialorder %v484_v62, %v486_v4  ;;  %v492_v10 = vcvt.f32.s32 %v486_v4 }
 0x705   : > { %v488_v6 = vsel %vm487_vm11, %v483_v5, inf }
 0x706   : > { %489 = vmin.xlane.f32.xlu1 %v488_v6  ;;  %v493_v15 = vshll.u32 %v492_v10, 16 }
 0x78b   : > { %v475_v8 = vpop.xlane.xlu0 %474 }
 0x78c   : > { %v476_v11 = vcvt.f32.s32 %v475_v8 }
 0x78e   : > { %v479_v12 = vadd.s32 %v478_v9, %v476_v11 }
 0x78f   : > { %v490_v14 = vpop.xlane.xlu1 %489 }
 0x790   : > { %v496_v16 = vsel %vm495_vm1, %v479_v12, %v449_v45  ;;  %v491_v17 = vcvt.f32.s32 %v490_v14 }
 0x791   : > { %499 = vst.msk [vmem:[%s242_s29] sm:$0xff] %vm498_vm12, %v496_v16 }
 0x792   : > { %v494_v18 = vadd.s32 %v493_v15, %v491_v17 }
 0x794   : > { %v497_v19 = vsel %vm495_vm1, %v494_v18, %v450_v50 }
 0x795   : > { %500 = vst.msk [vmem:[%s242_s29 + $0x8] sm:$0xff] %vm498_vm12, %v497_v19 }
 0x796 PF: > { %s13_s14 = sadd.s32 1, %s686_s14   ;;  %s794_s12 = smov %s682_s13 }
 0x797   : > { %p10_p5 = scmp.ge.s32.totalorder %s13_s14, 4   ;;  %s795_s13 = smov %s797_s15 }
 0x799   :  { %12 = sbr.rel (!%p10_p5) target bundleno = 2 (0x2), region = 68 }

// kernel: dgcnn_forward.16
= control target key start
LH: loop header
LB: loop body
LE: loop exit
PB: predicated region body
PF: predicated region fallthrough
CT: control target
= control target key end

     0   :  { %s1114_s18 = smov 0   ;;  %s1116_s19 = smov 0   ;;  %s1268_s0 = inlined_call_operand.vmem [shape: bf16[2,16,128], index: 0, kind: input, shape index: {}]   ;;  %s1269_s1 = inlined_call_operand.vmem [shape: bf16[2,4,16,128], index: 1, kind: input, shape index: {}]   ;;  %s1270_s2 = inlined_call_operand.vmem [shape: bf16[128,256], index: 2, kind: input, shape index: {}]   ;;  %s1271_s3 = inlined_call_operand.vmem [shape: bf16[128,256], index: 3, kind: input, shape index: {}]   ;;  %s1272_s4 = inlined_call_operand.vmem [shape: f32[1,256], index: 4, kind: input, shape index: {}]   ;;  %s1273_s5 = inlined_call_operand.vmem [shape: bf16[2,16,256], index: 5, kind: output, shape index: {}]  }
   0x1   :  { %s1118_s20 = smov 0  }
   0x2 LB: > { %s27_s21 = sadd.s32 1, %s1077_s19  ;;  %p922_p0 = scmp.ge.s32.totalorder %s1081_s20, 1  ;;  %s1081_s20 = sphi %s1118_s20, %s15_s20   ;;  %s1077_s19 = sphi %s1116_s19, %s1275_s19   ;;  %s1073_s18 = sphi %s1114_s18, %s1274_s18  }
   0x3   : > { %p29_p1 = scmp.ge.s32.totalorder %s27_s21, 2  ;;  %p225_p2 = scmp.lt.s32.totalorder %s1081_s20, 3 }
   0x5   : > { %s1277_s21 = smov (%p29_p1, %s27_s21), 0  ;;  %p226_p3 = pnand %p922_p0, %p225_p2 }
   0x6   : > { %p272_p4 = scmp.lt.s32.totalorder (!%p226_p3), %s1073_s18, 1 }
   0x7   : > { %229 = sbr.rel (%p226_p3) target bundleno = 320 (0x140), region = 40 }
   0xc   : > { %v1006_v0 = vld [vmem:[%s1270_s2 + $0x74] ss:$8 sps:$4 sm:$0xff]   ;;  %v1008_v1 = vld [vmem:[%s1270_s2 + $0x70] ss:$8 sps:$4 sm:$0xff]   ;;  %v1083_v2 = vmov 0   ;;  %s1279_s18 = smov (!%p272_p4, %s1073_s18), 1  ;;  %v771_v46 = vlaneseq }
   0xd   : > { %439 = vmatprep.mubr.bf16.mxu0 %v1083_v2  ;;  %491 = vmatprep.mubr.bf16.mxu1 %v1083_v2  ;;  %v1009_v3 = vld [vmem:[%s1270_s2 + $0x64] ss:$8 sps:$4 sm:$0xff]   ;;  %v1011_v4 = vld [vmem:[%s1270_s2 + $0x60] ss:$8 sps:$4 sm:$0xff]   ;;  %v1012_v5 = vld [vmem:[%s1270_s2 + $0x54] ss:$8 sps:$4 sm:$0xff]  }
   0xe   : > { %407 = vmatprep.subr.bf16.mxu0 %v1006_v0  ;;  %459 = vmatprep.subr.bf16.mxu1 %v1006_v0  ;;  %s977_s7 = sshll.u32 %s1279_s18, 5  ;;  %v1014_v6 = vld [vmem:[%s1270_s2 + $0x50] ss:$8 sps:$4 sm:$0xff]   ;;  %v1015_v7 = vld [vmem:[%s1270_s2 + $0x44] ss:$8 sps:$4 sm:$0xff]   ;;  %s976_s6 = sshll.u32 %s1279_s18, 3 }
   0xf   : > { %408 = vmatpush1.bf16.msra.mxu0 %v1008_v1  ;;  %460 = vmatpush1.bf16.msra.mxu1 %v1008_v1  ;;  %s1161_s14 = scalar_lea.vmem %s1269_s1, %s977_s7  ;;  %v1017_v8 = vld [vmem:[%s1270_s2 + $0x40] ss:$8 sps:$4 sm:$0xff]   ;;  %v1018_v9 = vld [vmem:[%s1270_s2 + $0x34] ss:$8 sps:$4 sm:$0xff]   ;;  %v1020_v10 = vld [vmem:[%s1270_s2 + $0x30] ss:$8 sps:$4 sm:$0xff]   ;;  %s1191_s13 = scalar_lea.vmem %s1268_s0, %s976_s6 }
  0x10   : > { %409 = vmatprep.subr.bf16.mxu0 %v1009_v3  ;;  %461 = vmatprep.subr.bf16.mxu1 %v1009_v3  ;;  %v1021_v11 = vld [vmem:[%s1270_s2 + $0x24] ss:$8 sps:$4 sm:$0xff]   ;;  %v1023_v12 = vld [vmem:[%s1270_s2 + $0x20] ss:$8 sps:$4 sm:$0xff]   ;;  %v1024_v13 = vld [vmem:[%s1270_s2 + $0x14] ss:$8 sps:$4 sm:$0xff]  }
  0x11   : > { %v1026_v14 = vld [vmem:[%s1270_s2 + $0x10] ss:$8 sps:$4 sm:$0xff]   ;;  %v1027_v15 = vld [vmem:[%s1270_s2 + $0x4] ss:$8 sps:$4 sm:$0xff]   ;;  %v1029_v16 = vld [vmem:[%s1270_s2] ss:$8 sps:$4 sm:$0xff]  }
  0x12   : > { %v1030_v17 = vld [vmem:[%s1161_s14] sm:$0xff]   ;;  %v1031_v18 = vld [vmem:[%s1161_s14 + $0x8] sm:$0xff]   ;;  %v1035_v19 = vld [vmem:[%s1271_s3 + $0x74] ss:$8 sps:$4 sm:$0xff]   ;;  %v772_v50 = vshrl.u32 %v771_v46, 7  ;;  %s978_s8 = sshll.u32 %s1279_s18, 4 }
  0x13   : > { %410 = vmatpush1.bf16.msra.mxu0 %v1011_v4  ;;  %462 = vmatpush1.bf16.msra.mxu1 %v1011_v4  ;;  %v1032_v20 = vld [vmem:[%s1161_s14 + $0x10] sm:$0xff]   ;;  %v1036_v21 = vld [vmem:[%s1161_s14 + $0x18] sm:$0xff]   ;;  %v1039_v23 = vld [vmem:[%s1271_s3 + $0x64] ss:$8 sps:$4 sm:$0xff]   ;;  %s300_s11 = scalar_lea.vmem %s1273_s5, %s978_s8 }
  0x14   : > { %411 = vmatprep.subr.bf16.mxu0 %v1012_v5  ;;  %463 = vmatprep.subr.bf16.mxu1 %v1012_v5  ;;  %v1033_v22 = vld [vmem:[%s1271_s3 + $0x70] ss:$8 sps:$4 sm:$0xff]   ;;  %v1037_v24 = vld [vmem:[%s1271_s3 + $0x60] ss:$8 sps:$4 sm:$0xff]   ;;  %v1042_v25 = vld [vmem:[%s1271_s3 + $0x54] ss:$8 sps:$4 sm:$0xff]  }
  0x15   : > { %v1040_v26 = vld [vmem:[%s1271_s3 + $0x50] ss:$8 sps:$4 sm:$0xff]   ;;  %v1045_v27 = vld [vmem:[%s1271_s3 + $0x44] ss:$8 sps:$4 sm:$0xff]   ;;  %v1043_v28 = vld [vmem:[%s1271_s3 + $0x40] ss:$8 sps:$4 sm:$0xff]  }
  0x16   : > { %v1048_v29 = vld [vmem:[%s1271_s3 + $0x34] ss:$8 sps:$4 sm:$0xff]   ;;  %v1046_v30 = vld [vmem:[%s1271_s3 + $0x30] ss:$8 sps:$4 sm:$0xff]   ;;  %v1051_v31 = vld [vmem:[%s1271_s3 + $0x24] ss:$8 sps:$4 sm:$0xff]  }
  0x17   : > { %412 = vmatpush1.bf16.msra.mxu0 %v1014_v6  ;;  %464 = vmatpush1.bf16.msra.mxu1 %v1014_v6  ;;  %v1049_v32 = vld [vmem:[%s1271_s3 + $0x20] ss:$8 sps:$4 sm:$0xff]   ;;  %v1054_v33 = vld [vmem:[%s1271_s3 + $0x14] ss:$8 sps:$4 sm:$0xff]   ;;  %v1052_v34 = vld [vmem:[%s1271_s3 + $0x10] ss:$8 sps:$4 sm:$0xff]  }
  0x18   : > { %413 = vmatprep.subr.bf16.mxu0 %v1015_v7  ;;  %465 = vmatprep.subr.bf16.mxu1 %v1015_v7  ;;  %v1057_v35 = vld [vmem:[%s1271_s3 + $0x4] ss:$8 sps:$4 sm:$0xff]   ;;  %v1055_v36 = vld [vmem:[%s1271_s3] ss:$8 sps:$4 sm:$0xff]   ;;  %v773_v56 = vsub.s32 0, %v772_v50  ;;  %v777_v60 = vsub.s32 1, %v772_v50 }
  0x19   : > { %v1058_v37 = vld [vmem:[%s1191_s13] sm:$0xff]  }
  0x1a   : > { %v769_v57 = vld [vmem:[%s1272_s4] sm:$0x3] }
  0x1b   : > { %414 = vmatpush1.bf16.msra.mxu0 %v1017_v8  ;;  %466 = vmatpush1.bf16.msra.mxu1 %v1017_v8 }
  0x1c   : > { %415 = vmatprep.subr.bf16.mxu0 %v1018_v9  ;;  %467 = vmatprep.subr.bf16.mxu1 %v1018_v9 }
  0x1f   : > { %416 = vmatpush1.bf16.msra.mxu0 %v1020_v10  ;;  %468 = vmatpush1.bf16.msra.mxu1 %v1020_v10 }
  0x20   : > { %417 = vmatprep.subr.bf16.mxu0 %v1021_v11  ;;  %469 = vmatprep.subr.bf16.mxu1 %v1021_v11 }
  0x23   : > { %418 = vmatpush1.bf16.msra.mxu0 %v1023_v12  ;;  %470 = vmatpush1.bf16.msra.mxu1 %v1023_v12 }
  0x24   : > { %419 = vmatprep.subr.bf16.mxu0 %v1024_v13  ;;  %471 = vmatprep.subr.bf16.mxu1 %v1024_v13 }
  0x27   : > { %420 = vmatpush1.bf16.msra.mxu0 %v1026_v14  ;;  %472 = vmatpush1.bf16.msra.mxu1 %v1026_v14 }
  0x28   : > { %421 = vmatprep.subr.bf16.mxu0 %v1027_v15  ;;  %473 = vmatprep.subr.bf16.mxu1 %v1027_v15 }
  0x2b   : > { %422 = vmatpush1.bf16.msra.mxu0 %v1029_v16  ;;  %474 = vmatpush1.bf16.msra.mxu1 %v1029_v16 }
  0x2c   : > { %515 = vmatprep.subr.bf16.mxu0 %v1006_v0  ;;  %571 = vmatprep.subr.bf16.mxu1 %v1006_v0 }
  0x2e   : > { %440 = vmatmul.mubr.bf16.vlgmr.msra.gmra.mxu0 %v1030_v17  ;;  %492 = vmatmul.mubr.bf16.vlgmr.msra.gmra.mxu1 %v1031_v18 }
  0x2f   : > { %516 = vmatpush1.bf16.msra.mxu0 %v1008_v1  ;;  %572 = vmatpush1.bf16.msra.mxu1 %v1008_v1 }
  0x30   : > { %517 = vmatprep.subr.bf16.mxu0 %v1009_v3  ;;  %573 = vmatprep.subr.bf16.mxu1 %v1009_v3 }
  0x31   : > { %547 = vmatprep.mubr.bf16.mxu0 %v1083_v2  ;;  %603 = vmatprep.mubr.bf16.mxu1 %v1083_v2 }
  0x33   : > { %518 = vmatpush1.bf16.msra.mxu0 %v1011_v4  ;;  %574 = vmatpush1.bf16.msra.mxu1 %v1011_v4 }
  0x34   : > { %519 = vmatprep.subr.bf16.mxu0 %v1012_v5  ;;  %575 = vmatprep.subr.bf16.mxu1 %v1012_v5 }
  0x37   : > { %520 = vmatpush1.bf16.msra.mxu0 %v1014_v6  ;;  %576 = vmatpush1.bf16.msra.mxu1 %v1014_v6 }
  0x38   : > { %521 = vmatprep.subr.bf16.mxu0 %v1015_v7  ;;  %577 = vmatprep.subr.bf16.mxu1 %v1015_v7  ;;  %v778_v7 = vrot.slane %v769_v57, %v777_v60 }
  0x3b   : > { %522 = vmatpush1.bf16.msra.mxu0 %v1017_v8  ;;  %578 = vmatpush1.bf16.msra.mxu1 %v1017_v8 }
  0x3c   : > { %523 = vmatprep.subr.bf16.mxu0 %v1018_v9  ;;  %579 = vmatprep.subr.bf16.mxu1 %v1018_v9 }
  0x3f   : > { %524 = vmatpush1.bf16.msra.mxu0 %v1020_v10  ;;  %580 = vmatpush1.bf16.msra.mxu1 %v1020_v10 }
  0x40   : > { %525 = vmatprep.subr.bf16.mxu0 %v1021_v11  ;;  %581 = vmatprep.subr.bf16.mxu1 %v1021_v11 }
  0x43   : > { %526 = vmatpush1.bf16.msra.mxu0 %v1023_v12  ;;  %582 = vmatpush1.bf16.msra.mxu1 %v1023_v12 }
  0x44   : > { %527 = vmatprep.subr.bf16.mxu0 %v1024_v13  ;;  %583 = vmatprep.subr.bf16.mxu1 %v1024_v13 }
  0x47   : > { %528 = vmatpush1.bf16.msra.mxu0 %v1026_v14  ;;  %584 = vmatpush1.bf16.msra.mxu1 %v1026_v14 }
  0x48   : > { %529 = vmatprep.subr.bf16.mxu0 %v1027_v15  ;;  %585 = vmatprep.subr.bf16.mxu1 %v1027_v15 }
  0x4b   : > { %530 = vmatpush1.bf16.msra.mxu0 %v1029_v16  ;;  %586 = vmatpush1.bf16.msra.mxu1 %v1029_v16 }
  0x4c   : > { %722 = vmatprep.subr.bf16.mxu0 %v1035_v19 }
  0x4e   : > { %548 = vmatmul.mubr.bf16.vlgmr.msra.gmra.mxu0 %v1032_v20  ;;  %604 = vmatmul.mubr.bf16.vlgmr.msra.gmra.mxu1 %v1036_v21 }
  0x4f   : > { %723 = vmatpush1.bf16.msra.mxu0 %v1033_v22  ;;  %754 = vmatprep.mubr.bf16.mxu0 %v1083_v2  ;;  %v774_v2 = vrot.slane %v769_v57, %v773_v56 }
  0x50   : > { %724 = vmatprep.subr.bf16.mxu0 %v1039_v23 }
  0x53   : > { %725 = vmatpush1.bf16.msra.mxu0 %v1037_v24 }
  0x54   : > { %726 = vmatprep.subr.bf16.mxu0 %v1042_v25 }
  0x57   : > { %727 = vmatpush1.bf16.msra.mxu0 %v1040_v26 }
  0x58   : > { %728 = vmatprep.subr.bf16.mxu0 %v1045_v27 }
  0x5b   : > { %729 = vmatpush1.bf16.msra.mxu0 %v1043_v28 }
  0x5c   : > { %730 = vmatprep.subr.bf16.mxu0 %v1048_v29 }
  0x5f   : > { %731 = vmatpush1.bf16.msra.mxu0 %v1046_v30 }
  0x60   : > { %732 = vmatprep.subr.bf16.mxu0 %v1051_v31 }
  0x63   : > { %733 = vmatpush1.bf16.msra.mxu0 %v1049_v32 }
  0x64   : > { %734 = vmatprep.subr.bf16.mxu0 %v1054_v33 }
  0x67   : > { %735 = vmatpush1.bf16.msra.mxu0 %v1052_v34 }
  0x68   : > { %736 = vmatprep.subr.bf16.mxu0 %v1057_v35 }
  0x6b   : > { %737 = vmatpush1.bf16.msra.mxu0 %v1055_v36 }
  0x6e   : > { %755 = vmatmul.mubr.bf16.vlgmr.msra.gmra.mxu0 %v1058_v37 }
  0xee   : > { %v441_v38 = vpop.f32.mrf.mxu0  ;;  %v493_v39 = vpop.f32.mrf.mxu1 }
  0xef   : > { %v502_v51 = vmax.f32 %v441_v38, %v493_v39 }
  0xf0   : > { %v443_v40 = vpop.f32.mrf.mxu0  ;;  %v495_v41 = vpop.f32.mrf.mxu1 }
  0xf1   : > { %v503_v54 = vmax.f32 %v443_v40, %v495_v41 }
  0xf2   : > { %v445_v42 = vpop.f32.mrf.mxu0  ;;  %v497_v43 = vpop.f32.mrf.mxu1 }
  0xf3   : > { %v504_v58 = vmax.f32 %v445_v42, %v497_v43 }
  0xf4   : > { %v447_v44 = vpop.f32.mrf.mxu0  ;;  %v499_v47 = vpop.f32.mrf.mxu1 }
  0xf5   : > { %v505_v63 = vmax.f32 %v447_v44, %v499_v47 }
 0x10e   : > { %v549_v45 = vpop.f32.mrf.mxu0  ;;  %v605_v49 = vpop.f32.mrf.mxu1 }
 0x10f   : > { %v558_v55 = vmax.f32 %v502_v51, %v549_v45 }
 0x110   : > { %v551_v48 = vpop.f32.mrf.mxu0  ;;  %v607_v53 = vpop.f32.mrf.mxu1 }
 0x111   : > { %v559_v59 = vmax.f32 %v503_v54, %v551_v48  ;;  %v614_v0 = vmax.f32 %v558_v55, %v605_v49 }
 0x112   : > { %v553_v52 = vpop.f32.mrf.mxu0  ;;  %v609_v62 = vpop.f32.mrf.mxu1 }
 0x113   : > { %v560_v1 = vmax.f32 %v504_v58, %v553_v52  ;;  %v615_v4 = vmax.f32 %v559_v59, %v607_v53 }
 0x114   : > { %v555_v61 = vpop.f32.mrf.mxu0  ;;  %v611_v8 = vpop.f32.mrf.mxu1 }
 0x115   : > { %v561_v5 = vmax.f32 %v505_v63, %v555_v61  ;;  %v616_v10 = vmax.f32 %v560_v1, %v609_v62 }
 0x117   : > { %v617_v14 = vmax.f32 %v561_v5, %v611_v8 }
 0x12e   : > { %v756_v3 = vpop.f32.mrf.mxu0 }
 0x12f   : > { %v765_v6 = vadd.f32 %v756_v3, %v614_v0 }
 0x130   : > { %v758_v9 = vpop.f32.mrf.mxu0 }
 0x131   : > { %v781_v11 = vadd.f32 %v774_v2, %v765_v6  ;;  %v766_v12 = vadd.f32 %v758_v9, %v615_v4 }
 0x132   : > { %v760_v13 = vpop.f32.mrf.mxu0 }
 0x133   : > { %v785_v15 = vmul.f32 0.2, %v781_v11  ;;  %v782_v16 = vadd.f32 %v778_v7, %v766_v12  ;;  %v767_v17 = vadd.f32 %v760_v13, %v616_v10 }
 0x134   : > { %v762_v18 = vpop.f32.mrf.mxu0 }
 0x135   : > { %v786_v19 = vmul.f32 0.2, %v782_v16  ;;  %v783_v20 = vadd.f32 %v774_v2, %v767_v17  ;;  %v768_v21 = vadd.f32 %v762_v18, %v617_v14  ;;  %v789_v22 = vmax.f32 %v781_v11, %v785_v15 }
 0x137   : > { %v790_v23 = vmax.f32 %v782_v16, %v786_v19  ;;  %v787_v24 = vmul.f32 0.2, %v783_v20  ;;  %v784_v25 = vadd.f32 %v778_v7, %v768_v21 }
 0x139   : > { %v979_v26 = vpack.c.bf16 %v790_v23, %v789_v22  ;;  %v788_v27 = vmul.f32 0.2, %v784_v25  ;;  %v791_v28 = vmax.f32 %v783_v20, %v787_v24 }
 0x13b   : > { %805 = vst [vmem:[%s300_s11] sm:$0xff] %v979_v26  ;;  %v792_v29 = vmax.f32 %v784_v25, %v788_v27 }
 0x13d   : > { %v980_v30 = vpack.c.bf16 %v792_v29, %v791_v28 }
 0x13f   : > { %806 = vst [vmem:[%s300_s11 + $0x8] sm:$0xff] %v980_v30 }
 0x140 PF: > { %s15_s20 = sadd.s32 1, %s1081_s20   ;;  %s1274_s18 = smov %s1077_s19 }
 0x141   : > { %p12_p5 = scmp.ge.s32.totalorder %s15_s20, 4   ;;  %s1275_s19 = smov %s1277_s21 }
 0x143   :  { %14 = sbr.rel (!%p12_p5) target bundleno = 2 (0x2), region = 76 }

// kernel: dgcnn_forward.17
= control target key start
LH: loop header
LB: loop body
LE: loop exit
PB: predicated region body
PF: predicated region fallthrough
CT: control target
= control target key end

     0   :  { %14 = vsyncpa [#allocation3], 0  ;;  %s1912_s0 = inlined_call_operand.vmem [shape: bf16[2,16,64], index: 0, kind: input, shape index: {}]   ;;  %s1913_s1 = inlined_call_operand.vmem [shape: bf16[2,16,64], index: 1, kind: input, shape index: {}]   ;;  %s1914_s2 = inlined_call_operand.vmem [shape: bf16[2,16,128], index: 2, kind: input, shape index: {}]   ;;  %s1915_s3 = inlined_call_operand.vmem [shape: bf16[2,16,256], index: 3, kind: input, shape index: {}]   ;;  %s1916_s4 = inlined_call_operand.vmem [shape: bf16[64,32], index: 4, kind: input, shape index: {}]   ;;  %s1917_s5 = inlined_call_operand.vmem [shape: bf16[64,32], index: 5, kind: input, shape index: {}]   ;;  %s1918_s6 = inlined_call_operand.vmem [shape: bf16[128,32], index: 6, kind: input, shape index: {}]   ;;  %s1919_s7 = inlined_call_operand.vmem [shape: bf16[256,32], index: 7, kind: input, shape index: {}]   ;;  %s1920_s8 = inlined_call_operand.vmem [shape: f32[1,32], index: 8, kind: input, shape index: {}]   ;;  %s1921_s9 = inlined_call_operand.hbm [shape: f32[2,16,32], index: 9, kind: output, shape index: {}]  }
   0x1   :  { %16 = vsyncpa [#allocation3 + $0x1], 0  ;;  %s1659_s30 = smov 0   ;;  %s1661_s10 = smov 0  }
   0x2   :  { %s1663_s11 = smov 0   ;;  %s1665_s12 = smov 0  }
   0x3   :  { %s1667_s13 = smov 0   ;;  %s1669_s14 = smov 0  }
   0x4 LB: > { %1924 = sst [smem:[#allocation5_spill]] %s1598_s13  ;;  %s1275_s15 = sadd.s32 4294967295, %s1602_s14   ;;  %s1602_s14 = sphi %s1669_s14, %s22_s14   ;;  %s1598_s13 = sphi %s1667_s13, %s1935_s13   ;;  %s1594_s12 = sphi %s1665_s12, %s1930_s12   ;;  %s1590_s11 = sphi %s1663_s11, %s1934_s11   ;;  %s1586_s10 = sphi %s1661_s10, %s1933_s10   ;;  %s1582_s30 = sphi %s1659_s30, %s1932_s30  }
   0x5   : > { %s1276_s16 = sadd.s32 4294967294, %s1602_s14   ;;  %s41_s17 = sadd.s32 1, %s1598_s13 }
   0x6   : > { %s294_s18 = sadd.s32 1, %s1590_s11  ;;  %p43_p0 = scmp.ge.s32.totalorder %s41_s17, 2 }
   0x7   : > { %p304_p1 = scmp.ne.s32.totalorder %s1590_s11, %s1586_s10  ;;  %p305_p2 = scmp.eq.s32.totalorder %s1275_s15, 1 }
   0x8   : > { %p310_p3 = scmp.ne.s32.totalorder %s1586_s10, %s1582_s30  ;;  %s1937_s17 = smov (%p43_p0, %s41_s17), 0 }
   0x9   : > { %1925 = sst [smem:[#allocation6_spill]] %s1937_s17  ;;  %p1699_p4 = por %p305_p2, %p304_p1 }
   0xa   : > { %p311_p5 = scmp.eq.s32.totalorder %s1276_s16, 1  ;;  %s287_s20 = ssub.s32 %s1598_s13, %s1937_s17 }
   0xb   : > { %p1284_p6 = scmp.ge.s32.totalorder %s1602_s14, 1  ;;  %p292_p7 = scmp.eq.s32.totalorder %s287_s20, 0 }
   0xc   : > { %p1706_p8 = por %p311_p5, %p310_p3  ;;  %p416_p9 = scmp.lt.s32.totalorder %s1602_s14, 3 }
   0xd   : > { %s1712_s22 = scalar_select %p292_p7, %s1590_s11, %s294_s18  }
   0xe   : > { %p417_p10 = pnand %p1284_p6, %p416_p9 }
   0xf   : > { %1928 = sst [smem:[#allocation7_spill]] %s1712_s22  ;;  %p504_p11 = scmp.lt.s32.totalorder (!%p417_p10), %s1594_s12, 1 }
  0x10   : > { %420 = sbr.rel (%p417_p10) target bundleno = 294 (0x126), region = 56  ;;  %s1343_s29 = sshll.u32 (!%p417_p10), %s1594_s12, 8 }
  0x11   : > { %s1863_s24 = scalar_lea.hbm (!%p417_p10), %s1921_s9, %s1343_s29 }
  0x15   : > { %v1488_v0 = vld [vmem:[%s1917_s5 + $0x18] sm:$0xff]   ;;  %v1604_v1 = vmov 0.0   ;;  %v1490_v3 = vld [vmem:[%s1917_s5 + $0x10] sm:$0xff]   ;;  %vm1605_vm0 = vmmov 0   ;;  %s1736_s16 = scalar_select %p504_p11, %s1594_s12, 1  ;;  %v1492_v5 = vld [vmem:[%s1917_s5 + $0x8] sm:$0xff]  }
  0x16   : > { %1385 = vmatprep.subr.bf16.mxu0 %v1604_v1  ;;  %1397 = vmatprep.subr.bf16.mxu1 %v1604_v1  ;;  %v1489_v2 = vld [vmem:[%s1916_s4 + $0x18] sm:$0xff]   ;;  %v1491_v4 = vld [vmem:[%s1916_s4 + $0x10] sm:$0xff]   ;;  %v1493_v6 = vld [vmem:[%s1916_s4 + $0x8] sm:$0xff]   ;;  %vm614_vm1 = vcmask 523264   ;;  %vm1043_vm2 = vcmask 261120   ;;  %s1606_s12 = smov [#allocation2]  }
  0x17   : > { %1386 = vmatpush3.bf16.msra.mxu0 %v1488_v0  ;;  %1393 = vmatprep.mubr.msk.bf16.mxu0 %vm1605_vm0, %v1604_v1  ;;  %s1742_s23 = sshll.u32 %s1736_s16, 3  ;;  %v1494_v7 = vld [vmem:[%s1917_s5] sm:$0xff]   ;;  %v1498_v10 = vld [vmem:[%s1919_s7 + $0x78] sm:$0xff]   ;;  %v1501_v14 = vld [vmem:[%s1919_s7 + $0x70] sm:$0xff]   ;;  %s1342_s17 = sshll.u32 %s1736_s16, 4 }
  0x18   : > { %1398 = vmatpush3.bf16.msra.mxu1 %v1489_v2  ;;  %1387 = vmatprep.subr.bf16.mxu0 %v1604_v1  ;;  %s521_s28 = scalar_lea.vmem %s1913_s1, %s1742_s23  ;;  %s511_s18 = scalar_lea.vmem %s1912_s0, %s1742_s23  ;;  %v1495_v8 = vld [vmem:[%s1916_s4] sm:$0xff]   ;;  %v1499_v12 = vld [vmem:[%s1918_s6 + $0x38] sm:$0xff]   ;;  %v1502_v15 = vld [vmem:[%s1918_s6 + $0x30] sm:$0xff]  }
  0x19   : > { %1399 = vmatprep.subr.bf16.mxu1 %v1604_v1  ;;  %1405 = vmatprep.mubr.msk.bf16.mxu1 %vm1605_vm0, %v1604_v1  ;;  %v1496_v9 = vld [vmem:[%s521_s28] sm:$0xff]   ;;  %v1500_v13 = vld [vmem:[%s1919_s7 + $0x38] sm:$0xff]   ;;  %v1503_v16 = vld [vmem:[%s1919_s7 + $0x30] sm:$0xff]   ;;  %s542_s16 = scalar_lea.vmem %s1915_s3, %s1342_s17  ;;  %s531_s27 = scalar_lea.vmem %s1914_s2, %s1742_s23 }
  0x1a   : > { %v1497_v11 = vld [vmem:[%s511_s18] sm:$0xff]   ;;  %v1504_v17 = vld [vmem:[%s1919_s7 + $0x68] sm:$0xff]   ;;  %v1510_v23 = vld [vmem:[%s1919_s7 + $0x58] sm:$0xff]   ;;  %s1530_s13 = sshll.u32 %s1606_s12, 4  ;;  %s1531_s13 = int_to_ptr.vmem [resolvable:$false] %s1530_s13 }
  0x1b   : > { %1388 = vmatpush3.bf16.msra.mxu0 %v1490_v3  ;;  %v1505_v18 = vld [vmem:[%s1918_s6 + $0x28] sm:$0xff]   ;;  %v1507_v20 = vld [vmem:[%s1919_s7 + $0x60] sm:$0xff]   ;;  %v1511_v24 = vld [vmem:[%s1918_s6 + $0x18] sm:$0xff]   ;;  %s1532_s22 = scalar_lea.vmem %s1531_s13, 512 }
  0x1c   : > { %1400 = vmatpush3.bf16.msra.mxu1 %v1491_v4  ;;  %1389 = vmatprep.subr.bf16.mxu0 %v1604_v1  ;;  %v1506_v19 = vld [vmem:[%s1919_s7 + $0x28] sm:$0xff]   ;;  %v1508_v21 = vld [vmem:[%s1918_s6 + $0x20] sm:$0xff]   ;;  %v1512_v25 = vld [vmem:[%s1919_s7 + $0x18] sm:$0xff]  }
  0x1d   : > { %1401 = vmatprep.subr.bf16.mxu1 %v1604_v1  ;;  %v1509_v22 = vld [vmem:[%s1919_s7 + $0x20] sm:$0xff]   ;;  %v1513_v26 = vld [vmem:[%s1919_s7 + $0x50] sm:$0xff]   ;;  %v1516_v30 = vld [vmem:[%s1919_s7 + $0x48] sm:$0xff]  }
  0x1e   : > { %v1514_v27 = vld [vmem:[%s1918_s6 + $0x10] sm:$0xff]   ;;  %v1524_v29 = vld [vmem:[%s542_s16 + $0x4] ss:$8 sps:$4 sm:$0xff]   ;;  %v1522_v37 = vld [vmem:[%s542_s16] ss:$8 sps:$4 sm:$0xff]   ;;  %s500_s16 = sand.u32 1, %s1586_s10  }
  0x1f   : > { %1390 = vmatpush3.bf16.msra.mxu0 %v1492_v5  ;;  %v1515_v28 = vld [vmem:[%s1919_s7 + $0x10] sm:$0xff]   ;;  %v1517_v31 = vld [vmem:[%s1918_s6 + $0x8] sm:$0xff]   ;;  %v1519_v33 = vld [vmem:[%s1919_s7 + $0x40] sm:$0xff]   ;;  %s1285_s17 = sshll.u32 %s500_s16, 4  ;;  %s1867_s25 = scalar_lea.sflag [#allocation3], %s500_s16 }
  0x20   : > { %1402 = vmatpush3.bf16.msra.mxu1 %v1493_v6  ;;  %1391 = vmatprep.subr.bf16.mxu0 %v1604_v1  ;;  %v1518_v32 = vld [vmem:[%s1919_s7 + $0x8] sm:$0xff]   ;;  %v1520_v34 = vld [vmem:[%s1918_s6] sm:$0xff]   ;;  %s502_s15 = scalar_lea.vmem [#allocation2], %s1285_s17 }
  0x21   : > { %1403 = vmatprep.subr.bf16.mxu1 %v1604_v1  ;;  %v1521_v35 = vld [vmem:[%s1919_s7] sm:$0xff]   ;;  %s1063_s18 = sshll.u32 %s502_s15, 4  ;;  %s1865_s18 = int_to_ptr.vmem [resolvable:$true] %s1063_s18 }
  0x22   : > { %v1525_v36 = vld [vmem:[%s531_s27] sm:$0xff]   ;;  %s1526_s26 = scalar_lea.vmem %s1865_s18, 256  ;;  %p1533_p1 = scmp.lt.s32.totalorder %s1865_s18, %s1531_s13 }
  0x23   : > { %1392 = vmatpush3.bf16.msra.mxu0 %v1494_v7  ;;  %v1333_v54 = vld [vmem:[%s1920_s8] ss:$0 sm:$0xff]  ;;  %p1527_p12 = scmp.ne.s32.totalorder %s1865_s18, %s1526_s26  ;;  %p1534_p2 = scmp.lt.s32.totalorder %s1532_s22, %s1526_s26 }
  0x24   : > { %1404 = vmatpush3.bf16.msra.mxu1 %v1495_v8  ;;  %1409 = vmatprep.subr.bf16.mxu0 %v1604_v1 }
  0x25   : > { %1363 = vmatprep.subr.bf16.mxu1 %v1498_v10  ;;  %p1528_p13 = pnand %p1527_p12, %p1699_p4  ;;  %p1535_p3 = por %p1534_p2, %p1533_p1 }
  0x26   : > { %1394 = vmatmul.mubr.msk.bf16.vlgmr.msra.gmra.mxu0 %vm614_vm1, %v1496_v9 }
  0x27   : > { %1406 = vmatmul.mubr.msk.bf16.vlgmr.msra.gmra.mxu1 %vm614_vm1, %v1497_v11  ;;  %1410 = vmatpush3.bf16.msra.mxu0 %v1499_v12  ;;  %p1529_p0 = pneg %p1528_p13 }
  0x28   : > { %1364 = vmatpush3.bf16.msra.mxu1 %v1500_v13  ;;  %1411 = vmatprep.subr.bf16.mxu0 %v1604_v1 }
  0x29   : > { %1365 = vmatprep.subr.bf16.mxu1 %v1501_v14  ;;  %1425 = vmatprep.mubr.msk.bf16.mxu0 %vm1605_vm0, %v1604_v1  ;;  %p1536_p5 = pnand %p1535_p3, %p1529_p0 }
  0x2a   : > { %1019 = vmatprep.mubr.bf16.mxu1 %v1524_v29 }
  0x2b   : > { %1412 = vmatpush3.bf16.msra.mxu0 %v1502_v15 }
  0x2c   : > { %1366 = vmatpush3.bf16.msra.mxu1 %v1503_v16  ;;  %1413 = vmatprep.subr.bf16.mxu0 %v1604_v1 }
  0x2d   : > { %1367 = vmatprep.subr.bf16.mxu1 %v1504_v17 }
  0x2f   : > { %1414 = vmatpush3.bf16.msra.mxu0 %v1505_v18 }
  0x30   : > { %1368 = vmatpush3.bf16.msra.mxu1 %v1506_v19  ;;  %1415 = vmatprep.subr.bf16.mxu0 %v1604_v1 }
  0x31   : > { %1369 = vmatprep.subr.bf16.mxu1 %v1507_v20 }
  0x33   : > { %1416 = vmatpush3.bf16.msra.mxu0 %v1508_v21 }
  0x34   : > { %1370 = vmatpush3.bf16.msra.mxu1 %v1509_v22  ;;  %1417 = vmatprep.subr.bf16.mxu0 %v1604_v1 }
  0x35   : > { %1371 = vmatprep.subr.bf16.mxu1 %v1510_v23 }
  0x37   : > { %1418 = vmatpush3.bf16.msra.mxu0 %v1511_v24 }
  0x38   : > { %1372 = vmatpush3.bf16.msra.mxu1 %v1512_v25  ;;  %1419 = vmatprep.subr.bf16.mxu0 %v1604_v1 }
  0x39   : > { %1373 = vmatprep.subr.bf16.mxu1 %v1513_v26 }
  0x3b   : > { %1420 = vmatpush3.bf16.msra.mxu0 %v1514_v27 }
  0x3c   : > { %1374 = vmatpush3.bf16.msra.mxu1 %v1515_v28  ;;  %1421 = vmatprep.subr.bf16.mxu0 %v1604_v1 }
  0x3d   : > { %1375 = vmatprep.subr.bf16.mxu1 %v1516_v30 }
  0x3f   : > { %1422 = vmatpush3.bf16.msra.mxu0 %v1517_v31 }
  0x40   : > { %1376 = vmatpush3.bf16.msra.mxu1 %v1518_v32  ;;  %1423 = vmatprep.subr.bf16.mxu0 %v1604_v1 }
  0x41   : > { %1377 = vmatprep.subr.bf16.mxu1 %v1519_v33 }
  0x43   : > { %1424 = vmatpush3.bf16.msra.mxu0 %v1520_v34 }
  0x44   : > { %1378 = vmatpush3.bf16.msra.mxu1 %v1521_v35 }
  0x46   : > { %1426 = vmatmul.mubr.bf16.vlgmr.msra.gmra.mxu0 %v1525_v36 }
  0x47   : > { %1020 = vmatmul.mubr.bf16.vlgmr.msra.gmra.mxu1 %v1522_v37 }
  0xe6   : > { %v652_v38 = vpop.f32.mrf.mxu0 }
  0xe7   : > { %v725_v39 = vpop.f32.mrf.mxu1 }
  0xe8   : > { %v1395_v40 = vpop.f32.mrf.mxu0  ;;  %v726_v48 = vadd.f32 %v725_v39, %v652_v38 }
  0xe9   : > { %v1407_v41 = vpop.f32.mrf.mxu1 }
  0xea   : > { %v655_v42 = vpop.f32.mrf.mxu0 }
  0xeb   : > { %v728_v43 = vpop.f32.mrf.mxu1 }
  0xec   : > { %v1396_v44 = vpop.f32.mrf.mxu0  ;;  %v729_v56 = vadd.f32 %v728_v43, %v655_v42 }
  0xed   : > { %v1408_v45 = vpop.f32.mrf.mxu1 }
 0x106   : > { %v838_v46 = vpop.f32.mrf.mxu0 }
 0x107   : > { %v1379_v47 = vpop.f32.mrf.mxu1  ;;  %v845_v51 = vadd.f32 %v838_v46, %v726_v48 }
 0x108   : > { %v1427_v49 = vpop.f32.mrf.mxu0 }
 0x109   : > { %v1380_v50 = vpop.f32.mrf.mxu1 }
 0x10a   : > { %v1381_v52 = vadd.f32 %v1380_v50, %v1379_v47  ;;  %v841_v53 = vpop.f32.mrf.mxu0 }
 0x10b   : > { %v1382_v55 = vpop.f32.mrf.mxu1  ;;  %v846_v61 = vadd.f32 %v841_v53, %v729_v56 }
 0x10c   : > { %v1028_v57 = vadd.f32 %v1381_v52, %v845_v51  ;;  %v1428_v58 = vpop.f32.mrf.mxu0 }
 0x10d   : > { %v1383_v59 = vpop.f32.mrf.mxu1 }
 0x10e   : > { %v1037_v60 = vadd.f32 %v1333_v54, %v1028_v57  ;;  %v1384_v62 = vadd.f32 %v1383_v59, %v1382_v55 }
 0x110   : > { %v1039_v63 = vmul.f32 0.2, %v1037_v60  ;;  %v1029_v0 = vadd.f32 %v1384_v62, %v846_v61 }
 0x112   : > { %v1041_v1 = vmax.f32 %v1037_v60, %v1039_v63  ;;  %v1038_v2 = vadd.f32 %v1333_v54, %v1029_v0 }
 0x114   : > { %1044 = vst.msk [vmem:[%s502_s15] sm:$0xff] %vm1043_vm2, %v1041_v1  ;;  %v1040_v3 = vmul.f32 0.2, %v1038_v2 }
 0x116   : > { %v1042_v4 = vmax.f32 %v1038_v2, %v1040_v3 }
 0x118   : > { %1045 = vst.msk [vmem:[%s502_s15 + $0x8] sm:$0xff] %vm1043_vm2, %v1042_v4 }
 0x119   : > { %1539 = shalt.err (!%p1536_p5)
}
 0x11a   : > { %s1540_s16 = scalar_lea.hbm %s1863_s24, 256  ;;  %s1544_s17 = scalar_lea.hbm %s1921_s9, 512 }
 0x11b   : > { %p1541_p6 = scmp.ne.s32.totalorder %s1863_s24, %s1540_s16  ;;  %p1545_p10 = scmp.lt.s32.totalorder %s1863_s24, %s1921_s9 }
 0x11c   : > { %p1546_p11 = scmp.lt.s32.totalorder %s1544_s17, %s1540_s16 }
 0x11d   : > { %p1542_p7 = pnand %p1541_p6, %p1699_p4 }
 0x11e   : > { %p1547_p12 = por %p1546_p11, %p1545_p10 }
 0x11f   : > { %p1543_p9 = pneg %p1542_p7 }
 0x121   : > { %p1548_p13 = pnand %p1547_p12, %p1543_p9 }
 0x123   : > { %1551 = shalt.err (!%p1548_p13)
}
 0x124   : > { %s1607_s23 = smov 128   ;;  %s1608_s20 = smov 8  }
 0x125   : > { %1429 = dma.vmem_to_hbm [thread:$0]  (%p1699_p4), %s1865_s18, 256, %s1863_s24, %s1867_s25, %s1607_s23, %s1607_s23, %s1608_s20  }
 0x126 PF: > { %p1435_p0 = scmp.ge.s32.totalorder %s1602_s14, 2  ;;  %s1078_s26 = sand.u32 1, %s1582_s30  }
 0x127   : > { %s1079_s12 = scalar_lea.sflag [#allocation3], %s1078_s26 }
 0x128   : > { %p1432_p1 = pnand %p1435_p0, %p1706_p8 }
 0x12a   : > { %p1433_p2 = pneg %p1432_p1 }
 0x12c   : > { %1577 = dma.done.wait (%p1433_p2), %s1079_s12, 256  }
 0x12d   : > { %1579 = vsyncadd (%p1433_p2), %s1079_s12, 4294967040  ;;  %s22_s14 = sadd.s32 1, %s1602_s14   ;;  %s1929_s13 = sld [smem:[#allocation7_spill]] }
 0x12e   : > { %p19_p3 = scmp.ge.s32.totalorder %s22_s14, 4   ;;  %s1930_s12 = sld [smem:[#allocation5_spill]] }
 0x12f   : > { %s1931_s19 = sld [smem:[#allocation6_spill]]  ;;  %s1932_s30 = smov %s1586_s10 }
 0x130   : > { %s1933_s10 = smov %s1590_s11 }
 0x131   :  { %21 = sbr.rel (!%p19_p3) target bundleno = 4 (0x4), region = 115 }
 0x133   : > { %s1934_s11 = smov %s1929_s13 }
 0x135   : > { %s1935_s13 = smov %s1931_s19 }
 0x136   :  { %1084 = vsyncpa [#allocation3], 1 }
 0x137   :  { %1086 = vsyncpa [#allocation3 + $0x1], 1 }

</bundles_post_ra>
